<compile_context>
chip_gen: v5e
topology: v5e:2x2
jax: 0.10.0
libtpu: 0.0.40
codegen_flags: <defaults>
</compile_context>

<pallas_src>
import functools

import jax
import jax.numpy as jnp
from jax.experimental import pallas as pl
from jax.experimental.pallas import tpu as pltpu


def _round_up(x, m):
    return (x + m - 1) // m * m


# ----------------------------------------------------------------------------
# Pallas kernel 1: tiled  out = act(x @ W + b)
# ----------------------------------------------------------------------------
def _matmul_bias_act_kernel(x_ref, w_ref, b_ref, o_ref, *, act):
    # bf16 x bf16 -> f32 accumulate on the MXU; bias add + activation in f32.
    y = jnp.dot(x_ref[...], w_ref[...], preferred_element_type=jnp.float32)
    y = y + b_ref[...]
    if act == "relu":
        y = jnp.maximum(y, 0.0)
    elif act == "sigmoid":
        y = jax.nn.sigmoid(y)
    o_ref[...] = y.astype(o_ref.dtype)


def matmul_bias_act(x, w_mat, b_row, *, act, out_dtype):
    """x: (M, K) bf16, w_mat: (K, Np) bf16, b_row: (1, Np) f32 -> (M, Np).

    K is NOT padded in HBM (blocks span the full K dim); only M is padded up to
    the tile size.  Output dtype is bf16 for intermediate layers, f32 for the
    final sigmoid layer.
    """
    M, K = x.shape
    Np = w_mat.shape[1]
    TM = min(512, _round_up(M, 8))
    Mp = _round_up(M, TM)
    x = x.astype(jnp.bfloat16)
    if Mp != M:
        x = jnp.pad(x, ((0, Mp - M), (0, 0)))

    out = pl.pallas_call(
        functools.partial(_matmul_bias_act_kernel, act=act),
        out_shape=jax.ShapeDtypeStruct((Mp, Np), out_dtype),
        grid=(Mp // TM,),
        in_specs=[
            pl.BlockSpec((TM, K), lambda i: (i, 0)),    # patches, K = full dim
            pl.BlockSpec((K, Np), lambda i: (0, 0)),    # weights, grid-invariant
            pl.BlockSpec((1, Np), lambda i: (0, 0)),    # bias row
        ],
        out_specs=pl.BlockSpec((TM, Np), lambda i: (i, 0)),
        compiler_params=pltpu.CompilerParams(
            dimension_semantics=("parallel",)),
    )(x, w_mat, b_row)
    return out[:M]


# ----------------------------------------------------------------------------
# Pallas kernel 2: fused bottleneck  relu((x @ W1 + b1) @ W2 + b2), M-tiled
# ----------------------------------------------------------------------------
def _bottleneck_kernel(x_ref, w1_ref, b1_ref, w2_ref, b2_ref, o_ref):
    z = jnp.dot(x_ref[...], w1_ref[...],
                preferred_element_type=jnp.float32) + b1_ref[...]
    y = jnp.dot(z.astype(jnp.bfloat16), w2_ref[...],
                preferred_element_type=jnp.float32) + b2_ref[...]
    o_ref[...] = jnp.maximum(y, 0.0).astype(o_ref.dtype)


def bottleneck(x_nhwc, bn, *, kh, cout, out_dtype=jnp.bfloat16):
    """Fused Conv2d(Cin->C1, k) over the whole k x k input (-> 1x1) followed by
    ConvTranspose2d(C1->C2, k) back to k x k, with the trailing ReLU."""
    w1, b1, w2, b2 = bn
    Nb, H, W, Cin = x_nhwc.shape
    K1 = H * W * Cin
    C1 = w1.shape[1]
    N2 = w2.shape[1]

    x_flat = x_nhwc.astype(jnp.bfloat16).reshape(Nb, K1)
    TM = min(256, _round_up(Nb, 8))
    Mp = _round_up(Nb, TM)
    if Mp != Nb:
        x_flat = jnp.pad(x_flat, ((0, Mp - Nb), (0, 0)))

    out = pl.pallas_call(
        _bottleneck_kernel,
        out_shape=jax.ShapeDtypeStruct((Mp, N2), out_dtype),
        grid=(Mp // TM,),
        in_specs=[
            pl.BlockSpec((TM, K1), lambda i: (i, 0)),
            pl.BlockSpec((K1, C1), lambda i: (0, 0)),
            pl.BlockSpec((1, C1), lambda i: (0, 0)),
            pl.BlockSpec((C1, N2), lambda i: (0, 0)),
            pl.BlockSpec((1, N2), lambda i: (0, 0)),
        ],
        out_specs=pl.BlockSpec((TM, N2), lambda i: (i, 0)),
        compiler_params=pltpu.CompilerParams(
            dimension_semantics=("parallel",)),
    )(x_flat, w1, b1, w2, b2)
    return out[:Nb].reshape(Nb, kh, kh, cout)


# ----------------------------------------------------------------------------
# Plain-JAX glue: im2col (stride handled here; K ordering is (kh, kw, Cin))
# ----------------------------------------------------------------------------
def _im2col(x_nhwc, kh, kw, stride):
    N, H, W, C = x_nhwc.shape
    Ho = (H - kh) // stride + 1
    Wo = (W - kw) // stride + 1
    cols = []
    for i in range(kh):
        for j in range(kw):
            cols.append(
                x_nhwc[:, i:i + (Ho - 1) * stride + 1:stride,
                       j:j + (Wo - 1) * stride + 1:stride, :])
    patches = jnp.concatenate(cols, axis=-1).reshape(N * Ho * Wo, kh * kw * C)
    return patches, (N, Ho, Wo)


# ----------------------------------------------------------------------------
# One-time weight preparation (hoisted out of the forward pass)
# ----------------------------------------------------------------------------
def _prep_conv(w, b, pad_n=True):
    """Conv2d weight (Cout, Cin, kh, kw) -> matmul form (kh*kw*Cin, Np) bf16 +
    bias row (1, Np) f32.  Only the lane (N) dim is padded (to 128)."""
    cout, cin, kh, kw = w.shape
    K = kh * kw * cin
    wm = jnp.transpose(w, (2, 3, 1, 0)).reshape(K, cout)
    Np = _round_up(cout, 128) if pad_n else cout
    wm = jnp.pad(wm, ((0, 0), (0, Np - cout)))
    br = jnp.pad(b, (0, Np - cout)).reshape(1, Np)
    return wm.astype(jnp.bfloat16), br.astype(jnp.float32)


def _prep_convT_s2(w, b, pad_n=True):
    """ConvTranspose2d(k=3, stride=2, padding=1, output_padding=1) weight
    (Cin, Cout, 3, 3) -> sub-pixel combined weight (4*Cin, Np) bf16 mapping a
    2x2 window of the undilated input to the 4 output phases (p, q, Cout)."""
    cin, cout, kh, kw = w.shape
    assert kh == 3 and kw == 3
    # wf[i, j, ci, co] = w[ci, co, 2 - i, 2 - j]  (flipped, channel-swapped)
    wf = jnp.transpose(w[:, :, ::-1, ::-1], (2, 3, 0, 1)).astype(jnp.float32)

    W_all = jnp.zeros((2, 2, cin, 2, 2, cout), jnp.float32)
    for a in (0, 1):            # patch row offset
        for bb in (0, 1):       # patch col offset
            for p in (0, 1):    # output row phase
                for q in (0, 1):  # output col phase
                    if (p == 0 and a == 1) or (q == 0 and bb == 1):
                        continue
                    i = 1 if p == 0 else 2 * a
                    j = 1 if q == 0 else 2 * bb
                    W_all = W_all.at[a, bb, :, p, q, :].set(wf[i, j])

    K, N = 4 * cin, 4 * cout
    wm = W_all.reshape(K, N)
    br = jnp.broadcast_to(b[None, None, :], (2, 2, cout)).reshape(N)
    Np = _round_up(N, 128) if pad_n else N
    wm = jnp.pad(wm, ((0, 0), (0, Np - N)))
    br = jnp.pad(br, (0, Np - N)).reshape(1, Np)
    return wm.astype(jnp.bfloat16), br.astype(jnp.float32)


def _prep_bottleneck(e3w, e3b, d1w, d1b):
    c1, cin, kh, kw = e3w.shape            # (64, 32, 7, 7)
    _, c2, kh2, kw2 = d1w.shape            # (64, 32, 7, 7)
    w1 = jnp.transpose(e3w, (2, 3, 1, 0)).reshape(kh * kw * cin, c1)
    b1 = e3b.reshape(1, c1)
    w2 = jnp.transpose(d1w, (0, 2, 3, 1)).reshape(c1, kh2 * kw2 * c2)
    b2 = jnp.broadcast_to(d1b[None, :], (kh2 * kw2, c2)).reshape(1, kh2 * kw2 * c2)
    return (w1.astype(jnp.bfloat16), b1.astype(jnp.float32),
            w2.astype(jnp.bfloat16), b2.astype(jnp.float32))


def prepare_params(params):
    """Run once, outside the jitted forward, so weight layout / bias-fold /
    bf16-cast work is not re-emitted every step."""
    return {
        "e1": _prep_conv(*params["e1"]),
        "e2": _prep_conv(*params["e2"]),
        "bn": _prep_bottleneck(*params["e3"], *params["d1"]),
        "d2": _prep_convT_s2(*params["d2"]),
        "d3": _prep_convT_s2(*params["d3"], pad_n=False),  # final: 12 real lanes
        # fallback path (bottleneck input not 7x7): e3 / d1 as plain convs
        "e3c": _prep_conv(*params["e3"]),
        "d1c": _prep_conv(
            jnp.transpose(jnp.flip(params["d1"][0], axis=(2, 3)), (1, 0, 2, 3)),
            params["d1"][1]),
    }


# ----------------------------------------------------------------------------
# Layer wrappers (PyTorch Conv2d / ConvTranspose2d semantics)
# ----------------------------------------------------------------------------
def conv2d(x_nhwc, w_mat, b_row, *, kh, stride, padding, cout, act,
           out_dtype=jnp.bfloat16):
    x = x_nhwc.astype(jnp.bfloat16)
    if padding:
        x = jnp.pad(x, ((0, 0), (padding, padding), (padding, padding), (0, 0)))
    patches, (Nb, Ho, Wo) = _im2col(x, kh, kh, stride)
    y = matmul_bias_act(patches, w_mat, b_row, act=act, out_dtype=out_dtype)
    return y[:, :cout].reshape(Nb, Ho, Wo, cout)


def conv_transpose2d_s2(x_nhwc, w_mat, b_row, *, cout, act,
                        out_dtype=jnp.bfloat16):
    """ConvTranspose2d(k=3, stride=2, padding=1, output_padding=1) via sub-pixel
    decomposition: output pixel (2u+p, 2v+q) is a stride-1 conv over a 2x2
    window of the *undilated* input; all four phases share one im2col + matmul
    whose lane dim carries (p, q, cout).  No dilation zeros touch HBM / MXU."""
    Nb, Hi, Wi, cin = x_nhwc.shape
    x = jnp.pad(x_nhwc.astype(jnp.bfloat16), ((0, 0), (0, 1), (0, 1), (0, 0)))
    patches, _ = _im2col(x, 2, 2, 1)                      # (Nb*Hi*Wi, 4*cin)
    y = matmul_bias_act(patches, w_mat, b_row, act=act, out_dtype=out_dtype)
    y = y[:, :4 * cout].reshape(Nb, Hi, Wi, 2, 2, cout)
    y = jnp.transpose(y, (0, 1, 3, 2, 4, 5)).reshape(Nb, 2 * Hi, 2 * Wi, cout)
    return y


# ----------------------------------------------------------------------------
# Parameter init (deterministic; mirrors PyTorch default uniform(-1/sqrt(fan_in)))
# ----------------------------------------------------------------------------
def _init_conv(key, cout, cin, k):
    kw_, kb_ = jax.random.split(key)
    bound = 1.0 / jnp.sqrt(cin * k * k)
    w = jax.random.uniform(kw_, (cout, cin, k, k), jnp.float32, -bound, bound)
    b = jax.random.uniform(kb_, (cout,), jnp.float32, -bound, bound)
    return w, b


def _init_convT(key, cin, cout, k):
    kw_, kb_ = jax.random.split(key)
    bound = 1.0 / jnp.sqrt(cout * k * k)   # PyTorch fan_in uses weight.size(1)*k*k
    w = jax.random.uniform(kw_, (cin, cout, k, k), jnp.float32, -bound, bound)
    b = jax.random.uniform(kb_, (cout,), jnp.float32, -bound, bound)
    return w, b


def init_params(key):
    ks = jax.random.split(key, 6)
    return {
        "e1": _init_conv(ks[0], 16, 3, 3),
        "e2": _init_conv(ks[1], 32, 16, 3),
        "e3": _init_conv(ks[2], 64, 32, 7),
        "d1": _init_convT(ks[3], 64, 32, 7),
        "d2": _init_convT(ks[4], 32, 16, 3),
        "d3": _init_convT(ks[5], 16, 3, 3),
    }


# ----------------------------------------------------------------------------
# Full autoencoder forward (input/output NCHW, like the PyTorch module)
# ----------------------------------------------------------------------------
def autoencoder_forward(prep, x_nchw):
    x = jnp.transpose(x_nchw, (0, 2, 3, 1)).astype(jnp.bfloat16)  # NCHW -> NHWC

    # encoder
    x = conv2d(x, *prep["e1"], kh=3, stride=2, padding=1, cout=16, act="relu")
    x = conv2d(x, *prep["e2"], kh=3, stride=2, padding=1, cout=32, act="relu")

    # bottleneck: Conv2d(32,64,7) -> ConvTranspose2d(64,32,7) -> ReLU
    if x.shape[1] == 7 and x.shape[2] == 7:
        x = bottleneck(x, prep["bn"], kh=7, cout=32)      # fused single kernel
    else:
        x = conv2d(x, *prep["e3c"], kh=7, stride=1, padding=0, cout=64, act="none")
        x = conv2d(x, *prep["d1c"], kh=7, stride=1, padding=6, cout=32, act="relu")

    # decoder tail: stride-2 ConvTranspose via sub-pixel decomposition
    x = conv_transpose2d_s2(x, *prep["d2"], cout=16, act="relu")
    x = conv_transpose2d_s2(x, *prep["d3"], cout=3, act="sigmoid",
                            out_dtype=jnp.float32)

    return jnp.transpose(x, (0, 3, 1, 2))                  # NHWC -> NCHW


if __name__ == "__main__":
    key = jax.random.PRNGKey(0)
    k_param, k_x = jax.random.split(key)

    params = init_params(k_param)
    prep = prepare_params(params)     # one-time weight prep (outside jit)

    # 28x28 input so the 7x7 bottleneck conv reduces to 1x1 (MNIST-style sizing).
    x = jax.random.uniform(k_x, (2, 3, 28, 28), jnp.float32)

    fwd = jax.jit(autoencoder_forward)
    y = fwd(prep, x)
    jax.block_until_ready(y)

    assert y.shape == (2, 3, 28, 28), y.shape
    assert y.dtype == jnp.float32
    assert bool(jnp.all(jnp.isfinite(y)))
    assert bool(jnp.all((y >= 0.0) & (y <= 1.0)))  # sigmoid output range
    print("KERNEL_OK")
</pallas_src>

<mosaic_0001>
module attributes {stable_mosaic.version = 11 : i64} {
  func.func @_matmul_bias_act_kernel(%arg0: i32, %arg1: memref<392x27xbf16, #tpu.memory_space<vmem>>, %arg2: memref<27x128xbf16, #tpu.memory_space<vmem>>, %arg3: memref<1x128xf32, #tpu.memory_space<vmem>>, %arg4: memref<392x128xbf16, #tpu.memory_space<vmem>>) attributes {dimension_semantics = [#tpu.dimension_semantics<parallel>], iteration_bounds = array<i64: 1>, scalar_prefetch = 0 : i64, scratch_operands = 0 : i64, tpu.core_type = #tpu.core_type<tc>, window_params = [{transform_indices = @transform_0, window_bounds = array<i64: 392, 27>}, {pipeline_mode = #tpu.pipeline_mode<synchronous>, transform_indices = @transform_1, window_bounds = array<i64: 27, 128>}, {pipeline_mode = #tpu.pipeline_mode<synchronous>, transform_indices = @transform_2, window_bounds = array<i64: 1, 128>}, {transform_indices = @transform_3, window_bounds = array<i64: 392, 128>}]} {
    %c0 = arith.constant 0 : index
    %c0_0 = arith.constant 0 : index
    %0 = vector.load %arg1[%c0, %c0_0] : memref<392x27xbf16, #tpu.memory_space<vmem>>, vector<392x27xbf16>
    %c0_1 = arith.constant 0 : index
    %c0_2 = arith.constant 0 : index
    %1 = vector.load %arg2[%c0_1, %c0_2] : memref<27x128xbf16, #tpu.memory_space<vmem>>, vector<27x128xbf16>
    %cst = arith.constant dense<0.000000e+00> : vector<392x128xf32>
    %2 = tpu.matmul %0, %1, %cst {dimension_numbers = #tpu.dot_dimension_numbers<[1], [0], [0], [1], [0, 0, 1, 1], [], []>} : vector<392x27xbf16>, vector<27x128xbf16>, vector<392x128xf32> -> vector<392x128xf32>
    %c0_3 = arith.constant 0 : index
    %c0_4 = arith.constant 0 : index
    %3 = vector.load %arg3[%c0_3, %c0_4] : memref<1x128xf32, #tpu.memory_space<vmem>>, vector<1x128xf32>
    %4 = vector.broadcast %3 : vector<1x128xf32> to vector<392x128xf32>
    %5 = arith.addf %2, %4 : vector<392x128xf32>
    %cst_5 = arith.constant 0.000000e+00 : f32
    %6 = vector.broadcast %cst_5 : f32 to vector<392x128xf32>
    %7 = arith.maximumf %5, %6 : vector<392x128xf32>
    %8 = arith.truncf %7 : vector<392x128xf32> to vector<392x128xbf16>
    %c0_6 = arith.constant 0 : index
    %c0_7 = arith.constant 0 : index
    %9 = vector.load %arg4[%c0_6, %c0_7] : memref<392x128xbf16, #tpu.memory_space<vmem>>, vector<392x128xbf16>
    tpu.vector_store %arg4[%c0_6, %c0_7], %8 {strides = array<i32>} : memref<392x128xbf16, #tpu.memory_space<vmem>>, vector<392x128xbf16>,
    return
  }
  func.func @transform_0(%arg0: i32) -> (i32, i32) {
    %c0_i32 = arith.constant 0 : i32
    %c0_i32_0 = arith.constant 0 : i32
    return %arg0, %c0_i32 : i32, i32
  }
  func.func @transform_1(%arg0: i32) -> (i32, i32) {
    %c0_i32 = arith.constant 0 : i32
    %c0_i32_0 = arith.constant 0 : i32
    %c0_i32_1 = arith.constant 0 : i32
    return %c0_i32, %c0_i32_0 : i32, i32
  }
  func.func @transform_2(%arg0: i32) -> (i32, i32) {
    %c0_i32 = arith.constant 0 : i32
    %c0_i32_0 = arith.constant 0 : i32
    %c0_i32_1 = arith.constant 0 : i32
    return %c0_i32, %c0_i32_0 : i32, i32
  }
  func.func @transform_3(%arg0: i32) -> (i32, i32) {
    %c0_i32 = arith.constant 0 : i32
    %c0_i32_0 = arith.constant 0 : i32
    return %arg0, %c0_i32 : i32, i32
  }
}

module attributes {stable_mosaic.version = 11 : i64} {
  func.func @_matmul_bias_act_kernel(%arg0: i32, %arg1: memref<104x144xbf16, #tpu.memory_space<vmem>>, %arg2: memref<144x128xbf16, #tpu.memory_space<vmem>>, %arg3: memref<1x128xf32, #tpu.memory_space<vmem>>, %arg4: memref<104x128xbf16, #tpu.memory_space<vmem>>) attributes {dimension_semantics = [#tpu.dimension_semantics<parallel>], iteration_bounds = array<i64: 1>, scalar_prefetch = 0 : i64, scratch_operands = 0 : i64, tpu.core_type = #tpu.core_type<tc>, window_params = [{transform_indices = @transform_0, window_bounds = array<i64: 104, 144>}, {pipeline_mode = #tpu.pipeline_mode<synchronous>, transform_indices = @transform_1, window_bounds = array<i64: 144, 128>}, {pipeline_mode = #tpu.pipeline_mode<synchronous>, transform_indices = @transform_2, window_bounds = array<i64: 1, 128>}, {transform_indices = @transform_3, window_bounds = array<i64: 104, 128>}]} {
    %c0 = arith.constant 0 : index
    %c0_0 = arith.constant 0 : index
    %0 = vector.load %arg1[%c0, %c0_0] : memref<104x144xbf16, #tpu.memory_space<vmem>>, vector<104x144xbf16>
    %c0_1 = arith.constant 0 : index
    %c0_2 = arith.constant 0 : index
    %1 = vector.load %arg2[%c0_1, %c0_2] : memref<144x128xbf16, #tpu.memory_space<vmem>>, vector<144x128xbf16>
    %cst = arith.constant dense<0.000000e+00> : vector<104x128xf32>
    %2 = tpu.matmul %0, %1, %cst {dimension_numbers = #tpu.dot_dimension_numbers<[1], [0], [0], [1], [0, 0, 1, 1], [], []>} : vector<104x144xbf16>, vector<144x128xbf16>, vector<104x128xf32> -> vector<104x128xf32>
    %c0_3 = arith.constant 0 : index
    %c0_4 = arith.constant 0 : index
    %3 = vector.load %arg3[%c0_3, %c0_4] : memref<1x128xf32, #tpu.memory_space<vmem>>, vector<1x128xf32>
    %4 = vector.broadcast %3 : vector<1x128xf32> to vector<104x128xf32>
    %5 = arith.addf %2, %4 : vector<104x128xf32>
    %cst_5 = arith.constant 0.000000e+00 : f32
    %6 = vector.broadcast %cst_5 : f32 to vector<104x128xf32>
    %7 = arith.maximumf %5, %6 : vector<104x128xf32>
    %8 = arith.truncf %7 : vector<104x128xf32> to vector<104x128xbf16>
    %c0_6 = arith.constant 0 : index
    %c0_7 = arith.constant 0 : index
    %9 = vector.load %arg4[%c0_6, %c0_7] : memref<104x128xbf16, #tpu.memory_space<vmem>>, vector<104x128xbf16>
    tpu.vector_store %arg4[%c0_6, %c0_7], %8 {strides = array<i32>} : memref<104x128xbf16, #tpu.memory_space<vmem>>, vector<104x128xbf16>,
    return
  }
  func.func @transform_0(%arg0: i32) -> (i32, i32) {
    %c0_i32 = arith.constant 0 : i32
    %c0_i32_0 = arith.constant 0 : i32
    return %arg0, %c0_i32 : i32, i32
  }
  func.func @transform_1(%arg0: i32) -> (i32, i32) {
    %c0_i32 = arith.constant 0 : i32
    %c0_i32_0 = arith.constant 0 : i32
    %c0_i32_1 = arith.constant 0 : i32
    return %c0_i32, %c0_i32_0 : i32, i32
  }
  func.func @transform_2(%arg0: i32) -> (i32, i32) {
    %c0_i32 = arith.constant 0 : i32
    %c0_i32_0 = arith.constant 0 : i32
    %c0_i32_1 = arith.constant 0 : i32
    return %c0_i32, %c0_i32_0 : i32, i32
  }
  func.func @transform_3(%arg0: i32) -> (i32, i32) {
    %c0_i32 = arith.constant 0 : i32
    %c0_i32_0 = arith.constant 0 : i32
    return %arg0, %c0_i32 : i32, i32
  }
}

module attributes {stable_mosaic.version = 11 : i64} {
  func.func @_bottleneck_kernel(%arg0: i32, %arg1: memref<8x1568xbf16, #tpu.memory_space<vmem>>, %arg2: memref<1568x64xbf16, #tpu.memory_space<vmem>>, %arg3: memref<1x64xf32, #tpu.memory_space<vmem>>, %arg4: memref<64x1568xbf16, #tpu.memory_space<vmem>>, %arg5: memref<1x1568xf32, #tpu.memory_space<vmem>>, %arg6: memref<8x1568xbf16, #tpu.memory_space<vmem>>) attributes {dimension_semantics = [#tpu.dimension_semantics<parallel>], iteration_bounds = array<i64: 1>, scalar_prefetch = 0 : i64, scratch_operands = 0 : i64, tpu.core_type = #tpu.core_type<tc>, window_params = [{transform_indices = @transform_0, window_bounds = array<i64: 8, 1568>}, {pipeline_mode = #tpu.pipeline_mode<synchronous>, transform_indices = @transform_1, window_bounds = array<i64: 1568, 64>}, {pipeline_mode = #tpu.pipeline_mode<synchronous>, transform_indices = @transform_2, window_bounds = array<i64: 1, 64>}, {pipeline_mode = #tpu.pipeline_mode<synchronous>, transform_indices = @transform_3, window_bounds = array<i64: 64, 1568>}, {pipeline_mode = #tpu.pipeline_mode<synchronous>, transform_indices = @transform_4, window_bounds = array<i64: 1, 1568>}, {transform_indices = @transform_5, window_bounds = array<i64: 8, 1568>}]} {
    %c0 = arith.constant 0 : index
    %c0_0 = arith.constant 0 : index
    %0 = vector.load %arg1[%c0, %c0_0] : memref<8x1568xbf16, #tpu.memory_space<vmem>>, vector<8x1568xbf16>
    %c0_1 = arith.constant 0 : index
    %c0_2 = arith.constant 0 : index
    %1 = vector.load %arg2[%c0_1, %c0_2] : memref<1568x64xbf16, #tpu.memory_space<vmem>>, vector<1568x64xbf16>
    %cst = arith.constant dense<0.000000e+00> : vector<8x64xf32>
    %2 = tpu.matmul %0, %1, %cst {dimension_numbers = #tpu.dot_dimension_numbers<[1], [0], [0], [1], [0, 0, 1, 1], [], []>} : vector<8x1568xbf16>, vector<1568x64xbf16>, vector<8x64xf32> -> vector<8x64xf32>
    %c0_3 = arith.constant 0 : index
    %c0_4 = arith.constant 0 : index
    %3 = vector.load %arg3[%c0_3, %c0_4] : memref<1x64xf32, #tpu.memory_space<vmem>>, vector<1x64xf32>
    %4 = vector.broadcast %3 : vector<1x64xf32> to vector<8x64xf32>
    %5 = arith.addf %2, %4 : vector<8x64xf32>
    %6 = arith.truncf %5 : vector<8x64xf32> to vector<8x64xbf16>
    %c0_5 = arith.constant 0 : index
    %c0_6 = arith.constant 0 : index
    %7 = vector.load %arg4[%c0_5, %c0_6] : memref<64x1568xbf16, #tpu.memory_space<vmem>>, vector<64x1568xbf16>
    %cst_7 = arith.constant dense<0.000000e+00> : vector<8x1568xf32>
    %8 = tpu.matmul %6, %7, %cst_7 {dimension_numbers = #tpu.dot_dimension_numbers<[1], [0], [0], [1], [0, 0, 1, 1], [], []>} : vector<8x64xbf16>, vector<64x1568xbf16>, vector<8x1568xf32> -> vector<8x1568xf32>
    %c0_8 = arith.constant 0 : index
    %c0_9 = arith.constant 0 : index
    %9 = vector.load %arg5[%c0_8, %c0_9] : memref<1x1568xf32, #tpu.memory_space<vmem>>, vector<1x1568xf32>
    %10 = vector.broadcast %9 : vector<1x1568xf32> to vector<8x1568xf32>
    %11 = arith.addf %8, %10 : vector<8x1568xf32>
    %cst_10 = arith.constant 0.000000e+00 : f32
    %12 = vector.broadcast %cst_10 : f32 to vector<8x1568xf32>
    %13 = arith.maximumf %11, %12 : vector<8x1568xf32>
    %14 = arith.truncf %13 : vector<8x1568xf32> to vector<8x1568xbf16>
    %c0_11 = arith.constant 0 : index
    %c0_12 = arith.constant 0 : index
    %15 = vector.load %arg6[%c0_11, %c0_12] : memref<8x1568xbf16, #tpu.memory_space<vmem>>, vector<8x1568xbf16>
    tpu.vector_store %arg6[%c0_11, %c0_12], %14 {strides = array<i32>} : memref<8x1568xbf16, #tpu.memory_space<vmem>>, vector<8x1568xbf16>,
    return
  }
  func.func @transform_0(%arg0: i32) -> (i32, i32) {
    %c0_i32 = arith.constant 0 : i32
    %c0_i32_0 = arith.constant 0 : i32
    return %arg0, %c0_i32 : i32, i32
  }
  func.func @transform_1(%arg0: i32) -> (i32, i32) {
    %c0_i32 = arith.constant 0 : i32
    %c0_i32_0 = arith.constant 0 : i32
    %c0_i32_1 = arith.constant 0 : i32
    return %c0_i32, %c0_i32_0 : i32, i32
  }
  func.func @transform_2(%arg0: i32) -> (i32, i32) {
    %c0_i32 = arith.constant 0 : i32
    %c0_i32_0 = arith.constant 0 : i32
    %c0_i32_1 = arith.constant 0 : i32
    return %c0_i32, %c0_i32_0 : i32, i32
  }
  func.func @transform_3(%arg0: i32) -> (i32, i32) {
    %c0_i32 = arith.constant 0 : i32
    %c0_i32_0 = arith.constant 0 : i32
    %c0_i32_1 = arith.constant 0 : i32
    return %c0_i32, %c0_i32_0 : i32, i32
  }
  func.func @transform_4(%arg0: i32) -> (i32, i32) {
    %c0_i32 = arith.constant 0 : i32
    %c0_i32_0 = arith.constant 0 : i32
    %c0_i32_1 = arith.constant 0 : i32
    return %c0_i32, %c0_i32_0 : i32, i32
  }
  func.func @transform_5(%arg0: i32) -> (i32, i32) {
    %c0_i32 = arith.constant 0 : i32
    %c0_i32_0 = arith.constant 0 : i32
    return %arg0, %c0_i32 : i32, i32
  }
}

module attributes {stable_mosaic.version = 11 : i64} {
  func.func @_matmul_bias_act_kernel(%arg0: i32, %arg1: memref<104x128xbf16, #tpu.memory_space<vmem>>, %arg2: memref<128x128xbf16, #tpu.memory_space<vmem>>, %arg3: memref<1x128xf32, #tpu.memory_space<vmem>>, %arg4: memref<104x128xbf16, #tpu.memory_space<vmem>>) attributes {dimension_semantics = [#tpu.dimension_semantics<parallel>], iteration_bounds = array<i64: 1>, scalar_prefetch = 0 : i64, scratch_operands = 0 : i64, tpu.core_type = #tpu.core_type<tc>, window_params = [{transform_indices = @transform_0, window_bounds = array<i64: 104, 128>}, {pipeline_mode = #tpu.pipeline_mode<synchronous>, transform_indices = @transform_1, window_bounds = array<i64: 128, 128>}, {pipeline_mode = #tpu.pipeline_mode<synchronous>, transform_indices = @transform_2, window_bounds = array<i64: 1, 128>}, {transform_indices = @transform_3, window_bounds = array<i64: 104, 128>}]} {
    %c0 = arith.constant 0 : index
    %c0_0 = arith.constant 0 : index
    %0 = vector.load %arg1[%c0, %c0_0] : memref<104x128xbf16, #tpu.memory_space<vmem>>, vector<104x128xbf16>
    %c0_1 = arith.constant 0 : index
    %c0_2 = arith.constant 0 : index
    %1 = vector.load %arg2[%c0_1, %c0_2] : memref<128x128xbf16, #tpu.memory_space<vmem>>, vector<128x128xbf16>
    %cst = arith.constant dense<0.000000e+00> : vector<104x128xf32>
    %2 = tpu.matmul %0, %1, %cst {dimension_numbers = #tpu.dot_dimension_numbers<[1], [0], [0], [1], [0, 0, 1, 1], [], []>} : vector<104x128xbf16>, vector<128x128xbf16>, vector<104x128xf32> -> vector<104x128xf32>
    %c0_3 = arith.constant 0 : index
    %c0_4 = arith.constant 0 : index
    %3 = vector.load %arg3[%c0_3, %c0_4] : memref<1x128xf32, #tpu.memory_space<vmem>>, vector<1x128xf32>
    %4 = vector.broadcast %3 : vector<1x128xf32> to vector<104x128xf32>
    %5 = arith.addf %2, %4 : vector<104x128xf32>
    %cst_5 = arith.constant 0.000000e+00 : f32
    %6 = vector.broadcast %cst_5 : f32 to vector<104x128xf32>
    %7 = arith.maximumf %5, %6 : vector<104x128xf32>
    %8 = arith.truncf %7 : vector<104x128xf32> to vector<104x128xbf16>
    %c0_6 = arith.constant 0 : index
    %c0_7 = arith.constant 0 : index
    %9 = vector.load %arg4[%c0_6, %c0_7] : memref<104x128xbf16, #tpu.memory_space<vmem>>, vector<104x128xbf16>
    tpu.vector_store %arg4[%c0_6, %c0_7], %8 {strides = array<i32>} : memref<104x128xbf16, #tpu.memory_space<vmem>>, vector<104x128xbf16>,
    return
  }
  func.func @transform_0(%arg0: i32) -> (i32, i32) {
    %c0_i32 = arith.constant 0 : i32
    %c0_i32_0 = arith.constant 0 : i32
    return %arg0, %c0_i32 : i32, i32
  }
  func.func @transform_1(%arg0: i32) -> (i32, i32) {
    %c0_i32 = arith.constant 0 : i32
    %c0_i32_0 = arith.constant 0 : i32
    %c0_i32_1 = arith.constant 0 : i32
    return %c0_i32, %c0_i32_0 : i32, i32
  }
  func.func @transform_2(%arg0: i32) -> (i32, i32) {
    %c0_i32 = arith.constant 0 : i32
    %c0_i32_0 = arith.constant 0 : i32
    %c0_i32_1 = arith.constant 0 : i32
    return %c0_i32, %c0_i32_0 : i32, i32
  }
  func.func @transform_3(%arg0: i32) -> (i32, i32) {
    %c0_i32 = arith.constant 0 : i32
    %c0_i32_0 = arith.constant 0 : i32
    return %arg0, %c0_i32 : i32, i32
  }
}

module attributes {stable_mosaic.version = 11 : i64} {
  func.func @_matmul_bias_act_kernel(%arg0: i32, %arg1: memref<392x64xbf16, #tpu.memory_space<vmem>>, %arg2: memref<64x12xbf16, #tpu.memory_space<vmem>>, %arg3: memref<1x12xf32, #tpu.memory_space<vmem>>, %arg4: memref<392x12xf32, #tpu.memory_space<vmem>>) attributes {dimension_semantics = [#tpu.dimension_semantics<parallel>], iteration_bounds = array<i64: 1>, scalar_prefetch = 0 : i64, scratch_operands = 0 : i64, tpu.core_type = #tpu.core_type<tc>, window_params = [{transform_indices = @transform_0, window_bounds = array<i64: 392, 64>}, {pipeline_mode = #tpu.pipeline_mode<synchronous>, transform_indices = @transform_1, window_bounds = array<i64: 64, 12>}, {pipeline_mode = #tpu.pipeline_mode<synchronous>, transform_indices = @transform_2, window_bounds = array<i64: 1, 12>}, {transform_indices = @transform_3, window_bounds = array<i64: 392, 12>}]} {
    %c0 = arith.constant 0 : index
    %c0_0 = arith.constant 0 : index
    %0 = vector.load %arg1[%c0, %c0_0] : memref<392x64xbf16, #tpu.memory_space<vmem>>, vector<392x64xbf16>
    %c0_1 = arith.constant 0 : index
    %c0_2 = arith.constant 0 : index
    %1 = vector.load %arg2[%c0_1, %c0_2] : memref<64x12xbf16, #tpu.memory_space<vmem>>, vector<64x12xbf16>
    %cst = arith.constant dense<0.000000e+00> : vector<392x12xf32>
    %2 = tpu.matmul %0, %1, %cst {dimension_numbers = #tpu.dot_dimension_numbers<[1], [0], [0], [1], [0, 0, 1, 1], [], []>} : vector<392x64xbf16>, vector<64x12xbf16>, vector<392x12xf32> -> vector<392x12xf32>
    %c0_3 = arith.constant 0 : index
    %c0_4 = arith.constant 0 : index
    %3 = vector.load %arg3[%c0_3, %c0_4] : memref<1x12xf32, #tpu.memory_space<vmem>>, vector<1x12xf32>
    %4 = vector.broadcast %3 : vector<1x12xf32> to vector<392x12xf32>
    %5 = arith.addf %2, %4 : vector<392x12xf32>
    %6 = arith.negf %5 : vector<392x12xf32>
    %7 = math.exp %6 : vector<392x12xf32>
    %cst_5 = arith.constant 1.000000e+00 : f32
    %8 = vector.broadcast %cst_5 : f32 to vector<392x12xf32>
    %9 = arith.addf %8, %7 : vector<392x12xf32>
    %10 = arith.divf %8, %9 : vector<392x12xf32>
    %c0_6 = arith.constant 0 : index
    %c0_7 = arith.constant 0 : index
    %11 = vector.load %arg4[%c0_6, %c0_7] : memref<392x12xf32, #tpu.memory_space<vmem>>, vector<392x12xf32>
    tpu.vector_store %arg4[%c0_6, %c0_7], %10 {strides = array<i32>} : memref<392x12xf32, #tpu.memory_space<vmem>>, vector<392x12xf32>,
    return
  }
  func.func @transform_0(%arg0: i32) -> (i32, i32) {
    %c0_i32 = arith.constant 0 : i32
    %c0_i32_0 = arith.constant 0 : i32
    return %arg0, %c0_i32 : i32, i32
  }
  func.func @transform_1(%arg0: i32) -> (i32, i32) {
    %c0_i32 = arith.constant 0 : i32
    %c0_i32_0 = arith.constant 0 : i32
    %c0_i32_1 = arith.constant 0 : i32
    return %c0_i32, %c0_i32_0 : i32, i32
  }
  func.func @transform_2(%arg0: i32) -> (i32, i32) {
    %c0_i32 = arith.constant 0 : i32
    %c0_i32_0 = arith.constant 0 : i32
    %c0_i32_1 = arith.constant 0 : i32
    return %c0_i32, %c0_i32_0 : i32, i32
  }
  func.func @transform_3(%arg0: i32) -> (i32, i32) {
    %c0_i32 = arith.constant 0 : i32
    %c0_i32_0 = arith.constant 0 : i32
    return %arg0, %c0_i32 : i32, i32
  }
}

</mosaic_0001>

<bundles_post_ra>
// kernel: autoencoder_forward.5
= control target key start
LH: loop header
LB: loop body
LE: loop exit
PB: predicated region body
PF: predicated region fallthrough
CT: control target
= control target key end

     0   :  { %vm282_vm0 = vcmask 1044480   ;;  %vm283_vm1 = vcmask 1045504   ;;  %v879_v2 = vmov 65535   ;;  %vm206_vm2 = vcmask 220160   ;;  %s1138_s1 = inlined_call_operand.vmem [shape: bf16[27,128], index: 1, kind: input, shape index: {}]   ;;  %s1139_s2 = inlined_call_operand.vmem [shape: f32[1,128], index: 2, kind: input, shape index: {}]   ;;  %s1140_s0 = inlined_call_operand.vmem [shape: bf16[392,27], index: 0, kind: input, shape index: {}]   ;;  %s1141_s3 = inlined_call_operand.vmem [shape: bf16[392,128], index: 3, kind: output, shape index: {}]  }
   0x1   :  { %v675_v0 = vld [vmem:[%s1138_s1 + $0x8] sm:$0xf]  ;;  %v727_v1 = vld [vmem:[%s1138_s1 + $0x8] sm:$0x30]  ;;  %v284_v3 = vsel %vm282_vm0, 4294967295, %v879_v2  ;;  %v726_v7 = vld [vmem:[%s1138_s1] sm:$0xff] }
   0x2   :  { %v676_v4 = vor.u32 %v727_v1, %v675_v0  ;;  %v285_v5 = vsel %vm283_vm1, %v284_v3, 0  ;;  %v708_v8 = vld [vmem:[%s1140_s0 + $0x30] sm:$0xff]  ;;  %v715_v9 = vld [vmem:[%s1140_s0 + $0x68] sm:$0xff]  ;;  %v702_v10 = vld [vmem:[%s1140_s0] sm:$0xff] }
   0x3   :  { %v722_v11 = vld [vmem:[%s1140_s0 + $0xa0] sm:$0xff]  ;;  %v709_v12 = vld [vmem:[%s1140_s0 + $0x38] sm:$0xff]  ;;  %v716_v13 = vld [vmem:[%s1140_s0 + $0x70] sm:$0xff] }
   0x4   :  { %v287_v6 = vand.u32 %v676_v4, %v285_v5  ;;  %v703_v14 = vld [vmem:[%s1140_s0 + $0x8] sm:$0xff]  ;;  %v710_v16 = vld [vmem:[%s1140_s0 + $0x40] sm:$0xff]  ;;  %v717_v17 = vld [vmem:[%s1140_s0 + $0x78] sm:$0xff] }
   0x5   :  { %v723_v15 = vld [vmem:[%s1140_s0 + $0xa8] sm:$0xff]  ;;  %v704_v18 = vld [vmem:[%s1140_s0 + $0x10] sm:$0xff]  ;;  %v718_v21 = vld [vmem:[%s1140_s0 + $0x80] sm:$0xff] }
   0x6   :  { %871 = vmatpush.bf16.msra.mxu1 %v287_v6  ;;  %872 = vmatpush.bf16.msra.mxu2 %v287_v6  ;;  %v724_v19 = vld [vmem:[%s1140_s0 + $0xb0] sm:$0xff]  ;;  %v711_v20 = vld [vmem:[%s1140_s0 + $0x48] sm:$0xff]  ;;  %v705_v22 = vld [vmem:[%s1140_s0 + $0x18] sm:$0xff] }
   0x7   :  { %295 = vmatpush.bf16.msra.mxu0 %v287_v6  ;;  %873 = vmatpush.bf16.msra.mxu3 %v287_v6  ;;  %v725_v23 = vld [vmem:[%s1140_s0 + $0xb8] sm:$0xff]  ;;  %v63_v24 = vld [vmem:[%s1140_s0 + $0xc0] sm:$0xf]  ;;  %v712_v26 = vld [vmem:[%s1140_s0 + $0x50] sm:$0xff] }
   0x8   :  { %v169_v25 = vunpack.c.l.b16 %v63_v24  ;;  %v719_v27 = vld [vmem:[%s1140_s0 + $0x88] sm:$0xff]  ;;  %v706_v28 = vld [vmem:[%s1140_s0 + $0x20] sm:$0xff]  ;;  %v713_v30 = vld [vmem:[%s1140_s0 + $0x58] sm:$0xff] }
   0x9   :  { %v720_v31 = vld [vmem:[%s1140_s0 + $0x90] sm:$0xff]  ;;  %v707_v32 = vld [vmem:[%s1140_s0 + $0x28] sm:$0xff]  ;;  %v714_v33 = vld [vmem:[%s1140_s0 + $0x60] sm:$0xff] }
   0xa   :  { %874 = vmatpush.bf16.msra.mxu1 %v726_v7  ;;  %875 = vmatpush.bf16.msra.mxu2 %v726_v7  ;;  %v194_v29 = vpack.c.b16 %v169_v25, %v169_v25  ;;  %v721_v34 = vld [vmem:[%s1140_s0 + $0x98] sm:$0xff]  ;;  %v1012_v37 = vld [vmem:[%s1139_s2] ss:$0 sm:$0xff] }
   0xb   :  { %296 = vmatpush.bf16.msra.mxu0 %v726_v7  ;;  %876 = vmatpush.bf16.msra.mxu3 %v726_v7 }
   0xd   :  { %683 = vmatmul.msk.bf16.vlgmr.msra.gmra.mxu1 %vm206_vm2, %v708_v8  ;;  %690 = vmatmul.msk.bf16.vlgmr.msra.gmra.mxu2 %vm206_vm2, %v715_v9 }
   0xe   :  { %677 = vmatmul.msk.bf16.vlgmr.msra.gmra.mxu0 %vm206_vm2, %v702_v10  ;;  %697 = vmatmul.msk.bf16.vlgmr.msra.gmra.mxu3 %vm206_vm2, %v722_v11 }
  0x1d   :  { %684 = vmatmul.msk.bf16.gmra.mxu1 %vm206_vm2, %v709_v12  ;;  %691 = vmatmul.msk.bf16.gmra.mxu2 %vm206_vm2, %v716_v13 }
  0x1e   :  { %678 = vmatmul.msk.bf16.gmra.mxu0 %vm206_vm2, %v703_v14  ;;  %698 = vmatmul.msk.bf16.gmra.mxu3 %vm206_vm2, %v723_v15 }
  0x2d   :  { %685 = vmatmul.msk.bf16.gmra.mxu1 %vm206_vm2, %v710_v16  ;;  %692 = vmatmul.msk.bf16.gmra.mxu2 %vm206_vm2, %v717_v17 }
  0x2e   :  { %679 = vmatmul.msk.bf16.gmra.mxu0 %vm206_vm2, %v704_v18  ;;  %699 = vmatmul.msk.bf16.gmra.mxu3 %vm206_vm2, %v724_v19 }
  0x3d   :  { %686 = vmatmul.msk.bf16.gmra.mxu1 %vm206_vm2, %v711_v20  ;;  %693 = vmatmul.msk.bf16.gmra.mxu2 %vm206_vm2, %v718_v21 }
  0x3e   :  { %680 = vmatmul.msk.bf16.gmra.mxu0 %vm206_vm2, %v705_v22  ;;  %700 = vmatmul.msk.bf16.gmra.mxu3 %vm206_vm2, %v725_v23 }
  0x4d   :  { %687 = vmatmul.msk.bf16.gmra.mxu1 %vm206_vm2, %v712_v26  ;;  %694 = vmatmul.msk.bf16.gmra.mxu2 %vm206_vm2, %v719_v27 }
  0x4e   :  { %681 = vmatmul.msk.bf16.gmra.mxu0 %vm206_vm2, %v706_v28  ;;  %701 = vmatmul.msk.bf16.gmra.mxu3 %vm206_vm2, %v194_v29 }
  0x5d   :  { %688 = vmatmul.msk.bf16.gmra.mxu1 %vm206_vm2, %v713_v30  ;;  %695 = vmatmul.msk.bf16.gmra.mxu2 %vm206_vm2, %v720_v31 }
  0x5e   :  { %682 = vmatmul.msk.bf16.gmra.mxu0 %vm206_vm2, %v707_v32 }
  0x6d   :  { %689 = vmatmul.msk.bf16.gmra.mxu1 %vm206_vm2, %v714_v33  ;;  %696 = vmatmul.msk.bf16.gmra.mxu2 %vm206_vm2, %v721_v34 }
  0x8a   :  { %v328_v35 = vpop.f32.mrf.mxu1 }
  0x8b   :  { %v298_v36 = vpop.f32.mrf.mxu0  ;;  %v329_v40 = vadd.f32 %v1012_v37, %v328_v35 }
  0x8c   :  { %v299_v39 = vadd.f32 %v1012_v37, %v298_v36 }
  0x8d   :  { %v434_v47 = vmax.f32 %v329_v40, 0.0 }
  0x8e   :  { %v422_v45 = vmax.f32 %v299_v39, 0.0 }
  0x90   :  { %v363_v38 = vpop.f32.mrf.mxu2 }
  0x91   :  { %v398_v41 = vpop.f32.mrf.mxu3  ;;  %v364_v51 = vadd.f32 %v1012_v37, %v363_v38 }
  0x92   :  { %v330_v42 = vpop.f32.mrf.mxu1  ;;  %v399_v50 = vadd.f32 %v1012_v37, %v398_v41 }
  0x93   :  { %v331_v43 = vadd.f32 %v1012_v37, %v330_v42  ;;  %v300_v44 = vpop.f32.mrf.mxu0  ;;  %v448_v60 = vmax.f32 %v364_v51, 0.0 }
  0x94   :  { %v301_v46 = vadd.f32 %v1012_v37, %v300_v44  ;;  %v462_v58 = vmax.f32 %v399_v50, 0.0 }
  0x95   :  { %v435_v48 = vmax.f32 %v331_v43, 0.0 }
  0x96   :  { %v423_v49 = vmax.f32 %v301_v46, 0.0 }
  0x97   :  { %v761_v52 = vpack.c.bf16 %v435_v48, %v434_v47 }
  0x98   :  { %v365_v53 = vpop.f32.mrf.mxu2  ;;  %v731_v54 = vpack.c.bf16 %v423_v49, %v422_v45 }
  0x99   :  { %853 = vst [vmem:[%s1141_s3 + $0x30] sm:$0xff] %v761_v52   ;;  %v366_v55 = vadd.f32 %v1012_v37, %v365_v53  ;;  %v400_v56 = vpop.f32.mrf.mxu3 }
  0x9a   :  { %v333_v57 = vpop.f32.mrf.mxu1  ;;  %732 = vst [vmem:[%s1141_s3] sm:$0xff] %v731_v54   ;;  %v401_v59 = vadd.f32 %v1012_v37, %v400_v56 }
  0x9b   :  { %v449_v61 = vmax.f32 %v366_v55, 0.0  ;;  %v303_v62 = vpop.f32.mrf.mxu0  ;;  %v334_v4 = vadd.f32 %v1012_v37, %v333_v57 }
  0x9c   :  { %v463_v63 = vmax.f32 %v401_v59, 0.0  ;;  %v304_v3 = vadd.f32 %v1012_v37, %v303_v62 }
  0x9d   :  { %v796_v0 = vpack.c.bf16 %v449_v61, %v448_v60  ;;  %v436_v11 = vmax.f32 %v334_v4, 0.0 }
  0x9e   :  { %v831_v1 = vpack.c.bf16 %v463_v63, %v462_v58  ;;  %v424_v9 = vmax.f32 %v304_v3, 0.0 }
  0x9f   :  { %860 = vst [vmem:[%s1141_s3 + $0x68] sm:$0xff] %v796_v0  }
  0xa0   :  { %v368_v2 = vpop.f32.mrf.mxu2  ;;  %867 = vst [vmem:[%s1141_s3 + $0xa0] sm:$0xff] %v831_v1  }
  0xa1   :  { %v403_v5 = vpop.f32.mrf.mxu3  ;;  %v369_v15 = vadd.f32 %v1012_v37, %v368_v2 }
  0xa2   :  { %v335_v6 = vpop.f32.mrf.mxu1  ;;  %v404_v14 = vadd.f32 %v1012_v37, %v403_v5 }
  0xa3   :  { %v336_v7 = vadd.f32 %v1012_v37, %v335_v6  ;;  %v305_v8 = vpop.f32.mrf.mxu0  ;;  %v450_v24 = vmax.f32 %v369_v15, 0.0 }
  0xa4   :  { %v306_v10 = vadd.f32 %v1012_v37, %v305_v8  ;;  %v464_v22 = vmax.f32 %v404_v14, 0.0 }
  0xa5   :  { %v437_v12 = vmax.f32 %v336_v7, 0.0 }
  0xa6   :  { %v425_v13 = vmax.f32 %v306_v10, 0.0 }
  0xa7   :  { %v766_v16 = vpack.c.bf16 %v437_v12, %v436_v11 }
  0xa8   :  { %v370_v17 = vpop.f32.mrf.mxu2  ;;  %v736_v18 = vpack.c.bf16 %v425_v13, %v424_v9 }
  0xa9   :  { %854 = vst [vmem:[%s1141_s3 + $0x38] sm:$0xff] %v766_v16   ;;  %v371_v19 = vadd.f32 %v1012_v37, %v370_v17  ;;  %v405_v20 = vpop.f32.mrf.mxu3 }
  0xaa   :  { %v338_v21 = vpop.f32.mrf.mxu1  ;;  %848 = vst [vmem:[%s1141_s3 + $0x8] sm:$0xff] %v736_v18   ;;  %v406_v23 = vadd.f32 %v1012_v37, %v405_v20 }
  0xab   :  { %v451_v25 = vmax.f32 %v371_v19, 0.0  ;;  %v308_v26 = vpop.f32.mrf.mxu0  ;;  %v339_v32 = vadd.f32 %v1012_v37, %v338_v21 }
  0xac   :  { %v465_v27 = vmax.f32 %v406_v23, 0.0  ;;  %v309_v31 = vadd.f32 %v1012_v37, %v308_v26 }
  0xad   :  { %v801_v28 = vpack.c.bf16 %v451_v25, %v450_v24  ;;  %v438_v40 = vmax.f32 %v339_v32, 0.0 }
  0xae   :  { %v836_v29 = vpack.c.bf16 %v465_v27, %v464_v22  ;;  %v426_v38 = vmax.f32 %v309_v31, 0.0 }
  0xaf   :  { %861 = vst [vmem:[%s1141_s3 + $0x70] sm:$0xff] %v801_v28  }
  0xb0   :  { %v373_v30 = vpop.f32.mrf.mxu2  ;;  %868 = vst [vmem:[%s1141_s3 + $0xa8] sm:$0xff] %v836_v29  }
  0xb1   :  { %v408_v33 = vpop.f32.mrf.mxu3  ;;  %v374_v44 = vadd.f32 %v1012_v37, %v373_v30 }
  0xb2   :  { %v340_v34 = vpop.f32.mrf.mxu1  ;;  %v409_v43 = vadd.f32 %v1012_v37, %v408_v33 }
  0xb3   :  { %v341_v35 = vadd.f32 %v1012_v37, %v340_v34  ;;  %v310_v36 = vpop.f32.mrf.mxu0  ;;  %v452_v53 = vmax.f32 %v374_v44, 0.0 }
  0xb4   :  { %v311_v39 = vadd.f32 %v1012_v37, %v310_v36  ;;  %v466_v51 = vmax.f32 %v409_v43, 0.0 }
  0xb5   :  { %v439_v41 = vmax.f32 %v341_v35, 0.0 }
  0xb6   :  { %v427_v42 = vmax.f32 %v311_v39, 0.0 }
  0xb7   :  { %v771_v45 = vpack.c.bf16 %v439_v41, %v438_v40 }
  0xb8   :  { %v375_v46 = vpop.f32.mrf.mxu2  ;;  %v741_v47 = vpack.c.bf16 %v427_v42, %v426_v38 }
  0xb9   :  { %855 = vst [vmem:[%s1141_s3 + $0x40] sm:$0xff] %v771_v45   ;;  %v376_v48 = vadd.f32 %v1012_v37, %v375_v46  ;;  %v410_v49 = vpop.f32.mrf.mxu3 }
  0xba   :  { %v343_v50 = vpop.f32.mrf.mxu1  ;;  %849 = vst [vmem:[%s1141_s3 + $0x10] sm:$0xff] %v741_v47   ;;  %v411_v52 = vadd.f32 %v1012_v37, %v410_v49 }
  0xbb   :  { %v453_v54 = vmax.f32 %v376_v48, 0.0  ;;  %v313_v55 = vpop.f32.mrf.mxu0  ;;  %v344_v61 = vadd.f32 %v1012_v37, %v343_v50 }
  0xbc   :  { %v467_v56 = vmax.f32 %v411_v52, 0.0  ;;  %v314_v60 = vadd.f32 %v1012_v37, %v313_v55 }
  0xbd   :  { %v806_v57 = vpack.c.bf16 %v453_v54, %v452_v53  ;;  %v440_v4 = vmax.f32 %v344_v61, 0.0 }
  0xbe   :  { %v841_v58 = vpack.c.bf16 %v467_v56, %v466_v51  ;;  %v428_v2 = vmax.f32 %v314_v60, 0.0 }
  0xbf   :  { %862 = vst [vmem:[%s1141_s3 + $0x78] sm:$0xff] %v806_v57  }
  0xc0   :  { %v378_v59 = vpop.f32.mrf.mxu2  ;;  %869 = vst [vmem:[%s1141_s3 + $0xb0] sm:$0xff] %v841_v58  }
  0xc1   :  { %v413_v62 = vpop.f32.mrf.mxu3  ;;  %v379_v8 = vadd.f32 %v1012_v37, %v378_v59 }
  0xc2   :  { %v345_v63 = vpop.f32.mrf.mxu1  ;;  %v414_v7 = vadd.f32 %v1012_v37, %v413_v62 }
  0xc3   :  { %v346_v0 = vadd.f32 %v1012_v37, %v345_v63  ;;  %v315_v1 = vpop.f32.mrf.mxu0  ;;  %v454_v17 = vmax.f32 %v379_v8, 0.0 }
  0xc4   :  { %v316_v3 = vadd.f32 %v1012_v37, %v315_v1  ;;  %v468_v15 = vmax.f32 %v414_v7, 0.0 }
  0xc5   :  { %v441_v5 = vmax.f32 %v346_v0, 0.0 }
  0xc6   :  { %v429_v6 = vmax.f32 %v316_v3, 0.0 }
  0xc7   :  { %v776_v9 = vpack.c.bf16 %v441_v5, %v440_v4 }
  0xc8   :  { %v380_v10 = vpop.f32.mrf.mxu2  ;;  %v746_v11 = vpack.c.bf16 %v429_v6, %v428_v2 }
  0xc9   :  { %856 = vst [vmem:[%s1141_s3 + $0x48] sm:$0xff] %v776_v9   ;;  %v381_v12 = vadd.f32 %v1012_v37, %v380_v10  ;;  %v415_v13 = vpop.f32.mrf.mxu3 }
  0xca   :  { %v348_v14 = vpop.f32.mrf.mxu1  ;;  %850 = vst [vmem:[%s1141_s3 + $0x18] sm:$0xff] %v746_v11   ;;  %v416_v16 = vadd.f32 %v1012_v37, %v415_v13 }
  0xcb   :  { %v455_v18 = vmax.f32 %v381_v12, 0.0  ;;  %v318_v19 = vpop.f32.mrf.mxu0  ;;  %v349_v25 = vadd.f32 %v1012_v37, %v348_v14 }
  0xcc   :  { %v469_v20 = vmax.f32 %v416_v16, 0.0  ;;  %v319_v24 = vadd.f32 %v1012_v37, %v318_v19 }
  0xcd   :  { %v811_v21 = vpack.c.bf16 %v455_v18, %v454_v17  ;;  %v442_v34 = vmax.f32 %v349_v25, 0.0 }
  0xce   :  { %v846_v22 = vpack.c.bf16 %v469_v20, %v468_v15  ;;  %v430_v31 = vmax.f32 %v319_v24, 0.0 }
  0xcf   :  { %863 = vst [vmem:[%s1141_s3 + $0x80] sm:$0xff] %v811_v21  }
  0xd0   :  { %v383_v23 = vpop.f32.mrf.mxu2  ;;  %870 = vst [vmem:[%s1141_s3 + $0xb8] sm:$0xff] %v846_v22  }
  0xd1   :  { %v418_v26 = vpop.f32.mrf.mxu3  ;;  %v384_v39 = vadd.f32 %v1012_v37, %v383_v23 }
  0xd2   :  { %v350_v27 = vpop.f32.mrf.mxu1  ;;  %v419_v28 = vadd.f32 %v1012_v37, %v418_v26 }
  0xd3   :  { %v351_v29 = vadd.f32 %v1012_v37, %v350_v27  ;;  %v320_v30 = vpop.f32.mrf.mxu0  ;;  %v456_v46 = vmax.f32 %v384_v39, 0.0 }
  0xd4   :  { %v321_v32 = vadd.f32 %v1012_v37, %v320_v30  ;;  %v470_v33 = vmax.f32 %v419_v28, 0.0 }
  0xd5   :  { %v443_v35 = vmax.f32 %v351_v29, 0.0 }
  0xd6   :  { %v431_v36 = vmax.f32 %v321_v32, 0.0  ;;  %v519_v38 = vpack.c.bf16 %v470_v33, %v470_v33 }
  0xd7   :  { %v781_v40 = vpack.c.bf16 %v443_v35, %v442_v34 }
  0xd8   :  { %v385_v41 = vpop.f32.mrf.mxu2  ;;  %v751_v42 = vpack.c.bf16 %v431_v36, %v430_v31  ;;  %568 = vst [vmem:[%s1141_s3 + $0xc0] sm:$0xf] %v519_v38 }
  0xd9   :  { %857 = vst [vmem:[%s1141_s3 + $0x50] sm:$0xff] %v781_v40   ;;  %v386_v43 = vadd.f32 %v1012_v37, %v385_v41  ;;  %v420_v44 = vpop.f32.mrf.mxu3 }
  0xda   :  { %v353_v45 = vpop.f32.mrf.mxu1  ;;  %851 = vst [vmem:[%s1141_s3 + $0x20] sm:$0xff] %v751_v42  }
  0xdb   :  { %v457_v47 = vmax.f32 %v386_v43, 0.0  ;;  %v323_v48 = vpop.f32.mrf.mxu0  ;;  %v354_v52 = vadd.f32 %v1012_v37, %v353_v45 }
  0xdc   :  { %v324_v51 = vadd.f32 %v1012_v37, %v323_v48 }
  0xdd   :  { %v816_v49 = vpack.c.bf16 %v457_v47, %v456_v46  ;;  %v444_v58 = vmax.f32 %v354_v52, 0.0 }
  0xde   :  { %v432_v56 = vmax.f32 %v324_v51, 0.0 }
  0xdf   :  { %864 = vst [vmem:[%s1141_s3 + $0x88] sm:$0xff] %v816_v49  }
  0xe0   :  { %v388_v50 = vpop.f32.mrf.mxu2 }
  0xe1   :  { %v389_v61 = vadd.f32 %v1012_v37, %v388_v50 }
  0xe2   :  { %v355_v53 = vpop.f32.mrf.mxu1 }
  0xe3   :  { %v356_v54 = vadd.f32 %v1012_v37, %v355_v53  ;;  %v325_v55 = vpop.f32.mrf.mxu0  ;;  %v458_v3 = vmax.f32 %v389_v61, 0.0 }
  0xe4   :  { %v326_v57 = vadd.f32 %v1012_v37, %v325_v55 }
  0xe5   :  { %v445_v59 = vmax.f32 %v356_v54, 0.0 }
  0xe6   :  { %v433_v60 = vmax.f32 %v326_v57, 0.0 }
  0xe7   :  { %v786_v62 = vpack.c.bf16 %v445_v59, %v444_v58 }
  0xe8   :  { %v390_v63 = vpop.f32.mrf.mxu2  ;;  %v756_v0 = vpack.c.bf16 %v433_v60, %v432_v56 }
  0xe9   :  { %858 = vst [vmem:[%s1141_s3 + $0x58] sm:$0xff] %v786_v62   ;;  %v391_v1 = vadd.f32 %v1012_v37, %v390_v63 }
  0xea   :  { %v358_v2 = vpop.f32.mrf.mxu1  ;;  %852 = vst [vmem:[%s1141_s3 + $0x28] sm:$0xff] %v756_v0  }
  0xeb   :  { %v459_v4 = vmax.f32 %v391_v1, 0.0  ;;  %v359_v7 = vadd.f32 %v1012_v37, %v358_v2 }
  0xed   :  { %v821_v5 = vpack.c.bf16 %v459_v4, %v458_v3  ;;  %v446_v10 = vmax.f32 %v359_v7, 0.0 }
  0xef   :  { %865 = vst [vmem:[%s1141_s3 + $0x90] sm:$0xff] %v821_v5  }
  0xf0   :  { %v393_v6 = vpop.f32.mrf.mxu2 }
  0xf1   :  { %v394_v12 = vadd.f32 %v1012_v37, %v393_v6 }
  0xf2   :  { %v360_v8 = vpop.f32.mrf.mxu1 }
  0xf3   :  { %v361_v9 = vadd.f32 %v1012_v37, %v360_v8  ;;  %v460_v16 = vmax.f32 %v394_v12, 0.0 }
  0xf5   :  { %v447_v11 = vmax.f32 %v361_v9, 0.0 }
  0xf7   :  { %v791_v13 = vpack.c.bf16 %v447_v11, %v446_v10 }
  0xf8   :  { %v395_v14 = vpop.f32.mrf.mxu2 }
  0xf9   :  { %859 = vst [vmem:[%s1141_s3 + $0x60] sm:$0xff] %v791_v13   ;;  %v396_v15 = vadd.f32 %v1012_v37, %v395_v14 }
  0xfb   :  { %v461_v17 = vmax.f32 %v396_v15, 0.0 }
  0xfd   :  { %v826_v18 = vpack.c.bf16 %v461_v17, %v460_v16 }
  0xff   :  { %866 = vst [vmem:[%s1141_s3 + $0x98] sm:$0xff] %v826_v18  }

// kernel: autoencoder_forward.6
= control target key start
LH: loop header
LB: loop body
LE: loop exit
PB: predicated region body
PF: predicated region fallthrough
CT: control target
= control target key end

     0   :  { %vm164_vm0 = vcmask 130048   ;;  %s640_s1 = inlined_call_operand.vmem [shape: bf16[144,128], index: 1, kind: input, shape index: {}]   ;;  %s641_s0 = inlined_call_operand.vmem [shape: bf16[104,144], index: 0, kind: input, shape index: {}]   ;;  %s642_s2 = inlined_call_operand.vmem [shape: f32[1,128], index: 2, kind: input, shape index: {}]   ;;  %s643_s3 = inlined_call_operand.vmem [shape: bf16[104,128], index: 3, kind: output, shape index: {}]  }
   0x1   :  { %v425_v0 = vld [vmem:[%s640_s1 + $0x38] sm:$0xff]  ;;  %v426_v1 = vld [vmem:[%s640_s1 + $0x40] sm:$0xff]  ;;  %v319_v3 = vld [vmem:[%s641_s0 + $0x8] sm:$0xf0] }
   0x2   :  { %v406_v2 = vld [vmem:[%s641_s0 + $0x4] sm:$0xf]  ;;  %186 = vmatpush.bf16.msra.mxu0 %v425_v0  ;;  %462 = vmatpush.bf16.msra.mxu2 %v425_v0  ;;  %v424_v5 = vld [vmem:[%s640_s1 + $0x30] sm:$0xff]  ;;  %v423_v6 = vld [vmem:[%s640_s1 + $0x28] sm:$0xff] }
   0x3   :  { %v322_v4 = vor.u32 %v406_v2, %v319_v3  ;;  %236 = vmatpush.bf16.msra.mxu1 %v426_v1  ;;  %470 = vmatpush.bf16.msra.mxu3 %v426_v1  ;;  %v422_v7 = vld [vmem:[%s640_s1 + $0x20] sm:$0xff]  ;;  %v421_v8 = vld [vmem:[%s640_s1 + $0x18] sm:$0xff]  ;;  %v408_v9 = vld [vmem:[%s641_s0 + $0x14] sm:$0xf] }
   0x4   :  { %v327_v10 = vld [vmem:[%s641_s0 + $0x18] sm:$0xf0]  ;;  %v420_v12 = vld [vmem:[%s640_s1 + $0x10] sm:$0xff]  ;;  %v419_v13 = vld [vmem:[%s640_s1 + $0x8] sm:$0xff] }
   0x5   :  { %v330_v11 = vor.u32 %v408_v9, %v327_v10  ;;  %v416_v14 = vld [vmem:[%s641_s0 + $0x54] sm:$0xf]  ;;  %v359_v15 = vld [vmem:[%s641_s0 + $0x58] sm:$0xf0]  ;;  %v418_v17 = vld [vmem:[%s640_s1] sm:$0xff] }
   0x6   :  { %399 = vmatmul.msk.bf16.vlgmr.msra.gmra.mxu1 %vm164_vm0, %v322_v4  ;;  %187 = vmatpush.bf16.msra.mxu0 %v424_v5  ;;  %v362_v16 = vor.u32 %v416_v14, %v359_v15  ;;  %v317_v18 = vld [vmem:[%s641_s0] sm:$0xf]  ;;  %v407_v19 = vld [vmem:[%s641_s0 + $0x4] sm:$0xf0]  ;;  %v341_v20 = vld [vmem:[%s641_s0 + $0x30] sm:$0xf] }
   0x7   :  { %463 = vmatpush.bf16.msra.mxu2 %v424_v5  ;;  %v413_v21 = vld [vmem:[%s641_s0 + $0x34] sm:$0xf0]  ;;  %v318_v22 = vor.u32 %v407_v19, %v317_v18  ;;  %v410_v24 = vld [vmem:[%s641_s0 + $0x24] sm:$0xf]  ;;  %v335_v25 = vld [vmem:[%s641_s0 + $0x28] sm:$0xf0] }
   0x8   :  { %404 = vmatmul.msk.bf16.vlgmr.msra.gmra.mxu3 %vm164_vm0, %v362_v16  ;;  %v342_v23 = vor.u32 %v413_v21, %v341_v20  ;;  %v338_v26 = vor.u32 %v410_v24, %v335_v25  ;;  %v27_v27 = vld [vmem:[%s641_s0 + $0x60] sm:$0xff]  ;;  %v325_v30 = vld [vmem:[%s641_s0 + $0x10] sm:$0xf]  ;;  %v409_v31 = vld [vmem:[%s641_s0 + $0x14] sm:$0xf0] }
   0x9   :  { %v88_v28 = vunpack.c.h.b16 %v27_v27  ;;  %v349_v32 = vld [vmem:[%s641_s0 + $0x40] sm:$0xf]  ;;  %v415_v33 = vld [vmem:[%s641_s0 + $0x44] sm:$0xf0]  ;;  %v326_v34 = vor.u32 %v409_v31, %v325_v30  ;;  %v412_v36 = vld [vmem:[%s641_s0 + $0x34] sm:$0xf]  ;;  %v87_v48 = vunpack.c.l.b16 %v27_v27 }
   0xa   :  { %188 = vmatpush.bf16.msra.mxu0 %v423_v6  ;;  %v350_v35 = vor.u32 %v415_v33, %v349_v32  ;;  %v343_v37 = vld [vmem:[%s641_s0 + $0x38] sm:$0xf0]  ;;  %v333_v39 = vld [vmem:[%s641_s0 + $0x20] sm:$0xf]  ;;  %v411_v40 = vld [vmem:[%s641_s0 + $0x24] sm:$0xf0] }
   0xb   :  { %464 = vmatpush.bf16.msra.mxu2 %v423_v6  ;;  %v102_v29 = vpack.c.b16 %v88_v28, %v88_v28  ;;  %v346_v38 = vor.u32 %v412_v36, %v343_v37  ;;  %v357_v41 = vld [vmem:[%s641_s0 + $0x50] sm:$0xf]  ;;  %v417_v42 = vld [vmem:[%s641_s0 + $0x54] sm:$0xf0]  ;;  %v334_v43 = vor.u32 %v411_v40, %v333_v39  ;;  %v414_v45 = vld [vmem:[%s641_s0 + $0x44] sm:$0xf]  ;;  %v101_v49 = vpack.c.b16 %v87_v48, %v87_v48 }
   0xc   :  { %v358_v44 = vor.u32 %v417_v42, %v357_v41  ;;  %v351_v46 = vld [vmem:[%s641_s0 + $0x48] sm:$0xf0]  ;;  %v604_v56 = vld [vmem:[%s642_s2] ss:$0 sm:$0xff] }
   0xd   :  { %v354_v47 = vor.u32 %v414_v45, %v351_v46 }
   0xe   :  { %189 = vmatpush.bf16.msra.mxu0 %v422_v7 }
   0xf   :  { %465 = vmatpush.bf16.msra.mxu2 %v422_v7 }
  0x12   :  { %190 = vmatpush.bf16.msra.mxu0 %v421_v8 }
  0x13   :  { %466 = vmatpush.bf16.msra.mxu2 %v421_v8 }
  0x16   :  { %400 = vmatmul.msk.bf16.gmra.mxu1 %vm164_vm0, %v330_v11  ;;  %191 = vmatpush.bf16.msra.mxu0 %v420_v12 }
  0x17   :  { %467 = vmatpush.bf16.msra.mxu2 %v420_v12 }
  0x18   :  { %405 = vmatmul.msk.bf16.gmra.mxu3 %vm164_vm0, %v102_v29 }
  0x1a   :  { %192 = vmatpush.bf16.msra.mxu0 %v419_v13 }
  0x1b   :  { %468 = vmatpush.bf16.msra.mxu2 %v419_v13 }
  0x1e   :  { %193 = vmatpush.bf16.msra.mxu0 %v418_v17 }
  0x1f   :  { %469 = vmatpush.bf16.msra.mxu2 %v418_v17 }
  0x21   :  { %194 = vmatmul.bf16.vlgmr.msra.gmra.mxu0 %v318_v22 }
  0x22   :  { %209 = vmatmul.bf16.vlgmr.msra.gmra.mxu2 %v342_v23 }
  0x26   :  { %401 = vmatmul.msk.bf16.gmra.mxu1 %vm164_vm0, %v338_v26 }
  0x31   :  { %199 = vmatmul.bf16.gmra.mxu0 %v326_v34 }
  0x32   :  { %214 = vmatmul.bf16.gmra.mxu2 %v350_v35 }
  0x36   :  { %402 = vmatmul.msk.bf16.gmra.mxu1 %vm164_vm0, %v346_v38 }
  0x41   :  { %204 = vmatmul.bf16.gmra.mxu0 %v334_v43 }
  0x42   :  { %219 = vmatmul.bf16.gmra.mxu2 %v358_v44 }
  0x46   :  { %403 = vmatmul.msk.bf16.gmra.mxu1 %vm164_vm0, %v354_v47 }
  0x52   :  { %224 = vmatmul.bf16.gmra.mxu2 %v101_v49 }
  0x83   :  { %v238_v50 = vpop.f32.mrf.mxu1 }
  0x8b   :  { %v240_v51 = vpop.f32.mrf.mxu1  ;;  %v263_v55 = vpop.f32.mrf.mxu3 }
  0x93   :  { %v243_v52 = vpop.f32.mrf.mxu1  ;;  %v265_v61 = vpop.f32.mrf.mxu3 }
  0x9b   :  { %v245_v53 = vpop.f32.mrf.mxu1  ;;  %v268_v7 = vpop.f32.mrf.mxu3 }
  0x9e   :  { %v195_v54 = vpop.f32.mrf.mxu0 }
  0x9f   :  { %v196_v57 = vadd.f32 %v604_v56, %v195_v54 }
  0xa1   :  { %v239_v62 = vadd.f32 %v238_v50, %v196_v57 }
  0xa3   :  { %v248_v58 = vpop.f32.mrf.mxu1  ;;  %v272_v1 = vmax.f32 %v239_v62, 0.0  ;;  %v270_v12 = vpop.f32.mrf.mxu3 }
  0xa5   :  { %v210_v59 = vpop.f32.mrf.mxu2 }
  0xa6   :  { %v197_v60 = vpop.f32.mrf.mxu0  ;;  %v211_v15 = vadd.f32 %v604_v56, %v210_v59 }
  0xa7   :  { %v198_v63 = vadd.f32 %v604_v56, %v197_v60 }
  0xa9   :  { %v241_v0 = vadd.f32 %v240_v51, %v198_v63 }
  0xab   :  { %v273_v2 = vmax.f32 %v241_v0, 0.0  ;;  %v250_v3 = vpop.f32.mrf.mxu1 }
  0xad   :  { %v430_v4 = vpack.c.bf16 %v273_v2, %v272_v1  ;;  %v212_v5 = vpop.f32.mrf.mxu2 }
  0xae   :  { %v200_v6 = vpop.f32.mrf.mxu0  ;;  %v213_v17 = vadd.f32 %v604_v56, %v212_v5 }
  0xaf   :  { %431 = vst [vmem:[%s643_s3] sm:$0xff] %v430_v4   ;;  %v201_v8 = vadd.f32 %v604_v56, %v200_v6 }
  0xb1   :  { %v244_v13 = vadd.f32 %v243_v52, %v201_v8 }
  0xb3   :  { %v253_v9 = vpop.f32.mrf.mxu1  ;;  %v274_v19 = vmax.f32 %v244_v13, 0.0 }
  0xb4   :  { %v254_v18 = vadd.f32 %v253_v9, %v211_v15 }
  0xb5   :  { %v215_v10 = vpop.f32.mrf.mxu2 }
  0xb6   :  { %v202_v11 = vpop.f32.mrf.mxu0  ;;  %v278_v25 = vmax.f32 %v254_v18, 0.0  ;;  %v216_v35 = vadd.f32 %v604_v56, %v215_v10 }
  0xb7   :  { %v203_v14 = vadd.f32 %v604_v56, %v202_v11 }
  0xb9   :  { %v246_v16 = vadd.f32 %v245_v53, %v203_v14 }
  0xbb   :  { %v275_v20 = vmax.f32 %v246_v16, 0.0  ;;  %v255_v21 = vpop.f32.mrf.mxu1 }
  0xbc   :  { %v256_v22 = vadd.f32 %v255_v21, %v213_v17 }
  0xbd   :  { %v435_v23 = vpack.c.bf16 %v275_v20, %v274_v19  ;;  %v217_v24 = vpop.f32.mrf.mxu2 }
  0xbe   :  { %v279_v26 = vmax.f32 %v256_v22, 0.0  ;;  %v205_v27 = vpop.f32.mrf.mxu0  ;;  %v218_v37 = vadd.f32 %v604_v56, %v217_v24 }
  0xbf   :  { %457 = vst [vmem:[%s643_s3 + $0x8] sm:$0xff] %v435_v23   ;;  %v206_v29 = vadd.f32 %v604_v56, %v205_v27 }
  0xc0   :  { %v445_v28 = vpack.c.bf16 %v279_v26, %v278_v25 }
  0xc1   :  { %v249_v33 = vadd.f32 %v248_v58, %v206_v29 }
  0xc2   :  { %459 = vst [vmem:[%s643_s3 + $0x18] sm:$0xff] %v445_v28  }
  0xc3   :  { %v258_v30 = vpop.f32.mrf.mxu1  ;;  %v276_v40 = vmax.f32 %v249_v33, 0.0 }
  0xc4   :  { %v259_v38 = vadd.f32 %v258_v30, %v216_v35 }
  0xc5   :  { %v220_v31 = vpop.f32.mrf.mxu2 }
  0xc6   :  { %v207_v32 = vpop.f32.mrf.mxu0  ;;  %v221_v39 = vadd.f32 %v604_v56, %v220_v31  ;;  %v280_v46 = vmax.f32 %v259_v38, 0.0 }
  0xc7   :  { %v208_v34 = vadd.f32 %v604_v56, %v207_v32 }
  0xc8   :  { %v264_v47 = vadd.f32 %v263_v55, %v221_v39 }
  0xc9   :  { %v251_v36 = vadd.f32 %v250_v3, %v208_v34 }
  0xca   :  { %v282_v52 = vmax.f32 %v264_v47, 0.0 }
  0xcb   :  { %v277_v41 = vmax.f32 %v251_v36, 0.0  ;;  %v260_v42 = vpop.f32.mrf.mxu1 }
  0xcc   :  { %v261_v43 = vadd.f32 %v260_v42, %v218_v37 }
  0xcd   :  { %v440_v44 = vpack.c.bf16 %v277_v41, %v276_v40  ;;  %v222_v45 = vpop.f32.mrf.mxu2 }
  0xce   :  { %v281_v48 = vmax.f32 %v261_v43, 0.0  ;;  %v223_v49 = vadd.f32 %v604_v56, %v222_v45 }
  0xcf   :  { %458 = vst [vmem:[%s643_s3 + $0x10] sm:$0xff] %v440_v44  }
  0xd0   :  { %v450_v50 = vpack.c.bf16 %v281_v48, %v280_v46  ;;  %v266_v51 = vadd.f32 %v265_v61, %v223_v49 }
  0xd2   :  { %460 = vst [vmem:[%s643_s3 + $0x20] sm:$0xff] %v450_v50   ;;  %v283_v53 = vmax.f32 %v266_v51, 0.0 }
  0xd4   :  { %v455_v54 = vpack.c.bf16 %v283_v53, %v282_v52 }
  0xd5   :  { %v225_v57 = vpop.f32.mrf.mxu2 }
  0xd6   :  { %461 = vst [vmem:[%s643_s3 + $0x28] sm:$0xff] %v455_v54   ;;  %v226_v55 = vadd.f32 %v604_v56, %v225_v57 }
  0xd8   :  { %v269_v58 = vadd.f32 %v268_v7, %v226_v55 }
  0xda   :  { %v284_v59 = vmax.f32 %v269_v58, 0.0 }
  0xdc   :  { %v297_v60 = vpack.c.bf16 %v284_v59, %v284_v59 }
  0xdd   :  { %v227_v62 = vpop.f32.mrf.mxu2 }
  0xde   :  { %310 = vst [vmem:[%s643_s3 + $0x30] sm:$0xf] %v297_v60 }

// kernel: autoencoder_forward.7
= control target key start
LH: loop header
LB: loop body
LE: loop exit
PB: predicated region body
PF: predicated region fallthrough
CT: control target
= control target key end

     0   :  { %vm861_vm0 = vcmask 261120   ;;  %vm1385_vm1 = vcmask 523264   ;;  %vm1584_vm2 = vcmask 257024   ;;  %s3085_s1 = inlined_call_operand.vmem [shape: bf16[1568,64], index: 1, kind: input, shape index: {}]   ;;  %s3086_s2 = inlined_call_operand.vmem [shape: f32[1,64], index: 2, kind: input, shape index: {}]   ;;  %s3087_s0 = inlined_call_operand.vmem [shape: bf16[8,1568], index: 0, kind: input, shape index: {}]   ;;  %s3088_s3 = inlined_call_operand.vmem [shape: bf16[64,1568], index: 3, kind: input, shape index: {}]   ;;  %s3089_s4 = inlined_call_operand.vmem [shape: f32[1,1568], index: 4, kind: input, shape index: {}]   ;;  %s3090_s5 = inlined_call_operand.vmem [shape: bf16[8,1568], index: 5, kind: output, shape index: {}]  }
   0x1   :  { %v2211_v0 = vld [vmem:[%s3085_s1 + $0x38] sm:$0xff]  ;;  %v2210_v4 = vld [vmem:[%s3085_s1 + $0x30] sm:$0xff]  ;;  %v2209_v8 = vld [vmem:[%s3085_s1 + $0x28] sm:$0xff] }
   0x2   :  { %v2227_v1 = vld [vmem:[%s3085_s1 + $0xb8] sm:$0xff]  ;;  %865 = vmatpush.bf16.msra.mxu0 %v2211_v0  ;;  %v2226_v5 = vld [vmem:[%s3085_s1 + $0xb0] sm:$0xff]  ;;  %v2225_v9 = vld [vmem:[%s3085_s1 + $0xa8] sm:$0xff] }
   0x3   :  { %v2235_v2 = vld [vmem:[%s3085_s1 + $0xf8] sm:$0xff]  ;;  %891 = vmatpush.bf16.msra.mxu2 %v2227_v1  ;;  %v2234_v6 = vld [vmem:[%s3085_s1 + $0xf0] sm:$0xff]  ;;  %v2233_v10 = vld [vmem:[%s3085_s1 + $0xe8] sm:$0xff] }
   0x4   :  { %v2219_v3 = vld [vmem:[%s3085_s1 + $0x78] sm:$0xff]  ;;  %904 = vmatpush.bf16.msra.mxu3 %v2235_v2  ;;  %v2218_v7 = vld [vmem:[%s3085_s1 + $0x70] sm:$0xff]  ;;  %v2217_v11 = vld [vmem:[%s3085_s1 + $0x68] sm:$0xff] }
   0x5   :  { %878 = vmatpush.bf16.msra.mxu1 %v2219_v3  ;;  %v2208_v12 = vld [vmem:[%s3085_s1 + $0x20] sm:$0xff]  ;;  %v2207_v16 = vld [vmem:[%s3085_s1 + $0x18] sm:$0xff]  ;;  %v2206_v20 = vld [vmem:[%s3085_s1 + $0x10] sm:$0xff] }
   0x6   :  { %866 = vmatpush.bf16.msra.mxu0 %v2210_v4  ;;  %v2224_v13 = vld [vmem:[%s3085_s1 + $0xa0] sm:$0xff]  ;;  %v2223_v17 = vld [vmem:[%s3085_s1 + $0x98] sm:$0xff]  ;;  %v2222_v21 = vld [vmem:[%s3085_s1 + $0x90] sm:$0xff] }
   0x7   :  { %892 = vmatpush.bf16.msra.mxu2 %v2226_v5  ;;  %v2232_v14 = vld [vmem:[%s3085_s1 + $0xe0] sm:$0xff]  ;;  %v2231_v18 = vld [vmem:[%s3085_s1 + $0xd8] sm:$0xff]  ;;  %v2230_v22 = vld [vmem:[%s3085_s1 + $0xd0] sm:$0xff] }
   0x8   :  { %905 = vmatpush.bf16.msra.mxu3 %v2234_v6  ;;  %v2216_v15 = vld [vmem:[%s3085_s1 + $0x60] sm:$0xff]  ;;  %v2215_v19 = vld [vmem:[%s3085_s1 + $0x58] sm:$0xff]  ;;  %v2214_v23 = vld [vmem:[%s3085_s1 + $0x50] sm:$0xff] }
   0x9   :  { %879 = vmatpush.bf16.msra.mxu1 %v2218_v7  ;;  %v2205_v24 = vld [vmem:[%s3085_s1 + $0x8] sm:$0xff]  ;;  %v21_v29 = vld [vmem:[%s3087_s0] sm:$0xff]  ;;  %v2243_v35 = vld [vmem:[%s3085_s1 + $0x138] sm:$0xff] }
   0xa   :  { %867 = vmatpush.bf16.msra.mxu0 %v2209_v8  ;;  %v2221_v25 = vld [vmem:[%s3085_s1 + $0x88] sm:$0xff]  ;;  %v2204_v31 = vld [vmem:[%s3085_s1] sm:$0xff]  ;;  %v235_v33 = vunpack.c.l.b16 %v21_v29  ;;  %v2259_v37 = vld [vmem:[%s3085_s1 + $0x1b8] sm:$0xff]  ;;  %v236_v41 = vunpack.c.h.b16 %v21_v29 }
   0xb   :  { %893 = vmatpush.bf16.msra.mxu2 %v2225_v9  ;;  %v22_v26 = vld [vmem:[%s3087_s0 + $0x8] sm:$0xff]  ;;  %v2220_v32 = vld [vmem:[%s3085_s1 + $0x80] sm:$0xff]  ;;  %v2267_v38 = vld [vmem:[%s3085_s1 + $0x1f8] sm:$0xff] }
   0xc   :  { %906 = vmatpush.bf16.msra.mxu3 %v2233_v10  ;;  %v2229_v27 = vld [vmem:[%s3085_s1 + $0xc8] sm:$0xff]  ;;  %v237_v30 = vunpack.c.l.b16 %v22_v26  ;;  %v2228_v34 = vld [vmem:[%s3085_s1 + $0xc0] sm:$0xff]  ;;  %v238_v36 = vunpack.c.h.b16 %v22_v26  ;;  %v2251_v42 = vld [vmem:[%s3085_s1 + $0x178] sm:$0xff]  ;;  %v248_v43 = vpack.c.b16 %v235_v33, %v235_v33  ;;  %v249_v48 = vpack.c.b16 %v236_v41, %v236_v41 }
   0xd   :  { %880 = vmatpush.bf16.msra.mxu1 %v2217_v11  ;;  %v2213_v28 = vld [vmem:[%s3085_s1 + $0x48] sm:$0xff]  ;;  %v2212_v39 = vld [vmem:[%s3085_s1 + $0x40] sm:$0xff]  ;;  %v2242_v44 = vld [vmem:[%s3085_s1 + $0x130] sm:$0xff] }
   0xe   :  { %868 = vmatpush.bf16.msra.mxu0 %v2208_v12  ;;  %v250_v40 = vpack.c.b16 %v237_v30, %v237_v30  ;;  %v251_v45 = vpack.c.b16 %v238_v36, %v238_v36  ;;  %v2258_v46 = vld [vmem:[%s3085_s1 + $0x1b0] sm:$0xff]  ;;  %v2241_v50 = vld [vmem:[%s3085_s1 + $0x128] sm:$0xff]  ;;  %v2240_v54 = vld [vmem:[%s3085_s1 + $0x120] sm:$0xff] }
   0xf   :  { %894 = vmatpush.bf16.msra.mxu2 %v2224_v13  ;;  %v2266_v47 = vld [vmem:[%s3085_s1 + $0x1f0] sm:$0xff]  ;;  %v2257_v51 = vld [vmem:[%s3085_s1 + $0x1a8] sm:$0xff]  ;;  %v2256_v55 = vld [vmem:[%s3085_s1 + $0x1a0] sm:$0xff] }
  0x10   :  { %907 = vmatpush.bf16.msra.mxu3 %v2232_v14  ;;  %v2250_v49 = vld [vmem:[%s3085_s1 + $0x170] sm:$0xff]  ;;  %v2265_v52 = vld [vmem:[%s3085_s1 + $0x1e8] sm:$0xff]  ;;  %v2264_v56 = vld [vmem:[%s3085_s1 + $0x1e0] sm:$0xff] }
  0x11   :  { %881 = vmatpush.bf16.msra.mxu1 %v2216_v15  ;;  %v2249_v53 = vld [vmem:[%s3085_s1 + $0x168] sm:$0xff]  ;;  %v2248_v57 = vld [vmem:[%s3085_s1 + $0x160] sm:$0xff]  ;;  %v2239_v58 = vld [vmem:[%s3085_s1 + $0x118] sm:$0xff] }
  0x12   :  { %869 = vmatpush.bf16.msra.mxu0 %v2207_v16  ;;  %v2255_v59 = vld [vmem:[%s3085_s1 + $0x198] sm:$0xff]  ;;  %v2238_v62 = vld [vmem:[%s3085_s1 + $0x110] sm:$0xff]  ;;  %v2237_v2 = vld [vmem:[%s3085_s1 + $0x108] sm:$0xff] }
  0x13   :  { %895 = vmatpush.bf16.msra.mxu2 %v2223_v17  ;;  %v2263_v60 = vld [vmem:[%s3085_s1 + $0x1d8] sm:$0xff]  ;;  %v2254_v63 = vld [vmem:[%s3085_s1 + $0x190] sm:$0xff]  ;;  %v2253_v3 = vld [vmem:[%s3085_s1 + $0x188] sm:$0xff] }
  0x14   :  { %908 = vmatpush.bf16.msra.mxu3 %v2231_v18  ;;  %v2247_v61 = vld [vmem:[%s3085_s1 + $0x158] sm:$0xff]  ;;  %v2262_v0 = vld [vmem:[%s3085_s1 + $0x1d0] sm:$0xff]  ;;  %v2261_v4 = vld [vmem:[%s3085_s1 + $0x1c8] sm:$0xff] }
  0x15   :  { %882 = vmatpush.bf16.msra.mxu1 %v2215_v19  ;;  %v2246_v1 = vld [vmem:[%s3085_s1 + $0x150] sm:$0xff]  ;;  %v24_v5 = vld [vmem:[%s3087_s0 + $0x18] sm:$0xff]  ;;  %v2245_v7 = vld [vmem:[%s3085_s1 + $0x148] sm:$0xff] }
  0x16   :  { %870 = vmatpush.bf16.msra.mxu0 %v2206_v20  ;;  %v23_v6 = vld [vmem:[%s3087_s0 + $0x10] sm:$0xff]  ;;  %v2236_v8 = vld [vmem:[%s3085_s1 + $0x100] sm:$0xff]  ;;  %v241_v9 = vunpack.c.l.b16 %v24_v5  ;;  %v242_v13 = vunpack.c.h.b16 %v24_v5  ;;  %v2275_v14 = vld [vmem:[%s3085_s1 + $0x238] sm:$0xff] }
  0x17   :  { %896 = vmatpush.bf16.msra.mxu2 %v2222_v21  ;;  %v2252_v10 = vld [vmem:[%s3085_s1 + $0x180] sm:$0xff]  ;;  %v239_v12 = vunpack.c.l.b16 %v23_v6  ;;  %v2291_v15 = vld [vmem:[%s3085_s1 + $0x2b8] sm:$0xff]  ;;  %v240_v18 = vunpack.c.h.b16 %v23_v6  ;;  %v2289_v29 = vld [vmem:[%s3085_s1 + $0x2a8] sm:$0xff] }
  0x18   :  { %909 = vmatpush.bf16.msra.mxu3 %v2230_v22  ;;  %v2260_v11 = vld [vmem:[%s3085_s1 + $0x1c0] sm:$0xff]  ;;  %v2299_v16 = vld [vmem:[%s3085_s1 + $0x2f8] sm:$0xff]  ;;  %v254_v20 = vpack.c.b16 %v241_v9, %v241_v9  ;;  %v255_v22 = vpack.c.b16 %v242_v13, %v242_v13  ;;  %v2297_v30 = vld [vmem:[%s3085_s1 + $0x2e8] sm:$0xff] }
  0x19   :  { %883 = vmatpush.bf16.msra.mxu1 %v2214_v23  ;;  %v2244_v17 = vld [vmem:[%s3085_s1 + $0x140] sm:$0xff]  ;;  %v2283_v19 = vld [vmem:[%s3085_s1 + $0x278] sm:$0xff]  ;;  %v252_v21 = vpack.c.b16 %v239_v12, %v239_v12  ;;  %v2274_v23 = vld [vmem:[%s3085_s1 + $0x230] sm:$0xff]  ;;  %v253_v26 = vpack.c.b16 %v240_v18, %v240_v18 }
  0x1a   :  { %871 = vmatpush.bf16.msra.mxu0 %v2205_v24  ;;  %v2290_v24 = vld [vmem:[%s3085_s1 + $0x2b0] sm:$0xff]  ;;  %v2288_v33 = vld [vmem:[%s3085_s1 + $0x2a0] sm:$0xff]  ;;  %v2271_v36 = vld [vmem:[%s3085_s1 + $0x218] sm:$0xff] }
  0x1b   :  { %897 = vmatpush.bf16.msra.mxu2 %v2221_v25  ;;  %v2298_v25 = vld [vmem:[%s3085_s1 + $0x2f0] sm:$0xff]  ;;  %v2141_v12 = vld [vmem:[%s3088_s3 + $0x138] sm:$0xf]  ;;  %v2347_v13 = vld [vmem:[%s3088_s3 + $0x168] sm:$0xf0] }
  0x1c   :  { %910 = vmatpush.bf16.msra.mxu3 %v2229_v27  ;;  %v2282_v27 = vld [vmem:[%s3085_s1 + $0x270] sm:$0xff]  ;;  %v2149_v18 = vld [vmem:[%s3088_s3 + $0x140] sm:$0xf] }
  0x1d   :  { %884 = vmatpush.bf16.msra.mxu1 %v2213_v28  ;;  %v2273_v28 = vld [vmem:[%s3085_s1 + $0x228] sm:$0xff]  ;;  %v2286_v41 = vld [vmem:[%s3085_s1 + $0x290] sm:$0xff] }
  0x1e   :  { %872 = vmatpush.bf16.msra.mxu0 %v2204_v31  ;;  %v2281_v31 = vld [vmem:[%s3085_s1 + $0x268] sm:$0xff] }
  0x1f   :  { %898 = vmatpush.bf16.msra.mxu2 %v2220_v32  ;;  %v2272_v32 = vld [vmem:[%s3085_s1 + $0x220] sm:$0xff] }
  0x20   :  { %911 = vmatpush.bf16.msra.mxu3 %v2228_v34  ;;  %v2296_v34 = vld [vmem:[%s3085_s1 + $0x2e0] sm:$0xff] }
  0x21   :  { %885 = vmatpush.bf16.msra.mxu1 %v2212_v39  ;;  %873 = vmatmul.bf16.vlgmr.msra.gmra.mxu0 %v248_v43  ;;  %v2279_v39 = vld [vmem:[%s3085_s1 + $0x258] sm:$0xff]  ;;  %v2278_v43 = vld [vmem:[%s3085_s1 + $0x250] sm:$0xff] }
  0x22   :  { %917 = vmatpush.bf16.msrb.mxu0 %v2243_v35  ;;  %899 = vmatmul.bf16.vlgmr.msra.gmra.mxu2 %v250_v40  ;;  %v2280_v35 = vld [vmem:[%s3085_s1 + $0x260] sm:$0xff]  ;;  %v2270_v40 = vld [vmem:[%s3085_s1 + $0x210] sm:$0xff] }
  0x23   :  { %943 = vmatpush.bf16.msrb.mxu2 %v2259_v37  ;;  %912 = vmatmul.bf16.vlgmr.msra.gmra.mxu3 %v251_v45  ;;  %v2287_v37 = vld [vmem:[%s3085_s1 + $0x298] sm:$0xff]  ;;  %v2285_v45 = vld [vmem:[%s3085_s1 + $0x288] sm:$0xff] }
  0x24   :  { %956 = vmatpush.bf16.msrb.mxu3 %v2267_v38  ;;  %886 = vmatmul.bf16.vlgmr.msra.gmra.mxu1 %v249_v48  ;;  %v2295_v38 = vld [vmem:[%s3085_s1 + $0x2d8] sm:$0xff]  ;;  %v2293_v48 = vld [vmem:[%s3085_s1 + $0x2c8] sm:$0xff] }
  0x25   :  { %930 = vmatpush.bf16.msrb.mxu1 %v2251_v42  ;;  %v2294_v42 = vld [vmem:[%s3085_s1 + $0x2d0] sm:$0xff] }
  0x26   :  { %918 = vmatpush.bf16.msrb.mxu0 %v2242_v44  ;;  %v2269_v44 = vld [vmem:[%s3085_s1 + $0x208] sm:$0xff] }
  0x27   :  { %944 = vmatpush.bf16.msrb.mxu2 %v2258_v46  ;;  %v25_v46 = vld [vmem:[%s3087_s0 + $0x20] sm:$0xff] }
  0x28   :  { %957 = vmatpush.bf16.msrb.mxu3 %v2266_v47  ;;  %v26_v47 = vld [vmem:[%s3087_s0 + $0x28] sm:$0xff] }
  0x29   :  { %931 = vmatpush.bf16.msrb.mxu1 %v2250_v49  ;;  %v2277_v49 = vld [vmem:[%s3085_s1 + $0x248] sm:$0xff] }
  0x2a   :  { %919 = vmatpush.bf16.msrb.mxu0 %v2241_v50  ;;  %v243_v50 = vunpack.c.l.b16 %v25_v46 }
  0x2b   :  { %945 = vmatpush.bf16.msrb.mxu2 %v2257_v51  ;;  %v245_v51 = vunpack.c.l.b16 %v26_v47 }
  0x2c   :  { %958 = vmatpush.bf16.msrb.mxu3 %v2265_v52  ;;  %v2268_v52 = vld [vmem:[%s3085_s1 + $0x200] sm:$0xff] }
  0x2d   :  { %932 = vmatpush.bf16.msrb.mxu1 %v2249_v53  ;;  %v2284_v53 = vld [vmem:[%s3085_s1 + $0x280] sm:$0xff] }
  0x2e   :  { %920 = vmatpush.bf16.msrb.mxu0 %v2240_v54  ;;  %v246_v54 = vunpack.c.h.b16 %v26_v47  ;;  %v2039_v47 = vld [vmem:[%s3088_s3 + $0x9c] sm:$0xf0] }
  0x2f   :  { %946 = vmatpush.bf16.msrb.mxu2 %v2256_v55  ;;  %v2292_v55 = vld [vmem:[%s3085_s1 + $0x2c0] sm:$0xff] }
  0x30   :  { %959 = vmatpush.bf16.msrb.mxu3 %v2264_v56  ;;  %v2301_v56 = vld [vmem:[%s3085_s1 + $0x308] sm:$0xff] }
  0x31   :  { %933 = vmatpush.bf16.msrb.mxu1 %v2248_v57  ;;  %v244_v57 = vunpack.c.h.b16 %v25_v46  ;;  %v2315_v46 = vld [vmem:[%s3088_s3 + $0x6c] sm:$0xf] }
  0x32   :  { %921 = vmatpush.bf16.msrb.mxu0 %v2239_v58  ;;  %v2276_v58 = vld [vmem:[%s3085_s1 + $0x240] sm:$0xff] }
  0x33   :  { %947 = vmatpush.bf16.msrb.mxu2 %v2255_v59  ;;  %v256_v59 = vpack.c.b16 %v243_v50, %v243_v50  ;;  %v2322_v50 = vld [vmem:[%s3088_s3 + $0xa0] sm:$0xf0] }
  0x34   :  { %960 = vmatpush.bf16.msrb.mxu3 %v2263_v60  ;;  %v258_v60 = vpack.c.b16 %v245_v51, %v245_v51  ;;  %v2316_v51 = vld [vmem:[%s3088_s3 + $0x74] sm:$0xf] }
  0x35   :  { %934 = vmatpush.bf16.msrb.mxu1 %v2247_v61  ;;  %v259_v61 = vpack.c.b16 %v246_v54, %v246_v54 }
  0x36   :  { %922 = vmatpush.bf16.msrb.mxu0 %v2238_v62  ;;  %v257_v62 = vpack.c.b16 %v244_v57, %v244_v57  ;;  %v1985_v57 = vld [vmem:[%s3088_s3] sm:$0xf] }
  0x37   :  { %948 = vmatpush.bf16.msrb.mxu2 %v2254_v63  ;;  %v2300_v63 = vld [vmem:[%s3085_s1 + $0x300] sm:$0xff] }
  0x38   :  { %961 = vmatpush.bf16.msrb.mxu3 %v2262_v0  ;;  %v27_v0 = vld [vmem:[%s3087_s0 + $0x30] sm:$0xf] }
  0x39   :  { %935 = vmatpush.bf16.msrb.mxu1 %v2246_v1  ;;  %v247_v1 = vunpack.c.l.b16 %v27_v0  ;;  %v2309_v0 = vld [vmem:[%s3088_s3 + $0x38] sm:$0xf0] }
  0x3a   :  { %923 = vmatpush.bf16.msrb.mxu0 %v2237_v2 }
  0x3b   :  { %949 = vmatpush.bf16.msrb.mxu2 %v2253_v3  ;;  %v260_v2 = vpack.c.b16 %v247_v1, %v247_v1 }
  0x3c   :  { %962 = vmatpush.bf16.msrb.mxu3 %v2261_v4 }
  0x3d   :  { %936 = vmatpush.bf16.msrb.mxu1 %v2245_v7 }
  0x3e   :  { %924 = vmatpush.bf16.msrb.mxu0 %v2236_v8 }
  0x3f   :  { %950 = vmatpush.bf16.msrb.mxu2 %v2252_v10 }
  0x40   :  { %963 = vmatpush.bf16.msrb.mxu3 %v2260_v11  ;;  %v2354_v11 = vld [vmem:[%s3086_s2] ss:$0 sm:$0xff] }
  0x41   :  { %937 = vmatpush.bf16.msrb.mxu1 %v2244_v17  ;;  %925 = vmatmul.bf16.vlgmr.msrb.gmra.mxu0 %v252_v21  ;;  %v2143_v17 = vld [vmem:[%s3088_s3 + $0x16c] sm:$0xf0]  ;;  %v2342_v21 = vld [vmem:[%s3088_s3 + $0x144] sm:$0xf] }
  0x42   :  { %969 = vmatpush.bf16.msra.mxu0 %v2275_v14  ;;  %951 = vmatmul.bf16.vlgmr.msrb.gmra.mxu2 %v254_v20  ;;  %v2348_v20 = vld [vmem:[%s3088_s3 + $0x170] sm:$0xf0] }
  0x43   :  { %995 = vmatpush.bf16.msra.mxu2 %v2291_v15  ;;  %964 = vmatmul.bf16.vlgmr.msrb.gmra.mxu3 %v255_v22  ;;  %v2142_v15 = vor.u32 %v2347_v13, %v2141_v12  ;;  %v2151_v22 = vld [vmem:[%s3088_s3 + $0x174] sm:$0xf0]  ;;  %v2165_v13 = vld [vmem:[%s3088_s3 + $0x150] sm:$0xf] }
  0x44   :  { %1008 = vmatpush.bf16.msra.mxu3 %v2299_v16  ;;  %938 = vmatmul.bf16.vlgmr.msrb.gmra.mxu1 %v253_v26  ;;  %v2341_v16 = vld [vmem:[%s3088_s3 + $0x13c] sm:$0xf] }
  0x45   :  { %982 = vmatpush.bf16.msra.mxu1 %v2283_v19  ;;  %v2146_v19 = vor.u32 %v2341_v16, %v2143_v17 }
  0x46   :  { %970 = vmatpush.bf16.msra.mxu0 %v2274_v23 }
  0x47   :  { %996 = vmatpush.bf16.msra.mxu2 %v2290_v24  ;;  %v2150_v24 = vor.u32 %v2348_v20, %v2149_v18  ;;  %v2344_v18 = vld [vmem:[%s3088_s3 + $0x154] sm:$0xf] }
  0x48   :  { %1009 = vmatpush.bf16.msra.mxu3 %v2298_v25  ;;  %v2154_v25 = vor.u32 %v2342_v21, %v2151_v22  ;;  %v2105_v22 = vld [vmem:[%s3088_s3 + $0xe0] sm:$0xf] }
  0x49   :  { %983 = vmatpush.bf16.msra.mxu1 %v2282_v27  ;;  %v2089_v27 = vld [vmem:[%s3088_s3 + $0xd0] sm:$0xf] }
  0x4a   :  { %971 = vmatpush.bf16.msra.mxu0 %v2273_v28  ;;  %v2334_v28 = vld [vmem:[%s3088_s3 + $0x100] sm:$0xf0] }
  0x4b   :  { %997 = vmatpush.bf16.msra.mxu2 %v2289_v29  ;;  %v2328_v29 = vld [vmem:[%s3088_s3 + $0xd4] sm:$0xf] }
  0x4c   :  { %1010 = vmatpush.bf16.msra.mxu3 %v2297_v30 }
  0x4d   :  { %984 = vmatpush.bf16.msra.mxu1 %v2281_v31  ;;  %v2090_v31 = vor.u32 %v2334_v28, %v2089_v27  ;;  %v2113_v27 = vld [vmem:[%s3088_s3 + $0xe8] sm:$0xf]  ;;  %v2337_v28 = vld [vmem:[%s3088_s3 + $0x118] sm:$0xf0] }
  0x4e   :  { %972 = vmatpush.bf16.msra.mxu0 %v2272_v32  ;;  %v2091_v32 = vld [vmem:[%s3088_s3 + $0x104] sm:$0xf0] }
  0x4f   :  { %998 = vmatpush.bf16.msra.mxu2 %v2288_v33  ;;  %v2097_v33 = vld [vmem:[%s3088_s3 + $0xd8] sm:$0xf] }
  0x50   :  { %1011 = vmatpush.bf16.msra.mxu3 %v2296_v34  ;;  %v2335_v34 = vld [vmem:[%s3088_s3 + $0x108] sm:$0xf0] }
  0x51   :  { %985 = vmatpush.bf16.msra.mxu1 %v2280_v35 }
  0x52   :  { %973 = vmatpush.bf16.msra.mxu0 %v2271_v36  ;;  %v2094_v36 = vor.u32 %v2328_v29, %v2091_v32  ;;  %v2331_v32 = vld [vmem:[%s3088_s3 + $0xec] sm:$0xf] }
  0x53   :  { %999 = vmatpush.bf16.msra.mxu2 %v2287_v37  ;;  %v2098_v37 = vor.u32 %v2335_v34, %v2097_v33  ;;  %v2115_v33 = vld [vmem:[%s3088_s3 + $0x11c] sm:$0xf0]  ;;  %v2053_v34 = vld [vmem:[%s3088_s3 + $0x78] sm:$0xf] }
  0x54   :  { %1012 = vmatpush.bf16.msra.mxu3 %v2295_v38  ;;  %v2329_v38 = vld [vmem:[%s3088_s3 + $0xdc] sm:$0xf] }
  0x55   :  { %986 = vmatpush.bf16.msra.mxu1 %v2279_v39  ;;  %v2099_v39 = vld [vmem:[%s3088_s3 + $0x10c] sm:$0xf0] }
  0x56   :  { %974 = vmatpush.bf16.msra.mxu0 %v2270_v40  ;;  %v2037_v40 = vld [vmem:[%s3088_s3 + $0x68] sm:$0xf] }
  0x57   :  { %1000 = vmatpush.bf16.msra.mxu2 %v2286_v41 }
  0x58   :  { %1013 = vmatpush.bf16.msra.mxu3 %v2294_v42  ;;  %v2102_v42 = vor.u32 %v2329_v38, %v2099_v39  ;;  %v2323_v38 = vld [vmem:[%s3088_s3 + $0xa8] sm:$0xf0]  ;;  %v2317_v39 = vld [vmem:[%s3088_s3 + $0x7c] sm:$0xf] }
  0x59   :  { %987 = vmatpush.bf16.msra.mxu1 %v2278_v43  ;;  %v2321_v43 = vld [vmem:[%s3088_s3 + $0x98] sm:$0xf0] }
  0x5a   :  { %975 = vmatpush.bf16.msra.mxu0 %v2269_v44 }
  0x5b   :  { %1001 = vmatpush.bf16.msra.mxu2 %v2285_v45  ;;  %v2038_v45 = vor.u32 %v2321_v43, %v2037_v40  ;;  %v2055_v40 = vld [vmem:[%s3088_s3 + $0xac] sm:$0xf0]  ;;  %v2324_v43 = vld [vmem:[%s3088_s3 + $0xb0] sm:$0xf0] }
  0x5c   :  { %1014 = vmatpush.bf16.msra.mxu3 %v2293_v48  ;;  %v2045_v48 = vld [vmem:[%s3088_s3 + $0x70] sm:$0xf] }
  0x5d   :  { %988 = vmatpush.bf16.msra.mxu1 %v2277_v49  ;;  %v2042_v49 = vor.u32 %v2315_v46, %v2039_v47  ;;  %v2046_v54 = vor.u32 %v2322_v50, %v2045_v48  ;;  %v2063_v46 = vld [vmem:[%s3088_s3 + $0xb4] sm:$0xf0]  ;;  %v2001_v47 = vld [vmem:[%s3088_s3 + $0x10] sm:$0xf]  ;;  %v2310_v48 = vld [vmem:[%s3088_s3 + $0x40] sm:$0xf0] }
  0x5e   :  { %976 = vmatpush.bf16.msra.mxu0 %v2268_v52  ;;  %v2047_v52 = vld [vmem:[%s3088_s3 + $0xa4] sm:$0xf0]  ;;  %v2304_v50 = vld [vmem:[%s3088_s3 + $0x14] sm:$0xf] }
  0x5f   :  { %1002 = vmatpush.bf16.msra.mxu2 %v2284_v53 }
  0x60   :  { %1015 = vmatpush.bf16.msra.mxu3 %v2292_v55  ;;  %v2050_v55 = vor.u32 %v2316_v51, %v2047_v52  ;;  %v2003_v51 = vld [vmem:[%s3088_s3 + $0x44] sm:$0xf0]  ;;  %v2009_v52 = vld [vmem:[%s3088_s3 + $0x18] sm:$0xf] }
  0x61   :  { %989 = vmatpush.bf16.msra.mxu1 %v2276_v58  ;;  %977 = vmatmul.bf16.vlgmr.msra.gmra.mxu0 %v256_v59  ;;  %v2308_v58 = vld [vmem:[%s3088_s3 + $0x30] sm:$0xf0]  ;;  %v2302_v59 = vld [vmem:[%s3088_s3 + $0x4] sm:$0xf] }
  0x62   :  { %1027 = vmatpush.bf16.msrb.mxu0 %v2301_v56  ;;  %1003 = vmatmul.bf16.vlgmr.msra.gmra.mxu2 %v258_v60 }
  0x63   :  { %1016 = vmatmul.bf16.vlgmr.msra.gmra.mxu3 %v259_v61  ;;  %1406 = vmatpush.bf16.msrb.mxu2 %v2146_v19  ;;  %v1986_v61 = vor.u32 %v2308_v58, %v1985_v57  ;;  %v2167_v19 = vld [vmem:[%s3088_s3 + $0x184] sm:$0xf0]  ;;  %v2011_v57 = vld [vmem:[%s3088_s3 + $0x4c] sm:$0xf0] }
  0x64   :  { %990 = vmatmul.bf16.vlgmr.msra.gmra.mxu1 %v257_v62  ;;  %1419 = vmatpush.bf16.msrb.mxu3 %v2150_v24  ;;  %v1987_v62 = vld [vmem:[%s3088_s3 + $0x34] sm:$0xf0]  ;;  %v2170_v21 = vor.u32 %v2344_v18, %v2167_v19  ;;  %v2336_v24 = vld [vmem:[%s3088_s3 + $0x110] sm:$0xf0] }
  0x65   :  { %1393 = vmatpush.bf16.msrb.mxu1 %v2142_v15  ;;  %v2350_v15 = vld [vmem:[%s3088_s3 + $0x180] sm:$0xf0]  ;;  %v2183_v18 = vld [vmem:[%s3088_s3 + $0x194] sm:$0xf0] }
  0x66   :  { %1028 = vmatpush.bf16.msrb.mxu0 %v2300_v63  ;;  %v1993_v63 = vld [vmem:[%s3088_s3 + $0x8] sm:$0xf]  ;;  %v2166_v17 = vor.u32 %v2350_v15, %v2165_v13  ;;  %v2181_v13 = vld [vmem:[%s3088_s3 + $0x160] sm:$0xf] }
  0x67   :  { %1407 = vmatpush.bf16.msrb.mxu2 %v2094_v36 }
  0x68   :  { %1420 = vmatpush.bf16.msrb.mxu3 %v2098_v37  ;;  %v2118_v37 = vor.u32 %v2331_v32, %v2115_v33  ;;  %v2131_v32 = vld [vmem:[%s3088_s3 + $0x12c] sm:$0xf0] }
  0x69   :  { %1394 = vmatpush.bf16.msrb.mxu1 %v2090_v31  ;;  %v2114_v31 = vor.u32 %v2337_v28, %v2113_v27  ;;  %v2123_v27 = vld [vmem:[%s3088_s3 + $0x124] sm:$0xf0]  ;;  %v2129_v28 = vld [vmem:[%s3088_s3 + $0xf8] sm:$0xf] }
  0x6a   :  { %1432 = vmatpush.bf16.msra.mxu0 %v2154_v25  ;;  %v2330_v25 = vld [vmem:[%s3088_s3 + $0xe4] sm:$0xf] }
  0x6b   :  { %1408 = vmatpush.bf16.msrb.mxu2 %v2042_v49 }
  0x6c   :  { %1421 = vmatpush.bf16.msrb.mxu3 %v2046_v54  ;;  %v2002_v54 = vor.u32 %v2310_v48, %v2001_v47  ;;  %v2017_v48 = vld [vmem:[%s3088_s3 + $0x20] sm:$0xf] }
  0x6d   :  { %1395 = vmatpush.bf16.msrb.mxu1 %v2038_v45 }
  0x6e   :  { %1433 = vmatpush.bf16.msra.mxu0 %v2102_v42  ;;  %v2058_v42 = vor.u32 %v2317_v39, %v2055_v40 }
  0x71   :  { %1982 = vmatmul.msk.bf16.vlgmr.msrb.gmra.mxu0 %vm861_vm0, %v260_v2  ;;  %v1990_v2 = vor.u32 %v2302_v59, %v1987_v62  ;;  %1396 = vmatpush.bf16.msrb.mxu1 %v1986_v61  ;;  %v2006_v59 = vor.u32 %v2304_v50, %v2003_v51 }
  0x72   :  { %1434 = vmatpush.bf16.msra.mxu0 %v2050_v55  ;;  %v2311_v55 = vld [vmem:[%s3088_s3 + $0x48] sm:$0xf0] }
  0x73   :  { %1409 = vmatpush.bf16.msrb.mxu2 %v1990_v2 }
  0x9e   :  { %v874_v3 = vpop.f32.mrf.mxu0 }
  0x9f   :  { %v875_v26 = vadd.f32 %v2354_v11, %v874_v3  ;;  %v1994_v3 = vor.u32 %v2309_v0, %v1993_v63  ;;  %v2343_v11 = vld [vmem:[%s3088_s3 + $0x14c] sm:$0xf] }
  0xa1   :  { %v887_v4 = vpop.f32.mrf.mxu1  ;;  %1422 = vmatpush.bf16.msrb.mxu3 %v1994_v3 }
  0xa2   :  { %v888_v41 = vadd.f32 %v887_v4, %v875_v26  ;;  %v2303_v4 = vld [vmem:[%s3088_s3 + $0xc] sm:$0xf]  ;;  %v2106_v26 = vor.u32 %v2336_v24, %v2105_v22  ;;  %v2121_v22 = vld [vmem:[%s3088_s3 + $0xf0] sm:$0xf]  ;;  %v2338_v24 = vld [vmem:[%s3088_s3 + $0x120] sm:$0xf0] }
  0xa3   :  { %v2122_v33 = vor.u32 %v2338_v24, %v2121_v22 }
  0xa5   :  { %v900_v5 = vpop.f32.mrf.mxu2  ;;  %1471 = vmatpush.bf16.msra.mxu3 %v2166_v17  ;;  %v2346_v17 = vld [vmem:[%s3088_s3 + $0x164] sm:$0xf] }
  0xa6   :  { %v2700_v6 = vpop.f32.mrf.mxu3  ;;  %v876_v7 = vpop.f32.mrf.mxu0  ;;  %v901_v56 = vadd.f32 %v900_v5, %v888_v41  ;;  %v1995_v5 = vld [vmem:[%s3088_s3 + $0x3c] sm:$0xf0]  ;;  %v2054_v41 = vor.u32 %v2323_v38, %v2053_v34 }
  0xa8   :  { %v914_v7 = vadd.f32 %v2700_v6, %v901_v56  ;;  %v2159_v6 = vld [vmem:[%s3088_s3 + $0x17c] sm:$0xf0]  ;;  %v2305_v56 = vld [vmem:[%s3088_s3 + $0x1c] sm:$0xf] }
  0xa9   :  { %v889_v8 = vpop.f32.mrf.mxu1  ;;  %v2162_v16 = vor.u32 %v2343_v11, %v2159_v6  ;;  %1472 = vmatpush.bf16.msra.mxu3 %v2114_v31  ;;  %v2175_v6 = vld [vmem:[%s3088_s3 + $0x18c] sm:$0xf0]  ;;  %v2333_v31 = vld [vmem:[%s3088_s3 + $0xfc] sm:$0xf] }
  0xaa   :  { %v1998_v8 = vor.u32 %v2303_v4, %v1995_v5  ;;  %v2134_v40 = vor.u32 %v2333_v31, %v2131_v32 }
  0xab   :  { %1458 = vmatpush.bf16.msra.mxu2 %v2162_v16  ;;  %v2352_v16 = vld [vmem:[%s3088_s3 + $0x190] sm:$0xf0] }
  0xac   :  { %1435 = vmatpush.bf16.msra.mxu0 %v1998_v8 }
  0xad   :  { %v902_v9 = vpop.f32.mrf.mxu2 }
  0xae   :  { %v915_v10 = vpop.f32.mrf.mxu3  ;;  %v2157_v9 = vld [vmem:[%s3088_s3 + $0x148] sm:$0xf] }
  0xaf   :  { %v2349_v10 = vld [vmem:[%s3088_s3 + $0x178] sm:$0xf0] }
  0xb0   :  { %v2158_v12 = vor.u32 %v2349_v10, %v2157_v9  ;;  %1484 = vmatpush.bf16.msrb.mxu0 %v2170_v21  ;;  %v2173_v10 = vld [vmem:[%s3088_s3 + $0x158] sm:$0xf] }
  0xb2   :  { %1445 = vmatpush.bf16.msra.mxu1 %v2158_v12  ;;  %v2345_v12 = vld [vmem:[%s3088_s3 + $0x15c] sm:$0xf] }
  0xb3   :  { %v2178_v21 = vor.u32 %v2345_v12, %v2175_v6 }
  0xb4   :  { %1485 = vmatpush.bf16.msrb.mxu0 %v2118_v37  ;;  %v2325_v37 = vld [vmem:[%s3088_s3 + $0xb8] sm:$0xf0] }
  0xb6   :  { %1446 = vmatpush.bf16.msra.mxu1 %v2106_v26  ;;  %v2186_v26 = vor.u32 %v2346_v17, %v2183_v18 }
  0xba   :  { %1447 = vmatpush.bf16.msra.mxu1 %v2054_v41  ;;  %v2319_v41 = vld [vmem:[%s3088_s3 + $0x8c] sm:$0xf] }
  0xbe   :  { %v2711_v14 = vpop.f32.mrf.mxu0  ;;  %1448 = vmatpush.bf16.msra.mxu1 %v2002_v54  ;;  %v2025_v54 = vld [vmem:[%s3088_s3 + $0x28] sm:$0xf] }
  0xbf   :  { %v927_v20 = vadd.f32 %v2711_v14, %v914_v7  ;;  %v2107_v14 = vld [vmem:[%s3088_s3 + $0x114] sm:$0xf0] }
  0xc0   :  { %v2110_v29 = vor.u32 %v2330_v25, %v2107_v14  ;;  %v2182_v25 = vor.u32 %v2352_v16, %v2181_v13  ;;  %v2332_v14 = vld [vmem:[%s3088_s3 + $0xf4] sm:$0xf] }
  0xc1   :  { %v2731_v23 = vpop.f32.mrf.mxu1  ;;  %v2126_v34 = vor.u32 %v2332_v14, %v2123_v27 }
  0xc2   :  { %v940_v36 = vadd.f32 %v2731_v23, %v927_v20  ;;  %1459 = vmatpush.bf16.msra.mxu2 %v2110_v29  ;;  %v2061_v23 = vld [vmem:[%s3088_s3 + $0x80] sm:$0xf]  ;;  %v2339_v29 = vld [vmem:[%s3088_s3 + $0x128] sm:$0xf0] }
  0xc3   :  { %v2062_v45 = vor.u32 %v2324_v43, %v2061_v23  ;;  %v2130_v39 = vor.u32 %v2339_v29, %v2129_v28  ;;  %v2077_v23 = vld [vmem:[%s3088_s3 + $0x90] sm:$0xf]  ;;  %v2326_v43 = vld [vmem:[%s3088_s3 + $0xc0] sm:$0xf0] }
  0xc4   :  { %v2078_v50 = vor.u32 %v2326_v43, %v2077_v23 }
  0xc5   :  { %v2742_v30 = vpop.f32.mrf.mxu2  ;;  %1473 = vmatpush.bf16.msra.mxu3 %v2062_v45  ;;  %v2079_v45 = vld [vmem:[%s3088_s3 + $0xc4] sm:$0xf0] }
  0xc6   :  { %v2753_v35 = vpop.f32.mrf.mxu3  ;;  %v928_v44 = vpop.f32.mrf.mxu0  ;;  %1460 = vmatpush.bf16.msra.mxu2 %v2058_v42  ;;  %v2071_v42 = vld [vmem:[%s3088_s3 + $0xbc] sm:$0xf0] }
  0xc7   :  { %v2318_v44 = vld [vmem:[%s3088_s3 + $0x84] sm:$0xf]  ;;  %v2074_v47 = vor.u32 %v2319_v41, %v2071_v42 }
  0xc8   :  { %v2066_v49 = vor.u32 %v2318_v44, %v2063_v46  ;;  %v2320_v44 = vld [vmem:[%s3088_s3 + $0x94] sm:$0xf] }
  0xc9   :  { %v941_v53 = vpop.f32.mrf.mxu1  ;;  %v2082_v51 = vor.u32 %v2320_v44, %v2079_v45 }
  0xca   :  { %v953_v53 = vadd.f32 %v2742_v30, %v940_v36  ;;  %1486 = vmatpush.bf16.msrb.mxu0 %v2066_v49  ;;  %v2014_v30 = vor.u32 %v2305_v56, %v2011_v57  ;;  %1461 = vmatpush.bf16.msra.mxu2 %v2006_v59  ;;  %v2069_v36 = vld [vmem:[%s3088_s3 + $0x88] sm:$0xf]  ;;  %v2312_v49 = vld [vmem:[%s3088_s3 + $0x50] sm:$0xf0]  ;;  %v2307_v56 = vld [vmem:[%s3088_s3 + $0x2c] sm:$0xf] }
  0xcb   :  { %v2070_v46 = vor.u32 %v2325_v37, %v2069_v36  ;;  %v2027_v57 = vld [vmem:[%s3088_s3 + $0x5c] sm:$0xf0] }
  0xcc   :  { %v966_v62 = vadd.f32 %v2753_v35, %v953_v53  ;;  %v2351_v35 = vld [vmem:[%s3088_s3 + $0x188] sm:$0xf0]  ;;  %v2019_v53 = vld [vmem:[%s3088_s3 + $0x54] sm:$0xf0] }
  0xcd   :  { %v954_v60 = vpop.f32.mrf.mxu2  ;;  %v2174_v20 = vor.u32 %v2351_v35, %v2173_v10  ;;  %v1091_v10 = vld [vmem:[%s3089_s4] sm:$0xff] }
  0xce   :  { %v967_v1 = vpop.f32.mrf.mxu3  ;;  %v2010_v60 = vor.u32 %v2311_v55, %v2009_v52  ;;  %1487 = vmatpush.bf16.msrb.mxu0 %v2014_v30  ;;  %v2306_v52 = vld [vmem:[%s3088_s3 + $0x24] sm:$0xf]  ;;  %v2313_v55 = vld [vmem:[%s3088_s3 + $0x58] sm:$0xf0]  ;;  %v2030_v30 = vor.u32 %v2307_v56, %v2027_v57  ;;  %v1098_v6 = vperm.slane %v1091_v10, 3  ;;  %v1096_v13 = vperm.slane %v1091_v10, 1 }
  0xcf   :  { %v2022_v59 = vor.u32 %v2306_v52, %v2019_v53  ;;  %v1102_v37 = vperm.slane %v1091_v10, 7 }
  0xd0   :  { %1474 = vmatpush.bf16.msra.mxu3 %v2010_v60  ;;  %v2026_v60 = vor.u32 %v2313_v55, %v2025_v54  ;;  %v1092_v54 = vld [vmem:[%s3089_s4 + $0x8] sm:$0x1f] }
  0xd1   :  { %v1103_v57 = vperm.slane %v1092_v54, 0 }
  0xde   :  { %v978_v58 = vpop.f32.mrf.mxu0 }
  0xdf   :  { %v979_v63 = vadd.f32 %v978_v58, %v966_v62  ;;  %v2018_v58 = vor.u32 %v2312_v49, %v2017_v48  ;;  %v2353_v62 = vld [vmem:[%s3088_s3 + $0x198] sm:$0xf0] }
  0xe1   :  { %v991_v61 = vpop.f32.mrf.mxu1 }
  0xe2   :  { %v992_v3 = vadd.f32 %v991_v61, %v979_v63  ;;  %v2189_v61 = vld [vmem:[%s3088_s3 + $0x168] sm:$0xf] }
  0xe3   :  { %v2190_v63 = vor.u32 %v2353_v62, %v2189_v61 }
  0xe5   :  { %v1004_v0 = vpop.f32.mrf.mxu2 }
  0xe6   :  { %v1017_v1 = vpop.f32.mrf.mxu3  ;;  %v980_v2 = vpop.f32.mrf.mxu0  ;;  %v1005_v5 = vadd.f32 %v1004_v0, %v992_v3  ;;  %v2137_v0 = vld [vmem:[%s3088_s3 + $0x100] sm:$0xf]  ;;  %v2085_v3 = vld [vmem:[%s3088_s3 + $0x98] sm:$0xf] }
  0xe8   :  { %v1018_v8 = vadd.f32 %v1017_v1, %v1005_v5  ;;  %v2340_v1 = vld [vmem:[%s3088_s3 + $0x130] sm:$0xf0] }
  0xe9   :  { %v993_v4 = vpop.f32.mrf.mxu1  ;;  %v2138_v2 = vor.u32 %v2340_v1, %v2137_v0 }
  0xea   :  { %v2327_v4 = vld [vmem:[%s3088_s3 + $0xc8] sm:$0xf0] }
  0xeb   :  { %v2086_v5 = vor.u32 %v2327_v4, %v2085_v3 }
  0xed   :  { %v1006_v7 = vpop.f32.mrf.mxu2 }
  0xee   :  { %v1019_v9 = vpop.f32.mrf.mxu3  ;;  %v1030_v11 = vpop.f32.mrf.mxu0  ;;  %v2033_v7 = vld [vmem:[%s3088_s3 + $0x30] sm:$0xf] }
  0xef   :  { %v1031_v15 = vadd.f32 %v1030_v11, %v1018_v8  ;;  %v2314_v8 = vld [vmem:[%s3088_s3 + $0x60] sm:$0xf0]  ;;  %v1095_v11 = vperm.slane %v1091_v10, 0 }
  0xf0   :  { %v2034_v9 = vor.u32 %v2314_v8, %v2033_v7 }
  0xf1   :  { %v2934_v19 = vpack.c.bf16 %v1031_v15, %v1031_v15  ;;  %v1097_v15 = vperm.slane %v1091_v10, 2 }
  0xf3   :  { %2191 = vmatmul.msk.bf16.vlgmr.msrb.gmra.mxu1 %vm1385_vm1, %v2934_v19  ;;  %2192 = vmatmul.msk.bf16.vlgmr.msrb.gmra.mxu2 %vm1385_vm1, %v2934_v19 }
  0xf4   :  { %2193 = vmatmul.msk.bf16.vlgmr.msrb.gmra.mxu3 %vm1385_vm1, %v2934_v19  ;;  %2194 = vmatmul.msk.bf16.vlgmr.msra.gmra.mxu0 %vm1385_vm1, %v2934_v19 }
  0xf5   :  { %1497 = vmatpush.bf16.msrb.mxu1 %v2174_v20  ;;  %1510 = vmatpush.bf16.msrb.mxu2 %v2178_v21 }
  0xf6   :  { %v1032_v38 = vpop.f32.mrf.mxu0  ;;  %1523 = vmatpush.bf16.msrb.mxu3 %v2182_v25  ;;  %1536 = vmatpush.bf16.msra.mxu0 %v2186_v26 }
  0xf7   :  { %v1100_v38 = vperm.slane %v1091_v10, 5 }
  0xf9   :  { %1498 = vmatpush.bf16.msrb.mxu1 %v2122_v33  ;;  %1511 = vmatpush.bf16.msrb.mxu2 %v2126_v34  ;;  %v1099_v34 = vperm.slane %v1091_v10, 4 }
  0xfa   :  { %1524 = vmatpush.bf16.msrb.mxu3 %v2130_v39  ;;  %1537 = vmatpush.bf16.msra.mxu0 %v2134_v40  ;;  %v1101_v39 = vperm.slane %v1091_v10, 6 }
  0xfd   :  { %1499 = vmatpush.bf16.msrb.mxu1 %v2070_v46  ;;  %1512 = vmatpush.bf16.msrb.mxu2 %v2074_v47 }
  0xfe   :  { %1525 = vmatpush.bf16.msrb.mxu3 %v2078_v50  ;;  %1538 = vmatpush.bf16.msra.mxu0 %v2082_v51 }
 0x101   :  { %1500 = vmatpush.bf16.msrb.mxu1 %v2018_v58  ;;  %1513 = vmatpush.bf16.msrb.mxu2 %v2022_v59  ;;  %v1106_v59 = vperm.slane %v1092_v54, 3 }
 0x102   :  { %1526 = vmatpush.bf16.msrb.mxu3 %v2026_v60  ;;  %1539 = vmatpush.bf16.msra.mxu0 %v2030_v30  ;;  %v1104_v60 = vperm.slane %v1092_v54, 1  ;;  %v1105_v30 = vperm.slane %v1092_v54, 2 }
 0x103   :  { %2195 = vmatmul.msk.bf16.vlgmr.msra.gmra.mxu1 %vm1385_vm1, %v2934_v19  ;;  %2196 = vmatmul.msk.bf16.vlgmr.msra.gmra.mxu2 %vm1385_vm1, %v2934_v19 }
 0x104   :  { %2197 = vmatmul.msk.bf16.vlgmr.msra.gmra.mxu3 %vm1385_vm1, %v2934_v19  ;;  %2198 = vmatmul.msk.bf16.vlgmr.msrb.gmra.mxu0 %vm1385_vm1, %v2934_v19 }
 0x105   :  { %1549 = vmatpush.bf16.msra.mxu1 %v2190_v63 }
 0x109   :  { %1550 = vmatpush.bf16.msra.mxu1 %v2138_v2 }
 0x10d   :  { %1551 = vmatpush.bf16.msra.mxu1 %v2086_v5 }
 0x111   :  { %1552 = vmatpush.bf16.msra.mxu1 %v2034_v9 }
 0x113   :  { %2199 = vmatmul.msk.bf16.vlgmr.msrb.gmra.mxu1 %vm1385_vm1, %v2934_v19  ;;  %2200 = vmatmul.msk.bf16.vlgmr.msrb.gmra.mxu2 %vm1385_vm1, %v2934_v19 }
 0x114   :  { %2201 = vmatmul.msk.bf16.vlgmr.msrb.gmra.mxu3 %vm1385_vm1, %v2934_v19  ;;  %2202 = vmatmul.msk.bf16.vlgmr.msra.gmra.mxu0 %vm1385_vm1, %v2934_v19 }
 0x123   :  { %2203 = vmatmul.msk.bf16.vlgmr.msra.gmra.mxu1 %vm1385_vm1, %v2934_v19 }
 0x170   :  { %v1398_v35 = vpop.f32.mrf.mxu1 }
 0x171   :  { %v1437_v12 = vpop.f32.mrf.mxu0  ;;  %v1399_v16 = vadd.f32 %v1398_v35, %v1095_v11  ;;  %v1107_v11 = vperm.slane %v1092_v54, 4 }
 0x172   :  { %v1438_v17 = vadd.f32 %v1437_v12, %v1098_v6 }
 0x173   :  { %v1558_v25 = vmax.f32 %v1399_v16, 0.0 }
 0x174   :  { %v1561_v14 = vmax.f32 %v1438_v17, 0.0 }
 0x176   :  { %v1411_v18 = vpop.f32.mrf.mxu2 }
 0x177   :  { %v1412_v20 = vadd.f32 %v1411_v18, %v1096_v13  ;;  %v1424_v21 = vpop.f32.mrf.mxu3 }
 0x178   :  { %v1425_v22 = vadd.f32 %v1424_v21, %v1097_v15  ;;  %v1400_v24 = vpop.f32.mrf.mxu1 }
 0x179   :  { %v1559_v26 = vmax.f32 %v1412_v20, 0.0  ;;  %v1439_v19 = vpop.f32.mrf.mxu0 }
 0x17a   :  { %v1560_v27 = vmax.f32 %v1425_v22, 0.0 }
 0x17b   :  { %v1571_v28 = vpack.c.bf16 %v1559_v26, %v1558_v25 }
 0x17c   :  { %v1572_v29 = vpack.c.bf16 %v1561_v14, %v1560_v27 }
 0x17d   :  { %1578 = vst [vmem:[%s3090_s5] sm:$0xff] %v1571_v28 }
 0x17e   :  { %1579 = vst [vmem:[%s3090_s5 + $0x8] sm:$0xff] %v1572_v29  ;;  %v1413_v31 = vpop.f32.mrf.mxu2 }
 0x17f   :  { %v1426_v32 = vpop.f32.mrf.mxu3 }
 0x180   :  { %v1450_v33 = vpop.f32.mrf.mxu1 }
 0x181   :  { %v1489_v36 = vpop.f32.mrf.mxu0  ;;  %v1451_v40 = vadd.f32 %v1450_v33, %v1099_v34 }
 0x182   :  { %v1490_v41 = vadd.f32 %v1489_v36, %v1102_v37 }
 0x183   :  { %v1562_v46 = vmax.f32 %v1451_v40, 0.0 }
 0x184   :  { %v1565_v49 = vmax.f32 %v1490_v41, 0.0 }
 0x186   :  { %v1463_v42 = vpop.f32.mrf.mxu2 }
 0x187   :  { %v1464_v23 = vadd.f32 %v1463_v42, %v1100_v38  ;;  %v1476_v43 = vpop.f32.mrf.mxu3 }
 0x188   :  { %v1477_v44 = vadd.f32 %v1476_v43, %v1101_v39  ;;  %v1452_v45 = vpop.f32.mrf.mxu1 }
 0x189   :  { %v1563_v47 = vmax.f32 %v1464_v23, 0.0  ;;  %v1491_v48 = vpop.f32.mrf.mxu0 }
 0x18a   :  { %v1564_v50 = vmax.f32 %v1477_v44, 0.0 }
 0x18b   :  { %v1573_v51 = vpack.c.bf16 %v1563_v47, %v1562_v46 }
 0x18c   :  { %v1574_v52 = vpack.c.bf16 %v1565_v49, %v1564_v50 }
 0x18d   :  { %1580 = vst [vmem:[%s3090_s5 + $0x10] sm:$0xff] %v1573_v51 }
 0x18e   :  { %1581 = vst [vmem:[%s3090_s5 + $0x18] sm:$0xff] %v1574_v52  ;;  %v1465_v53 = vpop.f32.mrf.mxu2 }
 0x18f   :  { %v1478_v55 = vpop.f32.mrf.mxu3 }
 0x190   :  { %v1502_v56 = vpop.f32.mrf.mxu1 }
 0x191   :  { %v1541_v58 = vpop.f32.mrf.mxu0  ;;  %v1503_v61 = vadd.f32 %v1502_v56, %v1103_v57 }
 0x192   :  { %v1542_v62 = vadd.f32 %v1541_v58, %v1106_v59 }
 0x193   :  { %v1566_v4 = vmax.f32 %v1503_v61, 0.0 }
 0x194   :  { %v1569_v8 = vmax.f32 %v1542_v62, 0.0 }
 0x196   :  { %v1515_v63 = vpop.f32.mrf.mxu2 }
 0x197   :  { %v1516_v0 = vadd.f32 %v1515_v63, %v1104_v60  ;;  %v1528_v1 = vpop.f32.mrf.mxu3 }
 0x198   :  { %v1529_v2 = vadd.f32 %v1528_v1, %v1105_v30  ;;  %v1504_v3 = vpop.f32.mrf.mxu1 }
 0x199   :  { %v1567_v5 = vmax.f32 %v1516_v0, 0.0  ;;  %v1543_v7 = vpop.f32.mrf.mxu0 }
 0x19a   :  { %v1568_v9 = vmax.f32 %v1529_v2, 0.0 }
 0x19b   :  { %v1575_v10 = vpack.c.bf16 %v1567_v5, %v1566_v4 }
 0x19c   :  { %v1576_v35 = vpack.c.bf16 %v1569_v8, %v1568_v9 }
 0x19d   :  { %1582 = vst [vmem:[%s3090_s5 + $0x20] sm:$0xff] %v1575_v10 }
 0x19e   :  { %1583 = vst [vmem:[%s3090_s5 + $0x28] sm:$0xff] %v1576_v35  ;;  %v1517_v12 = vpop.f32.mrf.mxu2 }
 0x19f   :  { %v1530_v6 = vpop.f32.mrf.mxu3 }
 0x1a0   :  { %v1554_v13 = vpop.f32.mrf.mxu1 }
 0x1a1   :  { %v1555_v15 = vadd.f32 %v1554_v13, %v1107_v11 }
 0x1a3   :  { %v1570_v16 = vmax.f32 %v1555_v15, 0.0 }
 0x1a5   :  { %v1577_v17 = vpack.c.bf16 %v1570_v16, %v1570_v16 }
 0x1a7   :  { %1585 = vst.msk [vmem:[%s3090_s5 + $0x30] sm:$0xf] %vm1584_vm2, %v1577_v17 }
 0x1a8   :  { %v1556_v18 = vpop.f32.mrf.mxu1 }

// kernel: autoencoder_forward.8
= control target key start
LH: loop header
LB: loop body
LE: loop exit
PB: predicated region body
PF: predicated region fallthrough
CT: control target
= control target key end

     0   :  { %s440_s1 = inlined_call_operand.vmem [shape: bf16[128,128], index: 1, kind: input, shape index: {}]   ;;  %s441_s2 = inlined_call_operand.vmem [shape: f32[1,128], index: 2, kind: input, shape index: {}]   ;;  %s442_s0 = inlined_call_operand.vmem [shape: bf16[104,128], index: 0, kind: input, shape index: {}]   ;;  %s443_s3 = inlined_call_operand.vmem [shape: bf16[104,128], index: 3, kind: output, shape index: {}]  }
   0x1   :  { %v290_v0 = vld [vmem:[%s440_s1 + $0x38] sm:$0xff]  ;;  %v289_v1 = vld [vmem:[%s440_s1 + $0x30] sm:$0xff]  ;;  %v288_v2 = vld [vmem:[%s440_s1 + $0x28] sm:$0xff] }
   0x2   :  { %326 = vmatpush.bf16.msra.mxu1 %v290_v0  ;;  %327 = vmatpush.bf16.msra.mxu2 %v290_v0  ;;  %v287_v3 = vld [vmem:[%s440_s1 + $0x20] sm:$0xff]  ;;  %v286_v4 = vld [vmem:[%s440_s1 + $0x18] sm:$0xff]  ;;  %v285_v5 = vld [vmem:[%s440_s1 + $0x10] sm:$0xff] }
   0x3   :  { %328 = vmatpush.bf16.msra.mxu3 %v290_v0  ;;  %135 = vmatpush.bf16.msra.mxu0 %v290_v0  ;;  %v284_v6 = vld [vmem:[%s440_s1 + $0x8] sm:$0xff]  ;;  %v283_v7 = vld [vmem:[%s440_s1] sm:$0xff]  ;;  %v280_v9 = vld [vmem:[%s442_s0 + $0x18] sm:$0xff] }
   0x4   :  { %v278_v8 = vld [vmem:[%s442_s0 + $0x8] sm:$0xff]  ;;  %v277_v11 = vld [vmem:[%s442_s0] sm:$0xff]  ;;  %v26_v12 = vld [vmem:[%s442_s0 + $0x30] sm:$0xf] }
   0x5   :  { %v282_v10 = vld [vmem:[%s442_s0 + $0x28] sm:$0xff]  ;;  %v72_v13 = vunpack.c.l.b16 %v26_v12  ;;  %v279_v14 = vld [vmem:[%s442_s0 + $0x10] sm:$0xff]  ;;  %v281_v15 = vld [vmem:[%s442_s0 + $0x20] sm:$0xff] }
   0x6   :  { %329 = vmatpush.bf16.msra.mxu1 %v289_v1  ;;  %330 = vmatpush.bf16.msra.mxu2 %v289_v1  ;;  %v350_v19 = vld [vmem:[%s441_s2] ss:$0 sm:$0xff] }
   0x7   :  { %331 = vmatpush.bf16.msra.mxu3 %v289_v1  ;;  %136 = vmatpush.bf16.msra.mxu0 %v289_v1  ;;  %v79_v16 = vpack.c.b16 %v72_v13, %v72_v13 }
   0xa   :  { %332 = vmatpush.bf16.msra.mxu1 %v288_v2  ;;  %333 = vmatpush.bf16.msra.mxu2 %v288_v2 }
   0xb   :  { %334 = vmatpush.bf16.msra.mxu3 %v288_v2  ;;  %137 = vmatpush.bf16.msra.mxu0 %v288_v2 }
   0xe   :  { %335 = vmatpush.bf16.msra.mxu1 %v287_v3  ;;  %336 = vmatpush.bf16.msra.mxu2 %v287_v3 }
   0xf   :  { %337 = vmatpush.bf16.msra.mxu3 %v287_v3  ;;  %138 = vmatpush.bf16.msra.mxu0 %v287_v3 }
  0x12   :  { %338 = vmatpush.bf16.msra.mxu1 %v286_v4  ;;  %339 = vmatpush.bf16.msra.mxu2 %v286_v4 }
  0x13   :  { %340 = vmatpush.bf16.msra.mxu3 %v286_v4  ;;  %139 = vmatpush.bf16.msra.mxu0 %v286_v4 }
  0x16   :  { %341 = vmatpush.bf16.msra.mxu1 %v285_v5  ;;  %342 = vmatpush.bf16.msra.mxu2 %v285_v5 }
  0x17   :  { %343 = vmatpush.bf16.msra.mxu3 %v285_v5  ;;  %140 = vmatpush.bf16.msra.mxu0 %v285_v5 }
  0x1a   :  { %344 = vmatpush.bf16.msra.mxu1 %v284_v6  ;;  %345 = vmatpush.bf16.msra.mxu2 %v284_v6 }
  0x1b   :  { %346 = vmatpush.bf16.msra.mxu3 %v284_v6  ;;  %141 = vmatpush.bf16.msra.mxu0 %v284_v6 }
  0x1e   :  { %347 = vmatpush.bf16.msra.mxu1 %v283_v7  ;;  %348 = vmatpush.bf16.msra.mxu2 %v283_v7 }
  0x1f   :  { %349 = vmatpush.bf16.msra.mxu3 %v283_v7  ;;  %142 = vmatpush.bf16.msra.mxu0 %v283_v7 }
  0x21   :  { %148 = vmatmul.bf16.vlgmr.msra.gmra.mxu1 %v278_v8  ;;  %158 = vmatmul.bf16.vlgmr.msra.gmra.mxu2 %v280_v9 }
  0x22   :  { %168 = vmatmul.bf16.vlgmr.msra.gmra.mxu3 %v282_v10  ;;  %143 = vmatmul.bf16.vlgmr.msra.gmra.mxu0 %v277_v11 }
  0x31   :  { %153 = vmatmul.bf16.gmra.mxu1 %v279_v14  ;;  %163 = vmatmul.bf16.gmra.mxu2 %v281_v15 }
  0x32   :  { %173 = vmatmul.bf16.gmra.mxu3 %v79_v16 }
  0x9e   :  { %v149_v17 = vpop.f32.mrf.mxu1 }
  0x9f   :  { %v144_v18 = vpop.f32.mrf.mxu0  ;;  %v150_v22 = vadd.f32 %v350_v19, %v149_v17 }
  0xa0   :  { %v145_v21 = vadd.f32 %v350_v19, %v144_v18 }
  0xa1   :  { %v180_v29 = vmax.f32 %v150_v22, 0.0 }
  0xa2   :  { %v178_v27 = vmax.f32 %v145_v21, 0.0 }
  0xa4   :  { %v159_v20 = vpop.f32.mrf.mxu2 }
  0xa5   :  { %v169_v23 = vpop.f32.mrf.mxu3  ;;  %v160_v33 = vadd.f32 %v350_v19, %v159_v20 }
  0xa6   :  { %v151_v24 = vpop.f32.mrf.mxu1  ;;  %v170_v31 = vadd.f32 %v350_v19, %v169_v23 }
  0xa7   :  { %v152_v25 = vadd.f32 %v350_v19, %v151_v24  ;;  %v146_v26 = vpop.f32.mrf.mxu0  ;;  %v184_v42 = vmax.f32 %v160_v33, 0.0 }
  0xa8   :  { %v147_v28 = vadd.f32 %v350_v19, %v146_v26  ;;  %v188_v39 = vmax.f32 %v170_v31, 0.0 }
  0xa9   :  { %v181_v30 = vmax.f32 %v152_v25, 0.0 }
  0xaa   :  { %v179_v32 = vmax.f32 %v147_v28, 0.0 }
  0xab   :  { %v299_v34 = vpack.c.bf16 %v181_v30, %v180_v29 }
  0xac   :  { %v161_v35 = vpop.f32.mrf.mxu2  ;;  %v294_v36 = vpack.c.bf16 %v179_v32, %v178_v27 }
  0xad   :  { %321 = vst [vmem:[%s443_s3 + $0x8] sm:$0xff] %v299_v34   ;;  %v162_v37 = vadd.f32 %v350_v19, %v161_v35  ;;  %v171_v38 = vpop.f32.mrf.mxu3 }
  0xae   :  { %v172_v40 = vadd.f32 %v350_v19, %v171_v38  ;;  %v154_v41 = vpop.f32.mrf.mxu1  ;;  %295 = vst [vmem:[%s443_s3] sm:$0xff] %v294_v36  }
  0xaf   :  { %v185_v43 = vmax.f32 %v162_v37, 0.0  ;;  %v155_v48 = vadd.f32 %v350_v19, %v154_v41 }
  0xb0   :  { %v189_v44 = vmax.f32 %v172_v40, 0.0 }
  0xb1   :  { %v309_v45 = vpack.c.bf16 %v185_v43, %v184_v42  ;;  %v182_v54 = vmax.f32 %v155_v48, 0.0 }
  0xb2   :  { %v319_v46 = vpack.c.bf16 %v189_v44, %v188_v39 }
  0xb3   :  { %323 = vst [vmem:[%s443_s3 + $0x18] sm:$0xff] %v309_v45  }
  0xb4   :  { %325 = vst [vmem:[%s443_s3 + $0x28] sm:$0xff] %v319_v46   ;;  %v164_v47 = vpop.f32.mrf.mxu2 }
  0xb5   :  { %v174_v49 = vpop.f32.mrf.mxu3  ;;  %v165_v57 = vadd.f32 %v350_v19, %v164_v47 }
  0xb6   :  { %v175_v50 = vadd.f32 %v350_v19, %v174_v49  ;;  %v156_v51 = vpop.f32.mrf.mxu1 }
  0xb7   :  { %v157_v52 = vadd.f32 %v350_v19, %v156_v51  ;;  %v186_v62 = vmax.f32 %v165_v57, 0.0 }
  0xb8   :  { %v190_v53 = vmax.f32 %v175_v50, 0.0 }
  0xb9   :  { %v183_v55 = vmax.f32 %v157_v52, 0.0 }
  0xba   :  { %v203_v56 = vpack.c.bf16 %v190_v53, %v190_v53 }
  0xbb   :  { %v304_v58 = vpack.c.bf16 %v183_v55, %v182_v54 }
  0xbc   :  { %216 = vst [vmem:[%s443_s3 + $0x30] sm:$0xf] %v203_v56  ;;  %v166_v59 = vpop.f32.mrf.mxu2 }
  0xbd   :  { %322 = vst [vmem:[%s443_s3 + $0x10] sm:$0xff] %v304_v58   ;;  %v167_v60 = vadd.f32 %v350_v19, %v166_v59  ;;  %v176_v61 = vpop.f32.mrf.mxu3 }
  0xbf   :  { %v187_v63 = vmax.f32 %v167_v60, 0.0 }
  0xc1   :  { %v314_v0 = vpack.c.bf16 %v187_v63, %v186_v62 }
  0xc3   :  { %324 = vst [vmem:[%s443_s3 + $0x20] sm:$0xff] %v314_v0  }

// kernel: autoencoder_forward.9
= control target key start
LH: loop header
LB: loop body
LE: loop exit
PB: predicated region body
PF: predicated region fallthrough
CT: control target
= control target key end

     0   :  { %vm223_vm0 = vcmask 523264   ;;  %vm1363_vm5 = vcmask 97280   ;;  %s3154_s1 = inlined_call_operand.vmem [shape: bf16[64,12], index: 1, kind: input, shape index: {}]   ;;  %s3155_s2 = inlined_call_operand.vmem [shape: f32[1,12], index: 2, kind: input, shape index: {}]   ;;  %s3156_s0 = inlined_call_operand.vmem [shape: bf16[392,64], index: 0, kind: input, shape index: {}]   ;;  %s3157_s3 = inlined_call_operand.vmem [shape: f32[392,12], index: 3, kind: output, shape index: {}]  }
   0x1   :  { %v1630_v0 = vld [vmem:[%s3154_s1 + $0x18] sm:$0xff]  ;;  %v1629_v1 = vld [vmem:[%s3154_s1 + $0x10] sm:$0xff]  ;;  %v1628_v2 = vld [vmem:[%s3154_s1 + $0x8] sm:$0xff] }
   0x2   :  { %1632 = vmatpush.bf16.msra.mxu2 %v1630_v0  ;;  %303 = vmatpush.bf16.msra.mxu0 %v1630_v0  ;;  %v1627_v3 = vld [vmem:[%s3154_s1] sm:$0xff]  ;;  %v1609_v6 = vld [vmem:[%s3156_s0 + $0x30] sm:$0xff]  ;;  %v1622_v7 = vld [vmem:[%s3156_s0 + $0x98] sm:$0xff] }
   0x3   :  { %1631 = vmatpush.bf16.msra.mxu1 %v1630_v0  ;;  %1633 = vmatpush.bf16.msra.mxu3 %v1630_v0  ;;  %v1615_v4 = vld [vmem:[%s3156_s0 + $0x60] sm:$0xff]  ;;  %v1616_v8 = vld [vmem:[%s3156_s0 + $0x68] sm:$0xff]  ;;  %v1610_v10 = vld [vmem:[%s3156_s0 + $0x38] sm:$0xff] }
   0x4   :  { %v1603_v5 = vld [vmem:[%s3156_s0] sm:$0xff]  ;;  %v1604_v9 = vld [vmem:[%s3156_s0 + $0x8] sm:$0xff]  ;;  %v1617_v12 = vld [vmem:[%s3156_s0 + $0x70] sm:$0xff] }
   0x5   :  { %v1623_v11 = vld [vmem:[%s3156_s0 + $0xa0] sm:$0xff]  ;;  %v1605_v13 = vld [vmem:[%s3156_s0 + $0x10] sm:$0xff]  ;;  %v1624_v15 = vld [vmem:[%s3156_s0 + $0xa8] sm:$0xff] }
   0x6   :  { %1635 = vmatpush.bf16.msra.mxu2 %v1629_v1  ;;  %304 = vmatpush.bf16.msra.mxu0 %v1629_v1  ;;  %v1611_v14 = vld [vmem:[%s3156_s0 + $0x40] sm:$0xff]  ;;  %v1618_v16 = vld [vmem:[%s3156_s0 + $0x78] sm:$0xff]  ;;  %v1612_v18 = vld [vmem:[%s3156_s0 + $0x48] sm:$0xff] }
   0x7   :  { %1634 = vmatpush.bf16.msra.mxu1 %v1629_v1  ;;  %1636 = vmatpush.bf16.msra.mxu3 %v1629_v1  ;;  %v1606_v17 = vld [vmem:[%s3156_s0 + $0x18] sm:$0xff]  ;;  %v1625_v19 = vld [vmem:[%s3156_s0 + $0xb0] sm:$0xff]  ;;  %v1619_v20 = vld [vmem:[%s3156_s0 + $0x80] sm:$0xff] }
   0x8   :  { %v1607_v21 = vld [vmem:[%s3156_s0 + $0x20] sm:$0xff]  ;;  %v1613_v22 = vld [vmem:[%s3156_s0 + $0x50] sm:$0xff]  ;;  %v1626_v23 = vld [vmem:[%s3156_s0 + $0xb8] sm:$0xff] }
   0x9   :  { %v63_v24 = vld [vmem:[%s3156_s0 + $0xc0] sm:$0xf]  ;;  %v1620_v26 = vld [vmem:[%s3156_s0 + $0x88] sm:$0xff]  ;;  %v1614_v28 = vld [vmem:[%s3156_s0 + $0x58] sm:$0xff] }
   0xa   :  { %1638 = vmatpush.bf16.msra.mxu2 %v1628_v2  ;;  %305 = vmatpush.bf16.msra.mxu0 %v1628_v2  ;;  %v173_v25 = vunpack.c.l.b16 %v63_v24  ;;  %v1608_v27 = vld [vmem:[%s3156_s0 + $0x28] sm:$0xff]  ;;  %v1621_v30 = vld [vmem:[%s3156_s0 + $0x90] sm:$0xff]  ;;  %v1976_v31 = vld [vmem:[%s3155_s2] ss:$0 sm:$0xff] }
   0xb   :  { %1637 = vmatpush.bf16.msra.mxu1 %v1628_v2  ;;  %1639 = vmatpush.bf16.msra.mxu3 %v1628_v2 }
   0xc   :  { %v198_v29 = vpack.c.b16 %v173_v25, %v173_v25 }
   0xe   :  { %1641 = vmatpush.bf16.msra.mxu2 %v1627_v3  ;;  %306 = vmatpush.bf16.msra.mxu0 %v1627_v3 }
   0xf   :  { %1640 = vmatpush.bf16.msra.mxu1 %v1627_v3  ;;  %1642 = vmatpush.bf16.msra.mxu3 %v1627_v3 }
  0x11   :  { %1541 = vmatmul.msk.bf16.vlgmr.msra.gmra.mxu2 %vm223_vm0, %v1615_v4  ;;  %1529 = vmatmul.msk.bf16.vlgmr.msra.gmra.mxu0 %vm223_vm0, %v1603_v5 }
  0x12   :  { %1535 = vmatmul.msk.bf16.vlgmr.msra.gmra.mxu1 %vm223_vm0, %v1609_v6  ;;  %1548 = vmatmul.msk.bf16.vlgmr.msra.gmra.mxu3 %vm223_vm0, %v1622_v7 }
  0x21   :  { %1542 = vmatmul.msk.bf16.gmra.mxu2 %vm223_vm0, %v1616_v8  ;;  %1530 = vmatmul.msk.bf16.gmra.mxu0 %vm223_vm0, %v1604_v9 }
  0x22   :  { %1536 = vmatmul.msk.bf16.gmra.mxu1 %vm223_vm0, %v1610_v10  ;;  %1549 = vmatmul.msk.bf16.gmra.mxu3 %vm223_vm0, %v1623_v11 }
  0x31   :  { %1543 = vmatmul.msk.bf16.gmra.mxu2 %vm223_vm0, %v1617_v12  ;;  %1531 = vmatmul.msk.bf16.gmra.mxu0 %vm223_vm0, %v1605_v13 }
  0x32   :  { %1537 = vmatmul.msk.bf16.gmra.mxu1 %vm223_vm0, %v1611_v14  ;;  %1550 = vmatmul.msk.bf16.gmra.mxu3 %vm223_vm0, %v1624_v15 }
  0x41   :  { %1544 = vmatmul.msk.bf16.gmra.mxu2 %vm223_vm0, %v1618_v16  ;;  %1532 = vmatmul.msk.bf16.gmra.mxu0 %vm223_vm0, %v1606_v17 }
  0x42   :  { %1538 = vmatmul.msk.bf16.gmra.mxu1 %vm223_vm0, %v1612_v18  ;;  %1551 = vmatmul.msk.bf16.gmra.mxu3 %vm223_vm0, %v1625_v19 }
  0x51   :  { %1545 = vmatmul.msk.bf16.gmra.mxu2 %vm223_vm0, %v1619_v20  ;;  %1533 = vmatmul.msk.bf16.gmra.mxu0 %vm223_vm0, %v1607_v21 }
  0x52   :  { %1539 = vmatmul.msk.bf16.gmra.mxu1 %vm223_vm0, %v1613_v22  ;;  %1552 = vmatmul.msk.bf16.gmra.mxu3 %vm223_vm0, %v1626_v23 }
  0x61   :  { %1546 = vmatmul.msk.bf16.gmra.mxu2 %vm223_vm0, %v1620_v26  ;;  %1534 = vmatmul.msk.bf16.gmra.mxu0 %vm223_vm0, %v1608_v27 }
  0x62   :  { %1540 = vmatmul.msk.bf16.gmra.mxu1 %vm223_vm0, %v1614_v28  ;;  %1553 = vmatmul.msk.bf16.gmra.mxu3 %vm223_vm0, %v198_v29 }
  0x71   :  { %1547 = vmatmul.msk.bf16.gmra.mxu2 %vm223_vm0, %v1621_v30 }
  0x8e   :  { %v308_v32 = vpop.f32.mrf.mxu0 }
  0x8f   :  { %v309_v33 = vadd.f32 %v1976_v31, %v308_v32  ;;  %v338_v34 = vpop.f32.mrf.mxu1 }
  0x90   :  { %v339_v35 = vadd.f32 %v1976_v31, %v338_v34 }
  0x91   :  { %v1554_v36 = vmul.f32 -1.442695, %v309_v33 }
  0x92   :  { %v1566_v37 = vmul.f32 -1.442695, %v339_v35 }
  0x93   :  { %1644 = vpow2.f32 %v1554_v36 }
  0x94   :  { %1646 = vpow2.f32 %v1566_v37  ;;  %v368_v38 = vpop.f32.mrf.mxu2 }
  0x95   :  { %v369_v39 = vadd.f32 %v1976_v31, %v368_v38  ;;  %v403_v40 = vpop.f32.mrf.mxu3 }
  0x96   :  { %v310_v41 = vpop.f32.mrf.mxu0  ;;  %v404_v42 = vadd.f32 %v1976_v31, %v403_v40 }
  0x97   :  { %v1578_v43 = vmul.f32 -1.442695, %v369_v39  ;;  %v311_v44 = vadd.f32 %v1976_v31, %v310_v41  ;;  %v340_v45 = vpop.f32.mrf.mxu1 }
  0x98   :  { %v341_v46 = vadd.f32 %v1976_v31, %v340_v45  ;;  %v1592_v47 = vmul.f32 -1.442695, %v404_v42 }
  0x99   :  { %v1645_v48 = vpop.eup %1644  ;;  %1648 = vpow2.f32 %v1578_v43  ;;  %v1555_v49 = vmul.f32 -1.442695, %v311_v44 }
  0x9a   :  { %v1647_v50 = vpop.eup %1646  ;;  %v579_v51 = vadd.f32 1.0, %v1645_v48  ;;  %v1567_v52 = vmul.f32 -1.442695, %v341_v46  ;;  %1650 = vpow2.f32 %v1592_v47 }
  0x9b   :  { %v1984_v53 = vadd.f32 1.0, %v1647_v50  ;;  %1652 = vpow2.f32 %v1555_v49 }
  0x9c   :  { %1654 = vrcp.f32 %v579_v51  ;;  %v370_v54 = vpop.f32.mrf.mxu2  ;;  %v637_v55 = vand.u32 2147483647, %v579_v51  ;;  %v639_v56 = vand.u32 2147483648, %v579_v51  ;;  %vm633_vm1 = vweird.f32 %v579_v51 }
  0x9d   :  { %1656 = vrcp.f32 %v1984_v53  ;;  %v405_v57 = vpop.f32.mrf.mxu3  ;;  %v817_v58 = vand.u32 2147483647, %v1984_v53  ;;  %v819_v59 = vand.u32 2147483648, %v1984_v53  ;;  %v371_v60 = vadd.f32 %v1976_v31, %v370_v54 }
  0x9e   :  { %1658 = vpow2.f32 %v1567_v52  ;;  %v313_v62 = vpop.f32.mrf.mxu0  ;;  %v406_v2 = vadd.f32 %v1976_v31, %v405_v57  ;;  %vm1994_vm2 = vcmp.eq.f32.partialorder %v637_v55, 8.507059e+37  ;;  %v640_v5 = vor.u32 1.1754944e-38, %v639_v56 }
  0x9f   :  { %v1649_v61 = vpop.eup %1648  ;;  %v314_v1 = vadd.f32 %v1976_v31, %v313_v62  ;;  %vm813_vm3 = vweird.f32 %v1984_v53  ;;  %v343_v7 = vpop.f32.mrf.mxu1  ;;  %vm2001_vm4 = vcmp.eq.f32.partialorder %v817_v58, 8.507059e+37  ;;  %v820_v10 = vor.u32 1.1754944e-38, %v819_v59 }
  0xa0   :  { %v1651_v63 = vpop.eup %1650  ;;  %v1990_v0 = vadd.f32 1.0, %v1649_v61  ;;  %v2006_v11 = vmul.f32 -1.442695, %v371_v60  ;;  %v2009_v12 = vadd.f32 %v1976_v31, %v343_v7  ;;  %v2019_v21 = vmul.f32 -1.442695, %v406_v2 }
  0xa1   :  { %v1653_v3 = vpop.eup %1652  ;;  %v1999_v6 = vadd.f32 1.0, %v1651_v63  ;;  %v2017_v20 = vmul.f32 -1.442695, %v314_v1 }
  0xa2   :  { %v1655_v8 = vpop.eup %1654  ;;  %1660 = vrcp.f32 %v1990_v0  ;;  %v999_v15 = vand.u32 2147483648, %v1990_v0  ;;  %v2012_v16 = vadd.f32 1.0, %v1653_v3  ;;  %v997_v19 = vand.u32 2147483647, %v1990_v0 }
  0xa3   :  { %v1657_v13 = vpop.eup %1656  ;;  %v629_v14 = vmul.f32 %v1655_v8, %v579_v51  ;;  %1662 = vrcp.f32 %v1999_v6  ;;  %vm634_vm6 = vweird.f32 %v1655_v8  ;;  %vm993_vm8 = vweird.f32 %v1990_v0 }
  0xa4   :  { %v1659_v17 = vpop.eup %1658  ;;  %v809_v18 = vmul.f32 %v1657_v13, %v1984_v53  ;;  %vm814_vm7 = vweird.f32 %v1657_v13  ;;  %1664 = vrcp.f32 %v2012_v16  ;;  %v652_v24 = vand.u32 2147483647, %v2012_v16  ;;  %vm2030_vm11 = vmor %vm633_vm1, %vm634_vm6  ;;  %v373_v49 = vpop.f32.mrf.mxu2 }
  0xa5   :  { %v630_v22 = vsub.f32 1.0, %v629_v14  ;;  %v654_v25 = vand.u32 2147483648, %v2012_v16  ;;  %v2025_v26 = vadd.f32 1.0, %v1659_v17  ;;  %v1000_v28 = vor.u32 1.1754944e-38, %v999_v15  ;;  %vm2042_vm12 = vmor %vm813_vm3, %vm814_vm7  ;;  %v408_v62 = vpop.f32.mrf.mxu3 }
  0xa6   :  { %v810_v23 = vsub.f32 1.0, %v809_v18  ;;  %vm648_vm9 = vweird.f32 %v2012_v16  ;;  %vm1203_vm10 = vweird.f32 %v1999_v6  ;;  %v1207_v33 = vand.u32 2147483647, %v1999_v6  ;;  %v315_v57 = vpop.f32.mrf.mxu0 }
  0xa7   :  { %v631_v27 = vmul.f32 %v1655_v8, %v630_v22  ;;  %1666 = vrcp.f32 %v2025_v26  ;;  %v1209_v34 = vand.u32 2147483648, %v1999_v6  ;;  %vm2047_vm13 = vcmp.eq.f32.partialorder %v997_v19, 8.507059e+37 }
  0xa8   :  { %v1661_v29 = vpop.eup %1660  ;;  %v811_v32 = vmul.f32 %v1657_v13, %v810_v23  ;;  %v2051_v40 = vor.u32 1.1754944e-38, %v654_v25  ;;  %vm828_vm14 = vweird.f32 %v2025_v26  ;;  %vm2054_vm0 = vcmp.eq.f32.partialorder %v652_v24, 8.507059e+37 }
  0xa9   :  { %v2037_v35 = vpop.eup %1662  ;;  %v632_v36 = vadd.f32 %v1655_v8, %v631_v27  ;;  %v989_v38 = vmul.f32 %v1661_v29, %v1990_v0  ;;  %vm994_vm15 = vweird.f32 %v1661_v29  ;;  %v832_v43 = vand.u32 2147483647, %v2025_v26 }
  0xaa   :  { %v812_v41 = vadd.f32 %v1657_v13, %v811_v32  ;;  %v1199_v44 = vmul.f32 %v2037_v35, %v1999_v6  ;;  %v1665_v45 = vpop.eup %1664  ;;  %v834_v48 = vand.u32 2147483648, %v2025_v26  ;;  %vm1204_vm1 = vweird.f32 %v2037_v35 }
  0xab   :  { %v636_v46 = vsel %vm2030_vm11, %v1655_v8, %v632_v36  ;;  %v990_v47 = vsub.f32 1.0, %v989_v38  ;;  %v644_v52 = vmul.f32 %v1665_v45, %v2012_v16  ;;  %vm2070_vm3 = vcmp.eq.f32.partialorder %v1207_v33, 8.507059e+37  ;;  %vm2099_vm7 = vmor %vm1203_vm10, %vm1204_vm1  ;;  %v345_v8 = vpop.f32.mrf.mxu1 }
  0xac   :  { %v641_v50 = vsel %vm1994_vm2, %v640_v5, %v636_v46  ;;  %v816_v51 = vsel %vm2042_vm12, %v1657_v13, %v812_v41  ;;  %vm649_vm6 = vweird.f32 %v1665_v45  ;;  %v1200_v56 = vsub.f32 1.0, %v1199_v44  ;;  %vm2089_vm2 = vmor %vm993_vm8, %vm994_vm15 }
  0xad   :  { %1364 = vst.msk [vmem:[%s3157_s3] sm:$0xff] %vm1363_vm5, %v641_v50  ;;  %v821_v54 = vsel %vm2001_vm4, %v820_v10, %v816_v51  ;;  %v991_v55 = vmul.f32 %v1661_v29, %v990_v47  ;;  %v1667_v58 = vpop.eup %1666  ;;  %v645_v59 = vsub.f32 1.0, %v644_v52  ;;  %v1210_v60 = vor.u32 1.1754944e-38, %v1209_v34  ;;  %vm2111_vm8 = vmor %vm648_vm9, %vm649_vm6 }
  0xae   :  { %1376 = vst.msk [vmem:[%s3157_s3 + $0x60] sm:$0xff] %vm1363_vm5, %v821_v54  ;;  %1668 = vpow2.f32 %v2006_v11  ;;  %v1568_v61 = vmul.f32 -1.442695, %v2009_v12  ;;  %v824_v2 = vmul.f32 %v1667_v58, %v2025_v26  ;;  %vm829_vm4 = vweird.f32 %v1667_v58 }
  0xaf   :  { %v992_v63 = vadd.f32 %v1661_v29, %v991_v55  ;;  %v1201_v3 = vmul.f32 %v2037_v35, %v1200_v56  ;;  %v646_v4 = vmul.f32 %v1665_v45, %v645_v59  ;;  %1670 = vpow2.f32 %v2017_v20  ;;  %vm2132_vm9 = vmor %vm828_vm14, %vm829_vm4 }
  0xb0   :  { %v374_v0 = vadd.f32 %v1976_v31, %v373_v49  ;;  %v316_v7 = vadd.f32 %v1976_v31, %v315_v57  ;;  %v825_v6 = vsub.f32 1.0, %v824_v2  ;;  %1672 = vpow2.f32 %v1568_v61 }
  0xb1   :  { %v996_v9 = vsel %vm2089_vm2, %v1661_v29, %v992_v63  ;;  %v1202_v11 = vadd.f32 %v2037_v35, %v1201_v3  ;;  %v647_v13 = vadd.f32 %v1665_v45, %v646_v4  ;;  %1674 = vpow2.f32 %v2019_v21 }
  0xb2   :  { %v1001_v12 = vsel %vm2047_vm13, %v1000_v28, %v996_v9  ;;  %v1580_v14 = vmul.f32 -1.442695, %v374_v0  ;;  %v826_v15 = vmul.f32 %v1667_v58, %v825_v6  ;;  %v1557_v17 = vmul.f32 -1.442695, %v316_v7  ;;  %v375_v28 = vpop.f32.mrf.mxu2 }
  0xb3   :  { %1388 = vst.msk [vmem:[%s3157_s3 + $0xc0] sm:$0xff] %vm1363_vm5, %v1001_v12  ;;  %v1206_v16 = vsel %vm2099_vm7, %v2037_v35, %v1202_v11  ;;  %v346_v18 = vadd.f32 %v1976_v31, %v345_v8  ;;  %v651_v20 = vsel %vm2111_vm8, %v1665_v45, %v647_v13  ;;  %vm2136_vm10 = vcmp.eq.f32.partialorder %v832_v43, 8.507059e+37 }
  0xb4   :  { %v1669_v19 = vpop.eup %1668  ;;  %v835_v23 = vor.u32 1.1754944e-38, %v834_v48  ;;  %v1211_v24 = vsel %vm2070_vm3, %v1210_v60, %v1206_v16  ;;  %v656_v25 = vsel %vm2054_vm0, %v2051_v40, %v651_v20  ;;  %v827_v27 = vadd.f32 %v1667_v58, %v826_v15  ;;  %v410_v40 = vpop.f32.mrf.mxu3 }
  0xb5   :  { %1402 = vst.msk [vmem:[%s3157_s3 + $0x130] sm:$0xff] %vm1363_vm5, %v1211_v24  ;;  %v2149_v26 = vadd.f32 1.0, %v1669_v19  ;;  %1676 = vpow2.f32 %v1580_v14  ;;  %v1671_v29 = vpop.eup %1670  ;;  %v1569_v30 = vmul.f32 -1.442695, %v346_v18  ;;  %v409_v34 = vadd.f32 %v1976_v31, %v408_v62  ;;  %v318_v20 = vpop.f32.mrf.mxu0 }
  0xb6   :  { %1365 = vst.msk [vmem:[%s3157_s3 + $0x8] sm:$0xff] %vm1363_vm5, %v656_v25  ;;  %1678 = vpow2.f32 %v1557_v17  ;;  %v1673_v32 = vpop.eup %1672  ;;  %v831_v33 = vsel %vm2132_vm9, %v1667_v58, %v827_v27  ;;  %v2161_v37 = vadd.f32 1.0, %v1671_v29  ;;  %v376_v39 = vadd.f32 %v1976_v31, %v375_v28 }
  0xb7   :  { %1680 = vrcp.f32 %v2149_v26  ;;  %v1675_v35 = vpop.eup %1674  ;;  %v836_v36 = vsel %vm2136_vm10, %v835_v23, %v831_v33  ;;  %v2163_v38 = vadd.f32 1.0, %v1673_v32  ;;  %v1014_v41 = vand.u32 2147483648, %v2149_v26 }
  0xb8   :  { %1377 = vst.msk [vmem:[%s3157_s3 + $0x68] sm:$0xff] %vm1363_vm5, %v836_v36  ;;  %v2171_v42 = vadd.f32 1.0, %v1675_v35  ;;  %1682 = vpow2.f32 %v1569_v30  ;;  %v1012_v43 = vand.u32 2147483647, %v2149_v26  ;;  %v667_v45 = vand.u32 2147483647, %v2161_v37 }
  0xb9   :  { %1684 = vrcp.f32 %v2161_v37  ;;  %v1594_v46 = vmul.f32 -1.442695, %v409_v34  ;;  %v2178_v47 = vadd.f32 %v1976_v31, %v410_v40  ;;  %vm1008_vm11 = vweird.f32 %v2149_v26 }
  0xba   :  { %1686 = vrcp.f32 %v2163_v38  ;;  %v669_v49 = vand.u32 2147483648, %v2161_v37  ;;  %v847_v50 = vand.u32 2147483647, %v2163_v38  ;;  %v2184_v51 = vmul.f32 -1.442695, %v376_v39 }
  0xbb   :  { %v1677_v44 = vpop.eup %1676  ;;  %1688 = vrcp.f32 %v2171_v42  ;;  %v1015_v53 = vor.u32 1.1754944e-38, %v1014_v41  ;;  %vm663_vm12 = vweird.f32 %v2161_v37  ;;  %vm843_vm13 = vweird.f32 %v2163_v38 }
  0xbc   :  { %v1679_v48 = vpop.eup %1678  ;;  %v849_v54 = vand.u32 2147483648, %v2163_v38  ;;  %vm2190_vm14 = vcmp.eq.f32.partialorder %v1012_v43, 8.507059e+37  ;;  %v1222_v57 = vand.u32 2147483647, %v2171_v42  ;;  %v1224_v58 = vand.u32 2147483648, %v2171_v42 }
  0xbd   :  { %v1681_v52 = vpop.eup %1680  ;;  %v2196_v59 = vadd.f32 1.0, %v1677_v44  ;;  %vm2198_vm15 = vcmp.eq.f32.partialorder %v667_v45, 8.507059e+37  ;;  %vm1218_vm0 = vweird.f32 %v2171_v42  ;;  %v2203_v62 = vadd.f32 1.0, %v1679_v48 }
  0xbe   :  { %v1004_v55 = vmul.f32 %v1681_v52, %v2149_v26  ;;  %v1683_v60 = vpop.eup %1682  ;;  %1690 = vpow2.f32 %v1594_v46  ;;  %v670_v2 = vor.u32 1.1754944e-38, %v669_v49  ;;  %vm2205_vm1 = vcmp.eq.f32.partialorder %v847_v50, 8.507059e+37  ;;  %v348_v26 = vpop.f32.mrf.mxu1 }
  0xbf   :  { %v1685_v63 = vpop.eup %1684  ;;  %1692 = vrcp.f32 %v2196_v59  ;;  %vm1009_vm3 = vweird.f32 %v1681_v52  ;;  %v850_v0 = vor.u32 1.1754944e-38, %v849_v54  ;;  %vm2213_vm6 = vcmp.eq.f32.partialorder %v1222_v57, 8.507059e+37  ;;  %v378_v54 = vpop.f32.mrf.mxu2 }
  0xc0   :  { %v1005_v1 = vsub.f32 1.0, %v1004_v55  ;;  %v1687_v4 = vpop.eup %1686  ;;  %v659_v5 = vmul.f32 %v1685_v63, %v2161_v37  ;;  %1694 = vrcp.f32 %v2203_v62  ;;  %v1225_v6 = vor.u32 1.1754944e-38, %v1224_v58  ;;  %vm1010_vm7 = vmor %vm1008_vm11, %vm1009_vm3 }
  0xc1   :  { %v1689_v7 = vpop.eup %1688  ;;  %v839_v9 = vmul.f32 %v1687_v4, %v2163_v38  ;;  %vm664_vm2 = vweird.f32 %v1685_v63  ;;  %v1027_v13 = vand.u32 2147483647, %v2196_v59  ;;  %vm844_vm4 = vweird.f32 %v1687_v4 }
  0xc2   :  { %v1006_v8 = vmul.f32 %v1681_v52, %v1005_v1  ;;  %v660_v11 = vsub.f32 1.0, %v659_v5  ;;  %v1214_v12 = vmul.f32 %v1689_v7, %v2171_v42  ;;  %v1029_v16 = vand.u32 2147483648, %v2196_v59  ;;  %vm2227_vm10 = vmor %vm663_vm12, %vm664_vm2  ;;  %v320_v1 = vpop.f32.mrf.mxu0 }
  0xc3   :  { %v840_v15 = vsub.f32 1.0, %v839_v9  ;;  %vm1219_vm8 = vweird.f32 %v1689_v7  ;;  %vm678_vm9 = vweird.f32 %v2203_v62  ;;  %v682_v25 = vand.u32 2147483647, %v2203_v62  ;;  %vm2239_vm11 = vmor %vm843_vm13, %vm844_vm4 }
  0xc4   :  { %v1007_v14 = vadd.f32 %v1681_v52, %v1006_v8  ;;  %v1691_v17 = vpop.eup %1690  ;;  %v661_v18 = vmul.f32 %v1685_v63, %v660_v11  ;;  %v1215_v19 = vsub.f32 1.0, %v1214_v12  ;;  %v2232_v27 = vadd.f32 1.0, %v1683_v60  ;;  %vm2251_vm12 = vmor %vm1218_vm0, %vm1219_vm8 }
  0xc5   :  { %v1693_v21 = vpop.eup %1692  ;;  %v841_v24 = vmul.f32 %v1687_v4, %v840_v15  ;;  %v684_v38 = vand.u32 2147483648, %v2203_v62  ;;  %v2257_v39 = vadd.f32 1.0, %v1691_v17  ;;  %vm2281_vm0 = vcmp.eq.f32.partialorder %v1027_v13, 8.507059e+37 }
  0xc6   :  { %v1011_v22 = vsel %vm1010_vm7, %v1681_v52, %v1007_v14  ;;  %v1695_v28 = vpop.eup %1694  ;;  %v662_v30 = vadd.f32 %v1685_v63, %v661_v18  ;;  %v1216_v33 = vmul.f32 %v1689_v7, %v1215_v19  ;;  %v1019_v34 = vmul.f32 %v1693_v21, %v2196_v59 }
  0xc7   :  { %v1016_v29 = vsel %vm2190_vm14, %v1015_v53, %v1011_v22  ;;  %v842_v35 = vadd.f32 %v1687_v4, %v841_v24  ;;  %v674_v37 = vmul.f32 %v1695_v28, %v2203_v62  ;;  %vm679_vm13 = vweird.f32 %v1695_v28 }
  0xc8   :  { %1389 = vst.msk [vmem:[%s3157_s3 + $0xc8] sm:$0xff] %vm1363_vm5, %v1016_v29  ;;  %v666_v40 = vsel %vm2227_vm10, %v1685_v63, %v662_v30  ;;  %v1217_v41 = vadd.f32 %v1689_v7, %v1216_v33  ;;  %v1020_v43 = vsub.f32 1.0, %v1019_v34  ;;  %1696 = vrcp.f32 %v2232_v27 }
  0xc9   :  { %v671_v44 = vsel %vm2198_vm15, %v670_v2, %v666_v40  ;;  %v846_v42 = vsel %vm2239_vm11, %v1687_v4, %v842_v35  ;;  %v675_v45 = vsub.f32 1.0, %v674_v37  ;;  %vm1024_vm14 = vweird.f32 %v1693_v21 }
  0xca   :  { %1366 = vst.msk [vmem:[%s3157_s3 + $0x10] sm:$0xff] %vm1363_vm5, %v671_v44  ;;  %v851_v46 = vsel %vm2205_vm1, %v850_v0, %v846_v42  ;;  %v1221_v48 = vsel %vm2251_vm12, %v1689_v7, %v1217_v41  ;;  %v1021_v49 = vmul.f32 %v1693_v21, %v1020_v43  ;;  %vm1023_vm15 = vweird.f32 %v2196_v59  ;;  %vm2292_vm1 = vmor %vm678_vm9, %vm679_vm13  ;;  %v350_v0 = vpop.f32.mrf.mxu1 }
  0xcb   :  { %1378 = vst.msk [vmem:[%s3157_s3 + $0x70] sm:$0xff] %vm1363_vm5, %v851_v46  ;;  %v1226_v50 = vsel %vm2213_vm6, %v1225_v6, %v1221_v48  ;;  %v676_v53 = vmul.f32 %v1695_v28, %v675_v45  ;;  %v1030_v56 = vor.u32 1.1754944e-38, %v1029_v16  ;;  %v685_v58 = vor.u32 1.1754944e-38, %v684_v38  ;;  %vm1025_vm3 = vmor %vm1023_vm15, %vm1024_vm14  ;;  %v323_v48 = vpop.f32.mrf.mxu0 }
  0xcc   :  { %1403 = vst.msk [vmem:[%s3157_s3 + $0x138] sm:$0xff] %vm1363_vm5, %v1226_v50  ;;  %v1022_v55 = vadd.f32 %v1693_v21, %v1021_v49  ;;  %1698 = vrcp.f32 %v2257_v39  ;;  %vm683_vm6 = vcmp.eq.f32.partialorder %v682_v25, 8.507059e+37  ;;  %vm858_vm2 = vweird.f32 %v2232_v27  ;;  %v413_v25 = vpop.f32.mrf.mxu3 }
  0xcd   :  { %v677_v59 = vadd.f32 %v1695_v28, %v676_v53  ;;  %v862_v60 = vand.u32 2147483647, %v2232_v27  ;;  %v864_v63 = vand.u32 2147483648, %v2232_v27  ;;  %1700 = vpow2.f32 %v2184_v51 }
  0xce   :  { %v1026_v61 = vsel %vm1025_vm3, %v1693_v21, %v1022_v55  ;;  %v319_v62 = vadd.f32 %v1976_v31, %v318_v20  ;;  %v1697_v2 = vpop.eup %1696  ;;  %vm1233_vm4 = vweird.f32 %v2257_v39  ;;  %v349_v5 = vadd.f32 %v1976_v31, %v348_v26  ;;  %v380_v26 = vpop.f32.mrf.mxu2 }
  0xcf   :  { %v1031_v3 = vsel %vm2281_vm0, %v1030_v56, %v1026_v61  ;;  %v681_v4 = vsel %vm2292_vm1, %v1695_v28, %v677_v59  ;;  %v854_v7 = vmul.f32 %v1697_v2, %v2232_v27  ;;  %v1237_v8 = vand.u32 2147483647, %v2257_v39 }
  0xd0   :  { %1390 = vst.msk [vmem:[%s3157_s3 + $0xd0] sm:$0xff] %vm1363_vm5, %v1031_v3  ;;  %v686_v51 = vsel %vm683_vm6, %v685_v58, %v681_v4  ;;  %v1558_v9 = vmul.f32 -1.442695, %v319_v62  ;;  %v1570_v10 = vmul.f32 -1.442695, %v349_v5  ;;  %v379_v11 = vadd.f32 %v1976_v31, %v378_v54 }
  0xd1   :  { %1367 = vst.msk [vmem:[%s3157_s3 + $0x18] sm:$0xff] %vm1363_vm5, %v686_v51  ;;  %v1595_v6 = vmul.f32 -1.442695, %v2178_v47  ;;  %v321_v12 = vadd.f32 %v1976_v31, %v320_v1  ;;  %v855_v14 = vsub.f32 1.0, %v854_v7  ;;  %vm859_vm7 = vweird.f32 %v1697_v2 }
  0xd2   :  { %v1699_v13 = vpop.eup %1698  ;;  %1702 = vpow2.f32 %v1558_v9  ;;  %v351_v15 = vadd.f32 %v1976_v31, %v350_v0  ;;  %v865_v16 = vor.u32 1.1754944e-38, %v864_v63  ;;  %v1582_v18 = vmul.f32 -1.442695, %v379_v11  ;;  %vm2326_vm8 = vmor %vm858_vm2, %vm859_vm7 }
  0xd3   :  { %v1229_v17 = vmul.f32 %v1699_v13, %v2257_v39  ;;  %1704 = vpow2.f32 %v1570_v10  ;;  %v1701_v19 = vpop.eup %1700  ;;  %v856_v20 = vmul.f32 %v1697_v2, %v855_v14  ;;  %v1239_v21 = vand.u32 2147483648, %v2257_v39 }
  0xd4   :  { %1706 = vpow2.f32 %v1595_v6  ;;  %v1559_v47 = vmul.f32 -1.442695, %v321_v12  ;;  %vm1234_vm9 = vweird.f32 %v1699_v13  ;;  %v2330_v24 = vadd.f32 1.0, %v1701_v19 }
  0xd5   :  { %v1230_v23 = vsub.f32 1.0, %v1229_v17  ;;  %1708 = vpow2.f32 %v1582_v18  ;;  %v857_v28 = vadd.f32 %v1697_v2, %v856_v20  ;;  %vm863_vm10 = vcmp.eq.f32.partialorder %v862_v60, 8.507059e+37  ;;  %vm2342_vm12 = vmor %vm1233_vm4, %vm1234_vm9 }
  0xd6   :  { %v1571_v29 = vmul.f32 -1.442695, %v351_v15  ;;  %v414_v30 = vadd.f32 %v1976_v31, %v413_v25  ;;  %vm2333_vm11 = vcmp.eq.f32.partialorder %v1237_v8, 8.507059e+37  ;;  %1710 = vrcp.f32 %v2330_v24 }
  0xd7   :  { %v1231_v32 = vmul.f32 %v1699_v13, %v1230_v23  ;;  %v861_v34 = vsel %vm2326_vm8, %v1697_v2, %v857_v28  ;;  %v1240_v36 = vor.u32 1.1754944e-38, %v1239_v21  ;;  %1712 = vpow2.f32 %v1559_v47 }
  0xd8   :  { %v1703_v27 = vpop.eup %1702  ;;  %v381_v37 = vadd.f32 %v1976_v31, %v380_v26  ;;  %v866_v40 = vsel %vm863_vm10, %v865_v16, %v861_v34  ;;  %v1044_v43 = vand.u32 2147483648, %v2330_v24  ;;  %v1042_v39 = vand.u32 2147483647, %v2330_v24 }
  0xd9   :  { %v1705_v38 = vpop.eup %1704  ;;  %v1232_v41 = vadd.f32 %v1699_v13, %v1231_v32  ;;  %v2348_v44 = vadd.f32 1.0, %v1703_v27  ;;  %1379 = vst.msk [vmem:[%s3157_s3 + $0x78] sm:$0xff] %vm1363_vm5, %v866_v40  ;;  %1714 = vpow2.f32 %v1571_v29  ;;  %v1596_v46 = vmul.f32 -1.442695, %v414_v30 }
  0xda   :  { %v1707_v42 = vpop.eup %1706  ;;  %v2355_v45 = vadd.f32 1.0, %v1705_v38  ;;  %v324_v52 = vadd.f32 %v1976_v31, %v323_v48  ;;  %vm1038_vm13 = vweird.f32 %v2330_v24  ;;  %v1045_v56 = vor.u32 1.1754944e-38, %v1044_v43 }
  0xdb   :  { %v1709_v49 = vpop.eup %1708  ;;  %v1236_v50 = vsel %vm2342_vm12, %v1699_v13, %v1232_v41  ;;  %1716 = vrcp.f32 %v2348_v44  ;;  %v697_v54 = vand.u32 2147483647, %v2348_v44  ;;  %v699_v57 = vand.u32 2147483648, %v2348_v44 }
  0xdc   :  { %v1241_v53 = vsel %vm2333_vm11, %v1240_v36, %v1236_v50  ;;  %1718 = vrcp.f32 %v2355_v45  ;;  %v1711_v55 = vpop.eup %1710  ;;  %v2371_v58 = vadd.f32 1.0, %v1707_v42  ;;  %v2373_v59 = vmul.f32 -1.442695, %v381_v37  ;;  %v353_v50 = vpop.f32.mrf.mxu1 }
  0xdd   :  { %1404 = vst.msk [vmem:[%s3157_s3 + $0x140] sm:$0xff] %vm1363_vm5, %v1241_v53  ;;  %v1713_v60 = vpop.eup %1712  ;;  %v1034_v61 = vmul.f32 %v1711_v55, %v2330_v24  ;;  %vm2376_vm14 = vcmp.eq.f32.partialorder %v1042_v39, 8.507059e+37  ;;  %v877_v62 = vand.u32 2147483647, %v2355_v45  ;;  %v2381_v1 = vadd.f32 1.0, %v1709_v49 }
  0xde   :  { %1720 = vpow2.f32 %v1596_v46  ;;  %vm693_vm15 = vweird.f32 %v2348_v44  ;;  %v879_v2 = vand.u32 2147483648, %v2355_v45  ;;  %v2386_v3 = vmul.f32 -1.442695, %v324_v52 }
  0xdf   :  { %1722 = vrcp.f32 %v2371_v58  ;;  %v1715_v4 = vpop.eup %1714  ;;  %v1035_v5 = vsub.f32 1.0, %v1034_v61  ;;  %vm2388_vm0 = vcmp.eq.f32.partialorder %v697_v54, 8.507059e+37  ;;  %vm873_vm1 = vweird.f32 %v2355_v45 }
  0xe0   :  { %1724 = vrcp.f32 %v2381_v1  ;;  %vm1039_vm3 = vweird.f32 %v1711_v55  ;;  %v700_v7 = vor.u32 1.1754944e-38, %v699_v57  ;;  %v1252_v8 = vand.u32 2147483647, %v2371_v58 }
  0xe1   :  { %v1717_v51 = vpop.eup %1716  ;;  %v2395_v9 = vadd.f32 1.0, %v1713_v60  ;;  %v1036_v6 = vmul.f32 %v1711_v55, %v1035_v5  ;;  %vm2398_vm6 = vcmp.eq.f32.partialorder %v877_v62, 8.507059e+37  ;;  %v1254_v13 = vand.u32 2147483648, %v2371_v58  ;;  %vm1040_vm7 = vmor %vm1038_vm13, %vm1039_vm3  ;;  %v415_v62 = vpop.f32.mrf.mxu3 }
  0xe2   :  { %v1719_v10 = vpop.eup %1718  ;;  %v689_v11 = vmul.f32 %v1717_v51, %v2348_v44  ;;  %v880_v15 = vor.u32 1.1754944e-38, %v879_v2  ;;  %vm1248_vm2 = vweird.f32 %v2371_v58  ;;  %v1057_v16 = vand.u32 2147483647, %v2381_v1  ;;  %v383_v2 = vpop.f32.mrf.mxu2 }
  0xe3   :  { %v869_v14 = vmul.f32 %v1719_v10, %v2355_v45  ;;  %v1037_v18 = vadd.f32 %v1711_v55, %v1036_v6  ;;  %vm694_vm4 = vweird.f32 %v1717_v51  ;;  %1726 = vrcp.f32 %v2395_v9 }
  0xe4   :  { %v1721_v17 = vpop.eup %1720  ;;  %v690_v19 = vsub.f32 1.0, %v689_v11  ;;  %vm874_vm8 = vweird.f32 %v1719_v10  ;;  %vm2410_vm9 = vcmp.eq.f32.partialorder %v1252_v8, 8.507059e+37  ;;  %vm1053_vm10 = vweird.f32 %v2381_v1  ;;  %vm2422_vm11 = vmor %vm693_vm15, %vm694_vm4  ;;  %v355_v47 = vpop.f32.mrf.mxu1 }
  0xe5   :  { %v1723_v20 = vpop.eup %1722  ;;  %v870_v21 = vsub.f32 1.0, %v869_v14  ;;  %v1059_v22 = vand.u32 2147483648, %v2381_v1  ;;  %v1041_v25 = vsel %vm1040_vm7, %v1711_v55, %v1037_v18  ;;  %v1255_v29 = vor.u32 1.1754944e-38, %v1254_v13  ;;  %vm2435_vm13 = vmor %vm873_vm1, %vm874_vm8 }
  0xe6   :  { %v1725_v23 = vpop.eup %1724  ;;  %v691_v26 = vmul.f32 %v1717_v51, %v690_v19  ;;  %v1244_v28 = vmul.f32 %v1723_v20, %v2371_v58  ;;  %v1046_v24 = vsel %vm2376_vm14, %v1045_v56, %v1041_v25  ;;  %vm708_vm12 = vweird.f32 %v2395_v9  ;;  %v325_v19 = vpop.f32.mrf.mxu0 }
  0xe7   :  { %v871_v32 = vmul.f32 %v1719_v10, %v870_v21  ;;  %v1049_v33 = vmul.f32 %v1725_v23, %v2381_v1  ;;  %1391 = vst.msk [vmem:[%s3157_s3 + $0xd8] sm:$0xff] %vm1363_vm5, %v1046_v24  ;;  %vm1249_vm14 = vweird.f32 %v1723_v20  ;;  %v712_v36 = vand.u32 2147483647, %v2395_v9 }
  0xe8   :  { %v692_v27 = vadd.f32 %v1717_v51, %v691_v26  ;;  %v1245_v35 = vsub.f32 1.0, %v1244_v28  ;;  %vm1054_vm15 = vweird.f32 %v1725_v23  ;;  %v2440_v40 = vadd.f32 1.0, %v1715_v4  ;;  %vm2453_vm1 = vmor %vm1248_vm2, %vm1249_vm14 }
  0xe9   :  { %v872_v37 = vadd.f32 %v1719_v10, %v871_v32  ;;  %v1050_v38 = vsub.f32 1.0, %v1049_v33  ;;  %v1727_v41 = vpop.eup %1726  ;;  %v2444_v42 = vadd.f32 1.0, %v1721_v17  ;;  %1728 = vpow2.f32 %v2373_v59  ;;  %vm1055_vm3 = vmor %vm1053_vm10, %vm1054_vm15 }
  0xea   :  { %v696_v43 = vsel %vm2422_vm11, %v1717_v51, %v692_v27  ;;  %v1246_v44 = vmul.f32 %v1723_v20, %v1245_v35  ;;  %v704_v49 = vmul.f32 %v1727_v41, %v2395_v9  ;;  %v714_v54 = vand.u32 2147483648, %v2395_v9 }
  0xeb   :  { %v701_v39 = vsel %vm2388_vm0, %v700_v7, %v696_v43  ;;  %v876_v45 = vsel %vm2435_vm13, %v1719_v10, %v872_v37  ;;  %v1051_v48 = vmul.f32 %v1725_v23, %v1050_v38  ;;  %1730 = vrcp.f32 %v2440_v40 }
  0xec   :  { %1368 = vst.msk [vmem:[%s3157_s3 + $0x20] sm:$0xff] %vm1363_vm5, %v701_v39  ;;  %v881_v52 = vsel %vm2398_vm6, %v880_v15, %v876_v45  ;;  %v1247_v53 = vadd.f32 %v1723_v20, %v1246_v44  ;;  %v705_v56 = vsub.f32 1.0, %v704_v49  ;;  %vm709_vm0 = vweird.f32 %v1727_v41 }
  0xed   :  { %1380 = vst.msk [vmem:[%s3157_s3 + $0x80] sm:$0xff] %vm1363_vm5, %v881_v52  ;;  %v1052_v55 = vadd.f32 %v1725_v23, %v1051_v48  ;;  %v354_v57 = vadd.f32 %v1976_v31, %v353_v50  ;;  %v1060_v59 = vor.u32 1.1754944e-38, %v1059_v22  ;;  %1732 = vrcp.f32 %v2444_v42  ;;  %vm2486_vm2 = vmor %vm708_vm12, %vm709_vm0  ;;  %v418_v52 = vpop.f32.mrf.mxu3 }
  0xee   :  { %v1251_v58 = vsel %vm2453_vm1, %v1723_v20, %v1247_v53  ;;  %vm1058_vm6 = vcmp.eq.f32.partialorder %v1057_v16, 8.507059e+37  ;;  %v706_v63 = vmul.f32 %v1727_v41, %v705_v56  ;;  %vm2490_vm4 = vcmp.eq.f32.partialorder %v712_v36, 8.507059e+37  ;;  %v385_v53 = vpop.f32.mrf.mxu2  ;;  %v2568_v56 = vld [vmem:[%s3155_s2] ss:$0 sm:$0xff] }
  0xef   :  { %v1256_v60 = vsel %vm2410_vm9, %v1255_v29, %v1251_v58  ;;  %v1056_v61 = vsel %vm1055_vm3, %v1725_v23, %v1052_v55  ;;  %v1729_v4 = vpop.eup %1728  ;;  %v715_v51 = vor.u32 1.1754944e-38, %v714_v54  ;;  %v892_v7 = vand.u32 2147483647, %v2440_v40 }
  0xf0   :  { %1405 = vst.msk [vmem:[%s3157_s3 + $0x148] sm:$0xff] %vm1363_vm5, %v1256_v60  ;;  %v1061_v5 = vsel %vm1058_vm6, %v1060_v59, %v1056_v61  ;;  %v707_v8 = vadd.f32 %v1727_v41, %v706_v63  ;;  %v2499_v10 = vadd.f32 1.0, %v1729_v4  ;;  %1734 = vpow2.f32 %v2386_v3 }
  0xf1   :  { %1392 = vst.msk [vmem:[%s3157_s3 + $0xe0] sm:$0xff] %vm1363_vm5, %v1061_v5  ;;  %v1572_v9 = vmul.f32 -1.442695, %v354_v57  ;;  %v1731_v6 = vpop.eup %1730  ;;  %v894_v11 = vand.u32 2147483648, %v2440_v40  ;;  %v416_v12 = vadd.f32 %v1976_v31, %v415_v62  ;;  %v384_v13 = vadd.f32 %v1976_v31, %v383_v2 }
  0xf2   :  { %v711_v14 = vsel %vm2486_vm2, %v1727_v41, %v707_v8  ;;  %v884_v15 = vmul.f32 %v1731_v6, %v2440_v40  ;;  %vm888_vm7 = vweird.f32 %v2440_v40  ;;  %1736 = vrcp.f32 %v2499_v10 }
  0xf3   :  { %v1733_v16 = vpop.eup %1732  ;;  %v716_v3 = vsel %vm2490_vm4, %v715_v51, %v711_v14  ;;  %vm2512_vm8 = vcmp.eq.f32.partialorder %v892_v7, 8.507059e+37  ;;  %vm1263_vm9 = vweird.f32 %v2444_v42  ;;  %v1267_v18 = vand.u32 2147483647, %v2444_v42 }
  0xf4   :  { %1369 = vst.msk [vmem:[%s3157_s3 + $0x28] sm:$0xff] %vm1363_vm5, %v716_v3  ;;  %v885_v20 = vsub.f32 1.0, %v884_v15  ;;  %vm889_vm10 = vweird.f32 %v1731_v6  ;;  %v1259_v21 = vmul.f32 %v1733_v16, %v2444_v42  ;;  %1738 = vpow2.f32 %v1572_v9 }
  0xf5   :  { %v895_v22 = vor.u32 1.1754944e-38, %v894_v11  ;;  %v1269_v23 = vand.u32 2147483648, %v2444_v42  ;;  %v1597_v25 = vmul.f32 -1.442695, %v416_v12  ;;  %v1584_v26 = vmul.f32 -1.442695, %v384_v13  ;;  %vm2527_vm12 = vmor %vm888_vm7, %vm889_vm10 }
  0xf6   :  { %v1735_v28 = vpop.eup %1734  ;;  %v886_v29 = vmul.f32 %v1731_v6, %v885_v20  ;;  %v1260_v24 = vsub.f32 1.0, %v1259_v21  ;;  %vm1264_vm11 = vweird.f32 %v1733_v16  ;;  %v326_v30 = vadd.f32 %v1976_v31, %v325_v19 }
  0xf7   :  { %v1072_v33 = vand.u32 2147483647, %v2499_v10  ;;  %v2532_v27 = vadd.f32 1.0, %v1735_v28  ;;  %1740 = vpow2.f32 %v1597_v25  ;;  %v356_v34 = vadd.f32 %v1976_v31, %v355_v47  ;;  %vm2537_vm13 = vmor %vm1263_vm9, %vm1264_vm11 }
  0xf8   :  { %v1737_v35 = vpop.eup %1736  ;;  %v887_v36 = vadd.f32 %v1731_v6, %v886_v29  ;;  %v1261_v37 = vmul.f32 %v1733_v16, %v1260_v24  ;;  %1742 = vpow2.f32 %v1584_v26  ;;  %v1561_v38 = vmul.f32 -1.442695, %v326_v30 }
  0xf9   :  { %vm2541_vm14 = vcmp.eq.f32.partialorder %v1267_v18, 8.507059e+37  ;;  %v1270_v43 = vor.u32 1.1754944e-38, %v1269_v23  ;;  %v1064_v44 = vmul.f32 %v1737_v35, %v2499_v10  ;;  %1744 = vrcp.f32 %v2532_v27 }
  0xfa   :  { %v1739_v31 = vpop.eup %1738  ;;  %v891_v39 = vsel %vm2527_vm12, %v1731_v6, %v887_v36  ;;  %v1262_v45 = vadd.f32 %v1733_v16, %v1261_v37  ;;  %vm1068_vm15 = vweird.f32 %v2499_v10  ;;  %v1074_v42 = vand.u32 2147483648, %v2499_v10 }
  0xfb   :  { %v896_v46 = vsel %vm2512_vm8, %v895_v22, %v891_v39  ;;  %v1065_v48 = vsub.f32 1.0, %v1064_v44  ;;  %vm2553_vm1 = vcmp.eq.f32.partialorder %v1072_v33, 8.507059e+37  ;;  %v2557_v50 = vadd.f32 1.0, %v1739_v31 }
  0xfc   :  { %1381 = vst.msk [vmem:[%s3157_s3 + $0x88] sm:$0xff] %vm1363_vm5, %v896_v46  ;;  %v1266_v54 = vsel %vm2537_vm13, %v1733_v16, %v1262_v45  ;;  %1746 = vpow2.f32 %v1561_v38  ;;  %v1573_v55 = vmul.f32 -1.442695, %v356_v34  ;;  %v419_v57 = vadd.f32 %v2568_v56, %v418_v52  ;;  %v388_v16 = vpop.f32.mrf.mxu2 }
  0xfd   :  { %v1741_v58 = vpop.eup %1740  ;;  %v1271_v59 = vsel %vm2541_vm14, %v1270_v43, %v1266_v54  ;;  %v1066_v60 = vmul.f32 %v1737_v35, %v1065_v48  ;;  %vm1069_vm0 = vweird.f32 %v1737_v35  ;;  %1748 = vrcp.f32 %v2557_v50 }
  0xfe   :  { %v1743_v61 = vpop.eup %1742  ;;  %1406 = vst.msk [vmem:[%s3157_s3 + $0x150] sm:$0xff] %vm1363_vm5, %v1271_v59  ;;  %v1075_v63 = vor.u32 1.1754944e-38, %v1074_v42  ;;  %v2578_v62 = vadd.f32 1.0, %v1741_v58  ;;  %1750 = vpow2.f32 %v1573_v55  ;;  %v386_v2 = vadd.f32 %v2568_v56, %v385_v53  ;;  %vm1070_vm3 = vmor %vm1068_vm15, %vm1069_vm0 }
  0xff   :  { %v1745_v4 = vpop.eup %1744  ;;  %v1067_v5 = vadd.f32 %v1737_v35, %v1066_v60  ;;  %v727_v1 = vand.u32 2147483647, %v2532_v27  ;;  %v729_v0 = vand.u32 2147483648, %v2532_v27  ;;  %v2583_v51 = vadd.f32 1.0, %v1743_v61 }
 0x100   :  { %v719_v7 = vmul.f32 %v1745_v4, %v2532_v27  ;;  %vm723_vm6 = vweird.f32 %v2532_v27  ;;  %v907_v8 = vand.u32 2147483647, %v2557_v50  ;;  %v909_v9 = vand.u32 2147483648, %v2557_v50  ;;  %v328_v27 = vpop.f32.mrf.mxu0 }
 0x101   :  { %v1071_v6 = vsel %vm1070_vm3, %v1737_v35, %v1067_v5  ;;  %vm724_vm2 = vweird.f32 %v1745_v4  ;;  %1752 = vrcp.f32 %v2578_v62  ;;  %v1598_v11 = vmul.f32 -1.442695, %v419_v57 }
 0x102   :  { %v1747_v12 = vpop.eup %1746  ;;  %v1076_v13 = vsel %vm2553_vm1, %v1075_v63, %v1071_v6  ;;  %v720_v14 = vsub.f32 1.0, %v719_v7  ;;  %v1282_v10 = vand.u32 2147483647, %v2578_v62  ;;  %1754 = vrcp.f32 %v2583_v51  ;;  %vm2613_vm9 = vmor %vm723_vm6, %vm724_vm2 }
 0x103   :  { %v1749_v15 = vpop.eup %1748  ;;  %1393 = vst.msk [vmem:[%s3157_s3 + $0xe8] sm:$0xff] %vm1363_vm5, %v1076_v13  ;;  %vm2600_vm4 = vcmp.eq.f32.partialorder %v727_v1, 8.507059e+37  ;;  %v730_v3 = vor.u32 1.1754944e-38, %v729_v0  ;;  %vm903_vm7 = vweird.f32 %v2557_v50  ;;  %v1585_v17 = vmul.f32 -1.442695, %v386_v2  ;;  %v420_v0 = vpop.f32.mrf.mxu3 }
 0x104   :  { %v1751_v18 = vpop.eup %1750  ;;  %v721_v19 = vmul.f32 %v1745_v4, %v720_v14  ;;  %v899_v20 = vmul.f32 %v1749_v15, %v2557_v50  ;;  %vm2606_vm8 = vcmp.eq.f32.partialorder %v907_v8, 8.507059e+37  ;;  %v910_v47 = vor.u32 1.1754944e-38, %v909_v9  ;;  %v390_v57 = vpop.f32.mrf.mxu2 }
 0x105   :  { %vm904_vm10 = vweird.f32 %v1749_v15  ;;  %vm1278_vm11 = vweird.f32 %v2578_v62  ;;  %v1284_v23 = vand.u32 2147483648, %v2578_v62  ;;  %v2619_v25 = vadd.f32 1.0, %v1747_v12 }
 0x106   :  { %v722_v26 = vadd.f32 %v1745_v4, %v721_v19  ;;  %v900_v28 = vsub.f32 1.0, %v899_v20  ;;  %vm2621_vm12 = vcmp.eq.f32.partialorder %v1282_v10, 8.507059e+37  ;;  %v2625_v24 = vadd.f32 1.0, %v1751_v18  ;;  %vm2640_vm14 = vmor %vm903_vm7, %vm904_vm10 }
 0x107   :  { %1756 = vpow2.f32 %v1598_v11  ;;  %v1753_v30 = vpop.eup %1752  ;;  %vm1083_vm13 = vweird.f32 %v2583_v51  ;;  %v1087_v32 = vand.u32 2147483647, %v2583_v51  ;;  %v1089_v33 = vand.u32 2147483648, %v2583_v51 }
 0x108   :  { %1758 = vrcp.f32 %v2619_v25  ;;  %v1755_v34 = vpop.eup %1754  ;;  %v726_v35 = vsel %vm2613_vm9, %v1745_v4, %v722_v26  ;;  %v901_v36 = vmul.f32 %v1749_v15, %v900_v28  ;;  %v1274_v37 = vmul.f32 %v1753_v30, %v2578_v62  ;;  %v358_v62 = vpop.f32.mrf.mxu1 }
 0x109   :  { %v329_v38 = vadd.f32 %v2568_v56, %v328_v27  ;;  %v731_v40 = vsel %vm2600_vm4, %v730_v3, %v726_v35  ;;  %v1285_v43 = vor.u32 1.1754944e-38, %v1284_v23  ;;  %v1079_v44 = vmul.f32 %v1755_v34, %v2583_v51 }
 0x10a   :  { %v744_v31 = vand.u32 2147483648, %v2619_v25  ;;  %1370 = vst.msk [vmem:[%s3157_s3 + $0x30] sm:$0xff] %vm1363_vm5, %v731_v40  ;;  %v902_v39 = vadd.f32 %v1749_v15, %v901_v36  ;;  %v1275_v45 = vsub.f32 1.0, %v1274_v37  ;;  %vm1279_vm15 = vweird.f32 %v1753_v30  ;;  %v330_v36 = vpop.f32.mrf.mxu0 }
 0x10b   :  { %1760 = vrcp.f32 %v2625_v24  ;;  %v1080_v42 = vsub.f32 1.0, %v1079_v44  ;;  %vm2651_vm1 = vcmp.eq.f32.partialorder %v1087_v32, 8.507059e+37  ;;  %v1090_v48 = vor.u32 1.1754944e-38, %v1089_v33  ;;  %vm2662_vm3 = vmor %vm1278_vm11, %vm1279_vm15  ;;  %v423_v44 = vpop.f32.mrf.mxu3 }
 0x10c   :  { %vm738_vm0 = vweird.f32 %v2619_v25  ;;  %v906_v50 = vsel %vm2640_vm14, %v1749_v15, %v902_v39  ;;  %v1276_v52 = vmul.f32 %v1753_v30, %v1275_v45  ;;  %1762 = vpow2.f32 %v1585_v17 }
 0x10d   :  { %v1757_v49 = vpop.eup %1756  ;;  %v1562_v53 = vmul.f32 -1.442695, %v329_v38  ;;  %v911_v55 = vsel %vm2606_vm8, %v910_v47, %v906_v50  ;;  %v1081_v58 = vmul.f32 %v1755_v34, %v1080_v42  ;;  %vm1084_vm6 = vweird.f32 %v1755_v34 }
 0x10e   :  { %v1759_v54 = vpop.eup %1758  ;;  %v742_v59 = vand.u32 2147483647, %v2619_v25  ;;  %1382 = vst.msk [vmem:[%s3157_s3 + $0x90] sm:$0xff] %vm1363_vm5, %v911_v55  ;;  %v1277_v60 = vadd.f32 %v1753_v30, %v1276_v52  ;;  %v745_v63 = vor.u32 1.1754944e-38, %v744_v31  ;;  %v2672_v2 = vadd.f32 1.0, %v1757_v49  ;;  %vm1085_vm2 = vmor %vm1083_vm13, %vm1084_vm6 }
 0x10f   :  { %v734_v61 = vmul.f32 %v1759_v54, %v2619_v25  ;;  %v1082_v4 = vadd.f32 %v1755_v34, %v1081_v58  ;;  %v924_v5 = vand.u32 2147483648, %v2625_v24  ;;  %1764 = vpow2.f32 %v1562_v53 }
 0x110   :  { %v359_v1 = vadd.f32 %v2568_v56, %v358_v62  ;;  %v1281_v8 = vsel %vm2662_vm3, %v1753_v30, %v1277_v60  ;;  %vm739_vm4 = vweird.f32 %v1759_v54  ;;  %1766 = vrcp.f32 %v2672_v2  ;;  %v360_v38 = vpop.f32.mrf.mxu1 }
 0x111   :  { %v1761_v7 = vpop.eup %1760  ;;  %v735_v9 = vsub.f32 1.0, %v734_v61  ;;  %v1286_v6 = vsel %vm2621_vm12, %v1285_v43, %v1281_v8  ;;  %v1086_v11 = vsel %vm1085_vm2, %v1755_v34, %v1082_v4  ;;  %vm918_vm7 = vweird.f32 %v2625_v24  ;;  %vm2700_vm8 = vmor %vm738_vm0, %vm739_vm4 }
 0x112   :  { %v914_v12 = vmul.f32 %v1761_v7, %v2625_v24  ;;  %v1763_v13 = vpop.eup %1762  ;;  %1407 = vst.msk [vmem:[%s3157_s3 + $0x158] sm:$0xff] %vm1363_vm5, %v1286_v6  ;;  %v1091_v51 = vsel %vm2651_vm1, %v1090_v48, %v1086_v11  ;;  %v922_v10 = vand.u32 2147483647, %v2625_v24  ;;  %v421_v15 = vadd.f32 %v2568_v56, %v420_v0 }
 0x113   :  { %v736_v14 = vmul.f32 %v1759_v54, %v735_v9  ;;  %1394 = vst.msk [vmem:[%s3157_s3 + $0xf0] sm:$0xff] %vm1363_vm5, %v1091_v51  ;;  %vm919_vm9 = vweird.f32 %v1761_v7  ;;  %v2704_v18 = vadd.f32 1.0, %v1763_v13  ;;  %v1574_v19 = vmul.f32 -1.442695, %v359_v1 }
 0x114   :  { %v915_v17 = vsub.f32 1.0, %v914_v12  ;;  %vm743_vm10 = vcmp.eq.f32.partialorder %v742_v59, 8.507059e+37  ;;  %v925_v21 = vor.u32 1.1754944e-38, %v924_v5  ;;  %v1297_v47 = vand.u32 2147483647, %v2672_v2  ;;  %vm2714_vm11 = vmor %vm918_vm7, %vm919_vm9 }
 0x115   :  { %v737_v20 = vadd.f32 %v1759_v54, %v736_v14  ;;  %v1765_v22 = vpop.eup %1764  ;;  %v1299_v26 = vand.u32 2147483648, %v2672_v2  ;;  %1768 = vrcp.f32 %v2704_v18  ;;  %v389_v25 = vadd.f32 %v2568_v56, %v388_v16 }
 0x116   :  { %v916_v23 = vmul.f32 %v1761_v7, %v915_v17  ;;  %v1767_v28 = vpop.eup %1766  ;;  %v2718_v32 = vadd.f32 1.0, %v1765_v22  ;;  %1770 = vpow2.f32 %v1574_v19  ;;  %v1599_v33 = vmul.f32 -1.442695, %v421_v15  ;;  %v2780_v17 = vpop.f32.mrf.mxu3 }
 0x117   :  { %v741_v29 = vsel %vm2700_vm8, %v1759_v54, %v737_v20  ;;  %vm923_vm12 = vcmp.eq.f32.partialorder %v922_v10, 8.507059e+37  ;;  %v1289_v35 = vmul.f32 %v1767_v28, %v2672_v2  ;;  %vm1293_vm13 = vweird.f32 %v2672_v2 }
 0x118   :  { %v746_v27 = vsel %vm743_vm10, %v745_v63, %v741_v29  ;;  %v917_v34 = vadd.f32 %v1761_v7, %v916_v23  ;;  %vm2726_vm14 = vcmp.eq.f32.partialorder %v1297_v47, 8.507059e+37  ;;  %v1102_v37 = vand.u32 2147483647, %v2704_v18  ;;  %v333_v29 = vpop.f32.mrf.mxu0 }
 0x119   :  { %1371 = vst.msk [vmem:[%s3157_s3 + $0x38] sm:$0xff] %vm1363_vm5, %v746_v27  ;;  %1772 = vrcp.f32 %v2718_v32  ;;  %v1290_v41 = vsub.f32 1.0, %v1289_v35  ;;  %vm1294_vm15 = vweird.f32 %v1767_v28  ;;  %v1300_v43 = vor.u32 1.1754944e-38, %v1299_v26  ;;  %v2805_v27 = vpop.f32.mrf.mxu2 }
 0x11a   :  { %v921_v40 = vsel %vm2714_vm11, %v1761_v7, %v917_v34  ;;  %1774 = vpow2.f32 %v1599_v33  ;;  %v1586_v39 = vmul.f32 -1.442695, %v389_v25  ;;  %v331_v45 = vadd.f32 %v2568_v56, %v330_v36  ;;  %vm2744_vm0 = vmor %vm1293_vm13, %vm1294_vm15 }
 0x11b   :  { %v926_v31 = vsel %vm923_vm12, %v925_v21, %v921_v40  ;;  %v1769_v42 = vpop.eup %1768  ;;  %v1291_v46 = vmul.f32 %v1767_v28, %v1290_v41  ;;  %vm1098_vm1 = vweird.f32 %v2704_v18  ;;  %v1104_v48 = vand.u32 2147483648, %v2704_v18 }
 0x11c   :  { %1383 = vst.msk [vmem:[%s3157_s3 + $0x98] sm:$0xff] %vm1363_vm5, %v926_v31  ;;  %v361_v49 = vadd.f32 %v2568_v56, %v360_v38  ;;  %v1771_v50 = vpop.eup %1770  ;;  %v1094_v53 = vmul.f32 %v1769_v42, %v2704_v18  ;;  %vm2749_vm3 = vcmp.eq.f32.partialorder %v1102_v37, 8.507059e+37  ;;  %1776 = vpow2.f32 %v1586_v39 }
 0x11d   :  { %v1563_v55 = vmul.f32 -1.442695, %v331_v45  ;;  %v1292_v58 = vadd.f32 %v1767_v28, %v1291_v46  ;;  %v757_v59 = vand.u32 2147483647, %v2718_v32  ;;  %v759_v60 = vand.u32 2147483648, %v2718_v32 }
 0x11e   :  { %v2755_v61 = vadd.f32 1.0, %v1771_v50  ;;  %v1095_v2 = vsub.f32 1.0, %v1094_v53  ;;  %v1575_v62 = vmul.f32 -1.442695, %v361_v49  ;;  %v424_v4 = vadd.f32 %v2568_v56, %v423_v44  ;;  %v2839_v53 = vpop.f32.mrf.mxu3 }
 0x11f   :  { %v1773_v63 = vpop.eup %1772  ;;  %1778 = vpow2.f32 %v1563_v55  ;;  %v1296_v5 = vsel %vm2744_vm0, %v1767_v28, %v1292_v58  ;;  %v1105_v1 = vor.u32 1.1754944e-38, %v1104_v48  ;;  %vm1099_vm6 = vweird.f32 %v1769_v42 }
 0x120   :  { %v749_v0 = vmul.f32 %v1773_v63, %v2718_v32  ;;  %1780 = vrcp.f32 %v2755_v61  ;;  %v1775_v7 = vpop.eup %1774  ;;  %v1301_v8 = vsel %vm2726_vm14, %v1300_v43, %v1296_v5  ;;  %v1096_v9 = vmul.f32 %v1769_v42, %v1095_v2  ;;  %vm1100_vm8 = vmor %vm1098_vm1, %vm1099_vm6  ;;  %v363_v5 = vpop.f32.mrf.mxu1 }
 0x121   :  { %vm753_vm2 = vweird.f32 %v2718_v32  ;;  %1408 = vst.msk [vmem:[%s3157_s3 + $0x160] sm:$0xff] %vm1363_vm5, %v1301_v8  ;;  %vm754_vm4 = vweird.f32 %v1773_v63  ;;  %vm2769_vm7 = vcmp.eq.f32.partialorder %v757_v59, 8.507059e+37  ;;  %v2773_v12 = vadd.f32 1.0, %v1775_v7 }
 0x122   :  { %v750_v6 = vsub.f32 1.0, %v749_v0  ;;  %v1777_v13 = vpop.eup %1776  ;;  %v1097_v51 = vadd.f32 %v1769_v42, %v1096_v9  ;;  %v760_v14 = vor.u32 1.1754944e-38, %v759_v60  ;;  %1782 = vpow2.f32 %v1575_v62  ;;  %vm2785_vm9 = vmor %vm753_vm2, %vm754_vm4 }
 0x123   :  { %v1600_v10 = vmul.f32 -1.442695, %v424_v4  ;;  %v937_v16 = vand.u32 2147483647, %v2755_v61  ;;  %1784 = vrcp.f32 %v2773_v12  ;;  %v391_v3 = vadd.f32 %v2568_v56, %v390_v57 }
 0x124   :  { %v751_v15 = vmul.f32 %v1773_v63, %v750_v6  ;;  %v1101_v20 = vsel %vm1100_vm8, %v1769_v42, %v1097_v51  ;;  %v939_v18 = vand.u32 2147483648, %v2755_v61  ;;  %v1312_v47 = vand.u32 2147483647, %v2773_v12 }
 0x125   :  { %v1779_v19 = vpop.eup %1778  ;;  %v2791_v22 = vadd.f32 1.0, %v1777_v13  ;;  %v1106_v26 = vsel %vm2749_vm3, %v1105_v1, %v1101_v20  ;;  %1786 = vpow2.f32 %v1600_v10  ;;  %vm933_vm10 = vweird.f32 %v2755_v61  ;;  %v2873_v13 = vpop.f32.mrf.mxu2 }
 0x126   :  { %v1781_v23 = vpop.eup %1780  ;;  %v752_v25 = vadd.f32 %v1773_v63, %v751_v15  ;;  %v2795_v28 = vadd.f32 1.0, %v1779_v19  ;;  %1395 = vst.msk [vmem:[%s3157_s3 + $0xf8] sm:$0xff] %vm1363_vm5, %v1106_v26  ;;  %v1314_v32 = vand.u32 2147483648, %v2773_v12  ;;  %v334_v33 = vadd.f32 %v2568_v56, %v333_v29 }
 0x127   :  { %v929_v30 = vmul.f32 %v1781_v23, %v2755_v61  ;;  %vm2809_vm11 = vcmp.eq.f32.partialorder %v937_v16, 8.507059e+37  ;;  %1788 = vrcp.f32 %v2791_v22  ;;  %v1587_v36 = vmul.f32 -1.442695, %v391_v3 }
 0x128   :  { %v756_v34 = vsel %vm2785_vm9, %v1773_v63, %v752_v25  ;;  %v1783_v24 = vpop.eup %1782  ;;  %vm934_vm12 = vweird.f32 %v1781_v23  ;;  %1790 = vrcp.f32 %v2795_v28  ;;  %v940_v41 = vor.u32 1.1754944e-38, %v939_v18 }
 0x129   :  { %v761_v37 = vsel %vm2769_vm7, %v760_v14, %v756_v34  ;;  %v930_v38 = vsub.f32 1.0, %v929_v30  ;;  %v1785_v40 = vpop.eup %1784  ;;  %vm1308_vm13 = vweird.f32 %v2773_v12  ;;  %vm2822_vm14 = vcmp.eq.f32.partialorder %v1312_v47, 8.507059e+37  ;;  %vm2831_vm15 = vmor %vm933_vm10, %vm934_vm12  ;;  %v430_v47 = vpop.f32.mrf.mxu3 }
 0x12a   :  { %1372 = vst.msk [vmem:[%s3157_s3 + $0x40] sm:$0xff] %vm1363_vm5, %v761_v37  ;;  %v1119_v44 = vand.u32 2147483648, %v2791_v22  ;;  %v1304_v39 = vmul.f32 %v1785_v40, %v2773_v12  ;;  %v1315_v45 = vor.u32 1.1754944e-38, %v1314_v32  ;;  %v1117_v42 = vand.u32 2147483647, %v2791_v22 }
 0x12b   :  { %v931_v31 = vmul.f32 %v1781_v23, %v930_v38  ;;  %v1787_v46 = vpop.eup %1786  ;;  %v772_v49 = vand.u32 2147483647, %v2795_v28  ;;  %v774_v50 = vand.u32 2147483648, %v2795_v28  ;;  %v2837_v52 = vadd.f32 1.0, %v1783_v24 }
 0x12c   :  { %1792 = vpow2.f32 %v1587_v36  ;;  %v1305_v55 = vsub.f32 1.0, %v1304_v39  ;;  %vm1309_vm1 = vweird.f32 %v1785_v40  ;;  %v2841_v57 = vadd.f32 1.0, %v1787_v46  ;;  %v365_v39 = vpop.f32.mrf.mxu1 }
 0x12d   :  { %v932_v54 = vadd.f32 %v1781_v23, %v931_v31  ;;  %v1789_v58 = vpop.eup %1788  ;;  %vm1113_vm0 = vweird.f32 %v2791_v22  ;;  %v1120_v59 = vor.u32 1.1754944e-38, %v1119_v44  ;;  %vm768_vm3 = vweird.f32 %v2795_v28  ;;  %vm2858_vm2 = vmor %vm1308_vm13, %vm1309_vm1 }
 0x12e   :  { %1794 = vrcp.f32 %v2837_v52  ;;  %v1791_v60 = vpop.eup %1790  ;;  %v1306_v63 = vmul.f32 %v1785_v40, %v1305_v55  ;;  %v1109_v2 = vmul.f32 %v1789_v58, %v2791_v22  ;;  %vm2849_vm6 = vcmp.eq.f32.partialorder %v1117_v42, 8.507059e+37 }
 0x12f   :  { %v936_v61 = vsel %vm2831_vm15, %v1781_v23, %v932_v54  ;;  %v1564_v4 = vmul.f32 -1.442695, %v334_v33  ;;  %v764_v7 = vmul.f32 %v1791_v60, %v2795_v28  ;;  %vm2863_vm4 = vcmp.eq.f32.partialorder %v772_v49, 8.507059e+37 }
 0x130   :  { %v941_v1 = vsel %vm2809_vm11, %v940_v41, %v936_v61  ;;  %v952_v9 = vand.u32 2147483647, %v2837_v52  ;;  %v1307_v6 = vadd.f32 %v1785_v40, %v1306_v63  ;;  %v1110_v11 = vsub.f32 1.0, %v1109_v2 }
 0x131   :  { %1384 = vst.msk [vmem:[%s3157_s3 + $0xa0] sm:$0xff] %vm1363_vm5, %v941_v1  ;;  %v775_v12 = vor.u32 1.1754944e-38, %v774_v50  ;;  %1796 = vrcp.f32 %v2841_v57  ;;  %vm1114_vm7 = vweird.f32 %v1789_v58  ;;  %v765_v14 = vsub.f32 1.0, %v764_v7 }
 0x132   :  { %v1793_v51 = vpop.eup %1792  ;;  %vm769_vm8 = vweird.f32 %v1791_v60  ;;  %v954_v10 = vand.u32 2147483648, %v2837_v52  ;;  %v1311_v15 = vsel %vm2858_vm2, %v1785_v40, %v1307_v6  ;;  %v1111_v16 = vmul.f32 %v1789_v58, %v1110_v11  ;;  %vm1115_vm12 = vmor %vm1113_vm0, %vm1114_vm7  ;;  %v335_v40 = vpop.f32.mrf.mxu0 }
 0x133   :  { %v2878_v3 = vadd.f32 1.0, %v1793_v51  ;;  %1798 = vpow2.f32 %v1564_v4  ;;  %v1316_v20 = vsel %vm2822_vm14, %v1315_v45, %v1311_v15  ;;  %v766_v21 = vmul.f32 %v1791_v60, %v765_v14  ;;  %vm2893_vm11 = vmor %vm768_vm3, %vm769_vm8 }
 0x134   :  { %v1795_v19 = vpop.eup %1794  ;;  %vm948_vm9 = vweird.f32 %v2837_v52  ;;  %vm2883_vm10 = vcmp.eq.f32.partialorder %v952_v9, 8.507059e+37  ;;  %1409 = vst.msk [vmem:[%s3157_s3 + $0x168] sm:$0xff] %vm1363_vm5, %v1316_v20  ;;  %v1112_v23 = vadd.f32 %v1789_v58, %v1111_v16  ;;  %v1327_v29 = vand.u32 2147483647, %v2841_v57 }
 0x135   :  { %v944_v25 = vmul.f32 %v1795_v19, %v2837_v52  ;;  %1800 = vrcp.f32 %v2878_v3  ;;  %v767_v30 = vadd.f32 %v1791_v60, %v766_v21  ;;  %vm949_vm13 = vweird.f32 %v1795_v19 }
 0x136   :  { %v955_v32 = vor.u32 1.1754944e-38, %v954_v10  ;;  %vm1323_vm14 = vweird.f32 %v2841_v57  ;;  %v1116_v33 = vsel %vm1115_vm12, %v1789_v58, %v1112_v23  ;;  %v364_v35 = vadd.f32 %v2568_v56, %v363_v5  ;;  %vm2931_vm1 = vmor %vm948_vm9, %vm949_vm13 }
 0x137   :  { %v1797_v28 = vpop.eup %1796  ;;  %v945_v34 = vsub.f32 1.0, %v944_v25  ;;  %v426_v36 = vadd.f32 %v2568_v56, %v2780_v17  ;;  %v1121_v24 = vsel %vm2849_vm6, %v1120_v59, %v1116_v33  ;;  %v771_v22 = vsel %vm2893_vm11, %v1791_v60, %v767_v30  ;;  %v398_v59 = vpop.f32.mrf.mxu2 }
 0x138   :  { %v1319_v37 = vmul.f32 %v1797_v28, %v2841_v57  ;;  %v1329_v38 = vand.u32 2147483648, %v2841_v57  ;;  %1396 = vst.msk [vmem:[%s3157_s3 + $0x100] sm:$0xff] %vm1363_vm5, %v1121_v24  ;;  %v776_v17 = vsel %vm2863_vm4, %v775_v12, %v771_v22  ;;  %vm2919_vm15 = vcmp.eq.f32.partialorder %v1327_v29, 8.507059e+37 }
 0x139   :  { %v1799_v41 = vpop.eup %1798  ;;  %v946_v43 = vmul.f32 %v1795_v19, %v945_v34  ;;  %v1132_v31 = vand.u32 2147483647, %v2878_v3  ;;  %1373 = vst.msk [vmem:[%s3157_s3 + $0x48] sm:$0xff] %vm1363_vm5, %v776_v17  ;;  %vm1324_vm0 = vweird.f32 %v1797_v28  ;;  %v1576_v48 = vmul.f32 -1.442695, %v364_v35 }
 0x13a   :  { %v1320_v42 = vsub.f32 1.0, %v1319_v37  ;;  %v2935_v46 = vadd.f32 1.0, %v1799_v41  ;;  %v1601_v54 = vmul.f32 -1.442695, %v426_v36  ;;  %v394_v55 = vadd.f32 %v2568_v56, %v2805_v27  ;;  %vm2947_vm3 = vmor %vm1323_vm14, %vm1324_vm0 }
 0x13b   :  { %v1801_v49 = vpop.eup %1800  ;;  %v947_v50 = vadd.f32 %v1795_v19, %v946_v43  ;;  %v336_v58 = vadd.f32 %v2568_v56, %v335_v40  ;;  %v366_v61 = vadd.f32 %v2568_v56, %v365_v39  ;;  %v1330_v27 = vor.u32 1.1754944e-38, %v1329_v38 }
 0x13c   :  { %v1321_v60 = vmul.f32 %v1797_v28, %v1320_v42  ;;  %v1124_v52 = vmul.f32 %v1801_v49, %v2878_v3  ;;  %1802 = vrcp.f32 %v2935_v46  ;;  %vm1128_vm6 = vweird.f32 %v2878_v3 }
 0x13d   :  { %v951_v63 = vsel %vm2931_vm1, %v1795_v19, %v947_v50  ;;  %v1134_v62 = vand.u32 2147483648, %v2878_v3  ;;  %1804 = vpow2.f32 %v1576_v48  ;;  %vm1129_vm2 = vweird.f32 %v1801_v49 }
 0x13e   :  { %v956_v4 = vsel %vm2883_vm10, %v955_v32, %v951_v63  ;;  %v1322_v5 = vadd.f32 %v1797_v28, %v1321_v60  ;;  %v1125_v1 = vsub.f32 1.0, %v1124_v52  ;;  %vm2959_vm4 = vcmp.eq.f32.partialorder %v1132_v31, 8.507059e+37  ;;  %vm1130_vm8 = vmor %vm1128_vm6, %vm1129_vm2 }
 0x13f   :  { %1385 = vst.msk [vmem:[%s3157_s3 + $0xa8] sm:$0xff] %vm1363_vm5, %v956_v4  ;;  %1806 = vpow2.f32 %v1601_v54  ;;  %v1588_v0 = vmul.f32 -1.442695, %v394_v55  ;;  %v1565_v9 = vmul.f32 -1.442695, %v336_v58  ;;  %v396_v12 = vadd.f32 %v2568_v56, %v2873_v13  ;;  %v400_v3 = vpop.f32.mrf.mxu2 }
 0x140   :  { %v1326_v7 = vsel %vm2947_vm3, %v1797_v28, %v1322_v5  ;;  %v1126_v8 = vmul.f32 %v1801_v49, %v1125_v1  ;;  %v1577_v6 = vmul.f32 -1.442695, %v366_v61  ;;  %v429_v51 = vadd.f32 %v2568_v56, %v2839_v53 }
 0x141   :  { %v1331_v11 = vsel %vm2919_vm15, %v1330_v27, %v1326_v7  ;;  %1808 = vpow2.f32 %v1588_v0  ;;  %v1135_v15 = vor.u32 1.1754944e-38, %v1134_v62  ;;  %vm783_vm7 = vweird.f32 %v2935_v46 }
 0x142   :  { %v1803_v14 = vpop.eup %1802  ;;  %1410 = vst.msk [vmem:[%s3157_s3 + $0x170] sm:$0xff] %vm1363_vm5, %v1331_v11  ;;  %v1127_v10 = vadd.f32 %v1801_v49, %v1126_v8  ;;  %1810 = vpow2.f32 %v1565_v9  ;;  %v787_v16 = vand.u32 2147483647, %v2935_v46  ;;  %v1589_v53 = vmul.f32 -1.442695, %v396_v12 }
 0x143   :  { %v779_v13 = vmul.f32 %v1803_v14, %v2935_v46  ;;  %1812 = vpow2.f32 %v1577_v6  ;;  %v1805_v19 = vpop.eup %1804  ;;  %vm784_vm9 = vweird.f32 %v1803_v14  ;;  %v789_v21 = vand.u32 2147483648, %v2935_v46 }
 0x144   :  { %v1131_v20 = vsel %vm1130_vm8, %v1801_v49, %v1127_v10  ;;  %v1602_v18 = vmul.f32 -1.442695, %v429_v51  ;;  %v2984_v25 = vadd.f32 1.0, %v1805_v19  ;;  %1814 = vpow2.f32 %v1589_v53  ;;  %vm2997_vm10 = vmor %vm783_vm7, %vm784_vm9 }
 0x145   :  { %v1807_v47 = vpop.eup %1806  ;;  %v1136_v23 = vsel %vm2959_vm4, %v1135_v15, %v1131_v20  ;;  %v780_v26 = vsub.f32 1.0, %v779_v13  ;;  %v399_v28 = vadd.f32 %v2568_v56, %v398_v59  ;;  %vm3001_vm11 = vcmp.eq.f32.partialorder %v787_v16, 8.507059e+37 }
 0x146   :  { %1397 = vst.msk [vmem:[%s3157_s3 + $0x108] sm:$0xff] %vm1363_vm5, %v1136_v23  ;;  %v2990_v29 = vadd.f32 1.0, %v1807_v47  ;;  %1816 = vpow2.f32 %v1602_v18  ;;  %v790_v36 = vor.u32 1.1754944e-38, %v789_v21  ;;  %v401_v24 = vadd.f32 %v2568_v56, %v400_v3 }
 0x147   :  { %v1809_v30 = vpop.eup %1808  ;;  %v781_v32 = vmul.f32 %v1803_v14, %v780_v26  ;;  %1818 = vrcp.f32 %v2984_v25  ;;  %v967_v38 = vand.u32 2147483647, %v2984_v25  ;;  %v969_v40 = vand.u32 2147483648, %v2984_v25 }
 0x148   :  { %v1811_v33 = vpop.eup %1810  ;;  %1820 = vrcp.f32 %v2990_v29  ;;  %v3009_v41 = vadd.f32 1.0, %v1809_v30  ;;  %v1342_v17 = vand.u32 2147483647, %v2990_v29  ;;  %v1344_v43 = vand.u32 2147483648, %v2990_v29 }
 0x149   :  { %v1813_v22 = vpop.eup %1812  ;;  %v782_v37 = vadd.f32 %v1803_v14, %v781_v32  ;;  %v3013_v44 = vadd.f32 1.0, %v1811_v33  ;;  %v1590_v45 = vmul.f32 -1.442695, %v399_v28  ;;  %vm963_vm12 = vweird.f32 %v2984_v25 }
 0x14a   :  { %v3015_v31 = vadd.f32 1.0, %v1813_v22  ;;  %v1815_v39 = vpop.eup %1814  ;;  %1822 = vrcp.f32 %v3009_v41  ;;  %v3024_v48 = vmul.f32 -1.442695, %v401_v24  ;;  %vm3030_vm13 = vcmp.eq.f32.partialorder %v967_v38, 8.507059e+37 }
 0x14b   :  { %v786_v56 = vsel %vm2997_vm10, %v1803_v14, %v782_v37  ;;  %1824 = vrcp.f32 %v3013_v44  ;;  %v970_v54 = vor.u32 1.1754944e-38, %v969_v40  ;;  %vm1338_vm14 = vweird.f32 %v2990_v29 }
 0x14c   :  { %v1817_v42 = vpop.eup %1816  ;;  %v791_v46 = vsel %vm3001_vm11, %v790_v36, %v786_v56  ;;  %1826 = vrcp.f32 %v3015_v31  ;;  %vm3037_vm15 = vcmp.eq.f32.partialorder %v1342_v17, 8.507059e+37  ;;  %v1345_v60 = vor.u32 1.1754944e-38, %v1344_v43 }
 0x14d   :  { %v1819_v49 = vpop.eup %1818  ;;  %1374 = vst.msk [vmem:[%s3157_s3 + $0x50] sm:$0xff] %vm1363_vm5, %v791_v46  ;;  %vm1143_vm1 = vweird.f32 %v3009_v41  ;;  %v1147_v61 = vand.u32 2147483647, %v3009_v41  ;;  %v1149_v63 = vand.u32 2147483648, %v3009_v41  ;;  %vm798_vm0 = vweird.f32 %v3013_v44 }
 0x14e   :  { %v1821_v55 = vpop.eup %1820  ;;  %v959_v58 = vmul.f32 %v1819_v49, %v2984_v25  ;;  %vm964_vm3 = vweird.f32 %v1819_v49  ;;  %v802_v27 = vand.u32 2147483647, %v3013_v44  ;;  %v804_v62 = vand.u32 2147483648, %v3013_v44 }
 0x14f   :  { %v1334_v52 = vmul.f32 %v1821_v55, %v2990_v29  ;;  %vm1339_vm6 = vweird.f32 %v1821_v55  ;;  %vm978_vm2 = vweird.f32 %v3015_v31  ;;  %v3049_v1 = vadd.f32 1.0, %v1815_v39  ;;  %vm3055_vm4 = vmor %vm963_vm12, %vm964_vm3 }
 0x150   :  { %v960_v2 = vsub.f32 1.0, %v959_v58  ;;  %v1823_v4 = vpop.eup %1822  ;;  %v982_v8 = vand.u32 2147483647, %v3015_v31  ;;  %1828 = vpow2.f32 %v1590_v45  ;;  %v984_v51 = vand.u32 2147483648, %v3015_v31  ;;  %vm3066_vm7 = vmor %vm1338_vm14, %vm1339_vm6 }
 0x151   :  { %v1335_v5 = vsub.f32 1.0, %v1334_v52  ;;  %v1825_v57 = vpop.eup %1824  ;;  %v1139_v7 = vmul.f32 %v1823_v4, %v3009_v41  ;;  %v3061_v14 = vadd.f32 1.0, %v1817_v42  ;;  %vm1144_vm8 = vweird.f32 %v1823_v4 }
 0x152   :  { %v961_v0 = vmul.f32 %v1819_v49, %v960_v2  ;;  %v1827_v9 = vpop.eup %1826  ;;  %v794_v12 = vmul.f32 %v1825_v57, %v3013_v44  ;;  %vm799_vm9 = vweird.f32 %v1825_v57  ;;  %1830 = vrcp.f32 %v3049_v1  ;;  %vm3080_vm11 = vmor %vm1143_vm1, %vm1144_vm8 }
 0x153   :  { %v1336_v11 = vmul.f32 %v1821_v55, %v1335_v5  ;;  %v1140_v13 = vsub.f32 1.0, %v1139_v7  ;;  %v974_v16 = vmul.f32 %v1827_v9, %v3015_v31  ;;  %vm979_vm10 = vweird.f32 %v1827_v9  ;;  %vm3093_vm12 = vmor %vm798_vm0, %vm799_vm9 }
 0x154   :  { %v962_v10 = vadd.f32 %v1819_v49, %v961_v0  ;;  %v795_v19 = vsub.f32 1.0, %v794_v12  ;;  %v1150_v25 = vor.u32 1.1754944e-38, %v1149_v63  ;;  %v805_v33 = vor.u32 1.1754944e-38, %v804_v62  ;;  %vm3104_vm14 = vmor %vm978_vm2, %vm979_vm10 }
 0x155   :  { %v1337_v53 = vadd.f32 %v1821_v55, %v1336_v11  ;;  %v1141_v21 = vmul.f32 %v1823_v4, %v1140_v13  ;;  %v975_v18 = vsub.f32 1.0, %v974_v16  ;;  %v985_v24 = vor.u32 1.1754944e-38, %v984_v51 }
 0x156   :  { %v966_v20 = vsel %vm3055_vm4, %v1819_v49, %v962_v10  ;;  %v796_v3 = vmul.f32 %v1825_v57, %v795_v19  ;;  %v1829_v29 = vpop.eup %1828  ;;  %1832 = vrcp.f32 %v3061_v14  ;;  %vm983_vm1 = vcmp.eq.f32.partialorder %v982_v8, 8.507059e+37 }
 0x157   :  { %v971_v47 = vsel %vm3030_vm13, %v970_v54, %v966_v20  ;;  %v1341_v23 = vsel %vm3066_vm7, %v1821_v55, %v1337_v53  ;;  %v1142_v32 = vadd.f32 %v1823_v4, %v1141_v21  ;;  %v976_v34 = vmul.f32 %v1827_v9, %v975_v18 }
 0x158   :  { %1386 = vst.msk [vmem:[%s3157_s3 + $0xb0] sm:$0xff] %vm1363_vm5, %v971_v47  ;;  %v1346_v30 = vsel %vm3037_vm15, %v1345_v60, %v1341_v23  ;;  %v797_v35 = vadd.f32 %v1825_v57, %v796_v3  ;;  %vm803_vm13 = vcmp.eq.f32.partialorder %v802_v27, 8.507059e+37  ;;  %vm1148_vm15 = vcmp.eq.f32.partialorder %v1147_v61, 8.507059e+37  ;;  %v1831_v38 = vpop.eup %1830 }
 0x159   :  { %1411 = vst.msk [vmem:[%s3157_s3 + $0x178] sm:$0xff] %vm1363_vm5, %v1346_v30  ;;  %v1146_v22 = vsel %vm3080_vm11, %v1823_v4, %v1142_v32  ;;  %v977_v37 = vadd.f32 %v1827_v9, %v976_v34  ;;  %v615_v17 = vadd.f32 1.0, %v1829_v29  ;;  %1834 = vpow2.f32 %v3024_v48 }
 0x15a   :  { %v1151_v40 = vsel %vm1148_vm15, %v1150_v25, %v1146_v22  ;;  %v801_v41 = vsel %vm3093_vm12, %v1825_v57, %v797_v35  ;;  %v1154_v31 = vmul.f32 %v1831_v38, %v3049_v1  ;;  %v1164_v42 = vand.u32 2147483648, %v3049_v1 }
 0x15b   :  { %1398 = vst.msk [vmem:[%s3157_s3 + $0x110] sm:$0xff] %vm1363_vm5, %v1151_v40  ;;  %v806_v43 = vsel %vm803_vm13, %v805_v33, %v801_v41  ;;  %v981_v44 = vsel %vm3104_vm14, %v1827_v9, %v977_v37  ;;  %1836 = vrcp.f32 %v615_v17  ;;  %vm1159_vm0 = vweird.f32 %v1831_v38 }
 0x15c   :  { %1375 = vst.msk [vmem:[%s3157_s3 + $0x58] sm:$0xff] %vm1363_vm5, %v806_v43  ;;  %v986_v39 = vsel %vm983_vm1, %v985_v24, %v981_v44  ;;  %v1155_v56 = vsub.f32 1.0, %v1154_v31  ;;  %v1833_v45 = vpop.eup %1832  ;;  %v1162_v48 = vand.u32 2147483647, %v3049_v1  ;;  %vm1158_vm3 = vweird.f32 %v3049_v1 }
 0x15d   :  { %1387 = vst.msk [vmem:[%s3157_s3 + $0xb8] sm:$0xff] %vm1363_vm5, %v986_v39  ;;  %v1349_v49 = vmul.f32 %v1833_v45, %v3061_v14  ;;  %vm1353_vm6 = vweird.f32 %v3061_v14  ;;  %v1357_v54 = vand.u32 2147483647, %v3061_v14  ;;  %v1359_v55 = vand.u32 2147483648, %v3061_v14  ;;  %vm1160_vm4 = vmor %vm1158_vm3, %vm1159_vm0 }
 0x15e   :  { %v1156_v46 = vmul.f32 %v1831_v38, %v1155_v56  ;;  %vm1354_vm2 = vweird.f32 %v1833_v45  ;;  %v1165_v61 = vor.u32 1.1754944e-38, %v1164_v42  ;;  %vm1163_vm7 = vcmp.eq.f32.partialorder %v1162_v48, 8.507059e+37 }
 0x15f   :  { %v1835_v50 = vpop.eup %1834  ;;  %v1350_v59 = vsub.f32 1.0, %v1349_v49  ;;  %vm1355_vm8 = vmor %vm1353_vm6, %vm1354_vm2  ;;  %v1360_v4 = vor.u32 1.1754944e-38, %v1359_v55  ;;  %vm1358_vm9 = vcmp.eq.f32.partialorder %v1357_v54, 8.507059e+37  ;;  %v1179_v57 = vand.u32 2147483648, %v615_v17 }
 0x160   :  { %v1157_v58 = vadd.f32 %v1831_v38, %v1156_v46  ;;  %v616_v60 = vadd.f32 1.0, %v1835_v50  ;;  %v1177_v8 = vand.u32 2147483647, %v615_v17  ;;  %vm1173_vm11 = vweird.f32 %v615_v17 }
 0x161   :  { %v1837_v52 = vpop.eup %1836  ;;  %v1351_v2 = vmul.f32 %v1833_v45, %v1350_v59  ;;  %v1180_v12 = vor.u32 1.1754944e-38, %v1179_v57 }
 0x162   :  { %v1161_v63 = vsel %vm1160_vm4, %v1831_v38, %v1157_v58  ;;  %v1169_v27 = vmul.f32 %v1837_v52, %v615_v17  ;;  %1838 = vrcp.f32 %v616_v60  ;;  %vm1174_vm10 = vweird.f32 %v1837_v52 }
 0x163   :  { %v1166_v62 = vsel %vm1163_vm7, %v1165_v61, %v1161_v63  ;;  %v1352_v5 = vadd.f32 %v1833_v45, %v1351_v2  ;;  %vm1175_vm12 = vmor %vm1173_vm11, %vm1174_vm10  ;;  %vm1178_vm13 = vcmp.eq.f32.partialorder %v1177_v8, 8.507059e+37  ;;  %v1194_v13 = vand.u32 2147483648, %v616_v60 }
 0x164   :  { %1399 = vst.msk [vmem:[%s3157_s3 + $0x118] sm:$0xff] %vm1363_vm5, %v1166_v62  ;;  %v1170_v1 = vsub.f32 1.0, %v1169_v27  ;;  %v1192_v53 = vand.u32 2147483647, %v616_v60  ;;  %vm1188_vm15 = vweird.f32 %v616_v60 }
 0x165   :  { %v1356_v0 = vsel %vm1355_vm8, %v1833_v45, %v1352_v5  ;;  %v1195_v20 = vor.u32 1.1754944e-38, %v1194_v13 }
 0x166   :  { %v1171_v7 = vmul.f32 %v1837_v52, %v1170_v1  ;;  %v1361_v9 = vsel %vm1358_vm9, %v1360_v4, %v1356_v0  ;;  %vm1193_vm0 = vcmp.eq.f32.partialorder %v1192_v53, 8.507059e+37 }
 0x167   :  { %1412 = vst.msk [vmem:[%s3157_s3 + $0x180] sm:$0xff] %vm1363_vm5, %v1361_v9 }
 0x168   :  { %v1172_v6 = vadd.f32 %v1837_v52, %v1171_v7  ;;  %v1839_v11 = vpop.eup %1838 }
 0x169   :  { %v1184_v14 = vmul.f32 %v1839_v11, %v616_v60  ;;  %vm1189_vm14 = vweird.f32 %v1839_v11 }
 0x16a   :  { %v1176_v51 = vsel %vm1175_vm12, %v1837_v52, %v1172_v6  ;;  %vm1190_vm1 = vmor %vm1188_vm15, %vm1189_vm14 }
 0x16b   :  { %v1181_v10 = vsel %vm1178_vm13, %v1180_v12, %v1176_v51  ;;  %v1185_v15 = vsub.f32 1.0, %v1184_v14 }
 0x16c   :  { %1400 = vst.msk [vmem:[%s3157_s3 + $0x120] sm:$0xff] %vm1363_vm5, %v1181_v10 }
 0x16d   :  { %v1186_v16 = vmul.f32 %v1839_v11, %v1185_v15 }
 0x16f   :  { %v1187_v19 = vadd.f32 %v1839_v11, %v1186_v16 }
 0x171   :  { %v1191_v21 = vsel %vm1190_vm1, %v1839_v11, %v1187_v19 }
 0x172   :  { %v1196_v18 = vsel %vm1193_vm0, %v1195_v20, %v1191_v21 }
 0x173   :  { %1401 = vst.msk [vmem:[%s3157_s3 + $0x128] sm:$0xff] %vm1363_vm5, %v1196_v18 }

</bundles_post_ra>
